<compile_context>
chip_gen: v6e
topology: v6e:2x2x1
jax: 0.10.0
libtpu: 0.0.40
codegen_flags: <defaults>
</compile_context>

<pallas_src>
import functools

import jax
import jax.numpy as jnp
from jax.experimental import pallas as pl
from jax.experimental.pallas import tpu as pltpu

EPS = 1e-5


def _row_tile(h, w, max_elems=1024):
    """Largest divisor th of h with th*w <= max_elems, preferring >= 2 grid steps."""
    divs = [d for d in range(1, h + 1) if h % d == 0]
    cands = [d for d in divs if d * w <= max_elems] or [1]
    th = max(cands)
    if th == h and h > 1:
        smaller = [d for d in cands if d < h]
        if smaller:
            th = max(smaller)
    return th


# ---------------------------------------------------------------------------
# Kernel 1: ConvTranspose2d(k=2, s=2) upsample (interleave folded into output)
# ---------------------------------------------------------------------------
def _upsample2x2_kernel(x_ref, w_ref, b_ref, o_ref, *, th, W1, Cin):
    # x_ref: (1, th, W1, Cin)       low-res input rows
    # w_ref: (Cin, 4*Cin)           columns ordered (kh, kw, c_out)
    # b_ref: (1, 4*Cin)
    # o_ref: (1, th, 2, W1, 2*Cin)  o[0,h,kh,w,kw*Cin+c] == out[2h+kh, 2w+kw, c]
    x = x_ref[0].astype(jnp.float32).reshape(th * W1, Cin)
    for kh in range(2):
        wk = w_ref[:, kh * 2 * Cin:(kh + 1) * 2 * Cin]   # (Cin, 2*Cin), cols (kw, c)
        bk = b_ref[:, kh * 2 * Cin:(kh + 1) * 2 * Cin]   # (1, 2*Cin)
        a = jnp.dot(x, wk, preferred_element_type=jnp.float32) + bk
        o_ref[0, :, kh] = a.reshape(th, W1, 2 * Cin)


def upsample2x2(x1, w_mat, b_vec):
    """ConvTranspose2d(Cin, Cin, kernel=2, stride=2). x1: (N, H1, W1, Cin) NHWC."""
    N, H1, W1, Cin = x1.shape
    th = _row_tile(H1, W1)
    kern = functools.partial(_upsample2x2_kernel, th=th, W1=W1, Cin=Cin)
    y = pl.pallas_call(
        kern,
        out_shape=jax.ShapeDtypeStruct((N, H1, 2, W1, 2 * Cin), jnp.float32),
        grid=(N, H1 // th),
        in_specs=[
            pl.BlockSpec((1, th, W1, Cin), lambda n, r: (n, r, 0, 0)),
            pl.BlockSpec((Cin, 4 * Cin), lambda n, r: (0, 0)),
            pl.BlockSpec((1, 4 * Cin), lambda n, r: (0, 0)),
        ],
        out_specs=pl.BlockSpec((1, th, 2, W1, 2 * Cin),
                               lambda n, r: (n, r, 0, 0, 0)),
        compiler_params=pltpu.CompilerParams(
            dimension_semantics=("parallel", "parallel")),
    )(x1, w_mat, b_vec)
    # Order-preserving reshape (n, h, kh, w, kw, c) -> NHWC; no transpose pass.
    return y.reshape(N, 2 * H1, 2 * W1, Cin)


# ---------------------------------------------------------------------------
# Shared conv helpers (traced inside the kernels)
# ---------------------------------------------------------------------------
def _zero_pad_into(p_ref, img, H, W):
    """Write img (H, W, C) into the interior of the (H+2, W+2, C) VMEM scratch."""
    p_ref[...] = jnp.zeros_like(p_ref)
    p_ref[1:H + 1, 1:W + 1, :] = img


def _im2col_dot(p_ref, w_ref, r0, th, W, C):
    """One 3x3-conv row tile as a single MXU matmul with K = 9*C."""
    win = p_ref[pl.ds(r0, th + 2), :, :]                       # (th+2, W+2, C)
    taps = [win[dh:dh + th, dw:dw + W, :]
            for dh in range(3) for dw in range(3)]
    patches = jnp.concatenate(taps, axis=-1).reshape(th * W, 9 * C)
    return jnp.dot(patches, w_ref[...], preferred_element_type=jnp.float32)


# ---------------------------------------------------------------------------
# Kernel 2: conv3x3(pad=1) over implicit concat([xa, xb]) + BN statistics
# ---------------------------------------------------------------------------
def _conv3x3_two_src_kernel(xa_ref, xb_ref, wa_ref, wb_ref, b_ref,
                            out_ref, sum_ref, sq_ref, pa_ref, pb_ref,
                            *, H, W, th, Ca, Cb, Cout):
    rt = pl.program_id(1)

    @pl.when(rt == 0)
    def _init():
        sum_ref[...] = jnp.zeros_like(sum_ref)
        sq_ref[...] = jnp.zeros_like(sq_ref)
        _zero_pad_into(pa_ref, xa_ref[0].astype(jnp.float32), H, W)
        _zero_pad_into(pb_ref, xb_ref[0].astype(jnp.float32), H, W)

    r0 = rt * th
    if th % 8 == 0:
        r0 = pl.multiple_of(r0, 8)
    acc = jnp.broadcast_to(b_ref[...], (th * W, Cout)).astype(jnp.float32)
    acc = acc + _im2col_dot(pa_ref, wa_ref, r0, th, W, Ca)
    acc = acc + _im2col_dot(pb_ref, wb_ref, r0, th, W, Cb)

    out_ref[0] = acc.reshape(th, W, Cout).astype(out_ref.dtype)
    sum_ref[...] += jnp.sum(acc, axis=0).reshape(1, 1, Cout)
    sq_ref[...] += jnp.sum(acc * acc, axis=0).reshape(1, 1, Cout)


def conv3x3_concat_bn_stats(xa, xb, wa, wb, b):
    N, H, W, Ca = xa.shape
    Cb = xb.shape[-1]
    Cout = wa.shape[-1]
    th = _row_tile(H, W)
    kern = functools.partial(_conv3x3_two_src_kernel, H=H, W=W, th=th,
                             Ca=Ca, Cb=Cb, Cout=Cout)
    return pl.pallas_call(
        kern,
        out_shape=(
            jax.ShapeDtypeStruct((N, H, W, Cout), jnp.float32),
            jax.ShapeDtypeStruct((N, 1, Cout), jnp.float32),
            jax.ShapeDtypeStruct((N, 1, Cout), jnp.float32),
        ),
        grid=(N, H // th),
        in_specs=[
            pl.BlockSpec((1, H, W, Ca), lambda n, r: (n, 0, 0, 0)),
            pl.BlockSpec((1, H, W, Cb), lambda n, r: (n, 0, 0, 0)),
            pl.BlockSpec((9 * Ca, Cout), lambda n, r: (0, 0)),
            pl.BlockSpec((9 * Cb, Cout), lambda n, r: (0, 0)),
            pl.BlockSpec((1, Cout), lambda n, r: (0, 0)),
        ],
        out_specs=(
            pl.BlockSpec((1, th, W, Cout), lambda n, r: (n, r, 0, 0)),
            pl.BlockSpec((1, 1, Cout), lambda n, r: (n, 0, 0)),
            pl.BlockSpec((1, 1, Cout), lambda n, r: (n, 0, 0)),
        ),
        scratch_shapes=[
            pltpu.VMEM((H + 2, W + 2, Ca), jnp.float32),
            pltpu.VMEM((H + 2, W + 2, Cb), jnp.float32),
        ],
        compiler_params=pltpu.CompilerParams(
            dimension_semantics=("parallel", "arbitrary")),
    )(xa, xb, wa, wb, b)


# ---------------------------------------------------------------------------
# Kernel 3: conv3x3(pad=1) over relu(x*scale+shift) (fused BN+ReLU) + BN stats
# ---------------------------------------------------------------------------
def _conv3x3_affine_src_kernel(x_ref, sc_ref, sh_ref, w_ref, b_ref,
                               out_ref, sum_ref, sq_ref, p_ref,
                               *, H, W, th, C, Cout):
    rt = pl.program_id(1)

    @pl.when(rt == 0)
    def _init():
        sum_ref[...] = jnp.zeros_like(sum_ref)
        sq_ref[...] = jnp.zeros_like(sq_ref)
        h = x_ref[0].astype(jnp.float32) * sc_ref[0] + sh_ref[0]
        _zero_pad_into(p_ref, jnp.maximum(h, 0.0), H, W)

    r0 = rt * th
    if th % 8 == 0:
        r0 = pl.multiple_of(r0, 8)
    acc = jnp.broadcast_to(b_ref[...], (th * W, Cout)).astype(jnp.float32)
    acc = acc + _im2col_dot(p_ref, w_ref, r0, th, W, C)

    out_ref[0] = acc.reshape(th, W, Cout).astype(out_ref.dtype)
    sum_ref[...] += jnp.sum(acc, axis=0).reshape(1, 1, Cout)
    sq_ref[...] += jnp.sum(acc * acc, axis=0).reshape(1, 1, Cout)


def conv3x3_affine_bn_stats(x, scale, shift, w, b):
    N, H, W, C = x.shape
    Cout = w.shape[-1]
    th = _row_tile(H, W)
    kern = functools.partial(_conv3x3_affine_src_kernel, H=H, W=W, th=th,
                             C=C, Cout=Cout)
    return pl.pallas_call(
        kern,
        out_shape=(
            jax.ShapeDtypeStruct((N, H, W, Cout), jnp.float32),
            jax.ShapeDtypeStruct((N, 1, Cout), jnp.float32),
            jax.ShapeDtypeStruct((N, 1, Cout), jnp.float32),
        ),
        grid=(N, H // th),
        in_specs=[
            pl.BlockSpec((1, H, W, C), lambda n, r: (n, 0, 0, 0)),
            pl.BlockSpec((1, C), lambda n, r: (0, 0)),
            pl.BlockSpec((1, C), lambda n, r: (0, 0)),
            pl.BlockSpec((9 * C, Cout), lambda n, r: (0, 0)),
            pl.BlockSpec((1, Cout), lambda n, r: (0, 0)),
        ],
        out_specs=(
            pl.BlockSpec((1, th, W, Cout), lambda n, r: (n, r, 0, 0)),
            pl.BlockSpec((1, 1, Cout), lambda n, r: (n, 0, 0)),
            pl.BlockSpec((1, 1, Cout), lambda n, r: (n, 0, 0)),
        ),
        scratch_shapes=[pltpu.VMEM((H + 2, W + 2, C), jnp.float32)],
        compiler_params=pltpu.CompilerParams(
            dimension_semantics=("parallel", "arbitrary")),
    )(x, scale, shift, w, b)


# ---------------------------------------------------------------------------
# Kernel 4: per-channel affine (folded BatchNorm) + ReLU (final layer)
# ---------------------------------------------------------------------------
def _bn_relu_kernel(x_ref, sc_ref, sh_ref, o_ref):
    y = x_ref[...].astype(jnp.float32) * sc_ref[0] + sh_ref[0]
    o_ref[...] = jnp.maximum(y, 0.0).astype(o_ref.dtype)


def bn_relu(x, scale, shift):
    N, H, W, C = x.shape
    th = _row_tile(H, W)
    return pl.pallas_call(
        _bn_relu_kernel,
        out_shape=jax.ShapeDtypeStruct((N, H, W, C), jnp.float32),
        grid=(N, H // th),
        in_specs=[
            pl.BlockSpec((1, th, W, C), lambda n, r: (n, r, 0, 0)),
            pl.BlockSpec((1, C), lambda n, r: (0, 0)),
            pl.BlockSpec((1, C), lambda n, r: (0, 0)),
        ],
        out_specs=pl.BlockSpec((1, th, W, C), lambda n, r: (n, r, 0, 0)),
        compiler_params=pltpu.CompilerParams(
            dimension_semantics=("parallel", "parallel")),
    )(x, scale, shift)


# ---------------------------------------------------------------------------
# Glue: BN statistics finalize (training-mode semantics, biased variance)
# ---------------------------------------------------------------------------
def bn_scale_shift(ch_sum, ch_sumsq, count, gamma, beta):
    s = jnp.sum(ch_sum, axis=(0, 1))
    q = jnp.sum(ch_sumsq, axis=(0, 1))
    mean = s / count
    var = jnp.maximum(q / count - mean * mean, 0.0)
    scale = gamma * jax.lax.rsqrt(var + EPS)
    shift = beta - mean * scale
    return scale.reshape(1, -1), shift.reshape(1, -1)


# ---------------------------------------------------------------------------
# Full Up.forward
# ---------------------------------------------------------------------------
def up_forward(x1_nchw, x2_nchw, p):
    N, Cin, H1, W1 = x1_nchw.shape
    x1 = jnp.transpose(x1_nchw, (0, 2, 3, 1))          # NHWC
    x2 = jnp.transpose(x2_nchw, (0, 2, 3, 1))          # NHWC

    # --- ConvTranspose2d(in_ch, in_ch, kernel=2, stride=2) ---
    # torch weight (Cin, Cout, kh, kw) -> (Cin, (kh, kw, Cout))
    w_up = jnp.transpose(p["w_up"], (0, 2, 3, 1)).reshape(Cin, 4 * Cin)
    b_up = jnp.tile(p["b_up"], 4).reshape(1, 4 * Cin)
    x1_up = upsample2x2(x1, w_up, b_up)                 # (N, 2H1, 2W1, Cin)

    # --- pad x2, reproducing the module's diffX/diffY convention
    #     (no-op when the spatial sizes already match, the standard U-Net case)
    diffX = x1_up.shape[1] - x2.shape[1]                # torch: x1.size(2) - x2.size(2)
    diffY = x1_up.shape[2] - x2.shape[2]                # torch: x1.size(3) - x2.size(3)
    x2 = jnp.pad(x2, ((0, 0),
                      (diffY // 2, int(diffY / 2)),     # H (second F.pad pair)
                      (diffX // 2, int(diffX / 2)),     # W (first F.pad pair)
                      (0, 0)))

    Nb, H, W, _ = x1_up.shape
    count = float(Nb * H * W)
    Cout = p["w1"].shape[-1]

    # --- double_conv: (conv3x3 -> BN -> ReLU) x 2 ---
    # conv1 over the implicit concat([x2, x1_up]) via channel-split weights
    # (the concatenated (N, H, W, 2*Cin) tensor is never materialized).
    wa = p["w1"][:, :, :Cin, :].reshape(9 * Cin, Cout)
    wb = p["w1"][:, :, Cin:, :].reshape(9 * Cin, Cout)
    c1, s1, q1 = conv3x3_concat_bn_stats(x2, x1_up, wa, wb,
                                         p["b1"].reshape(1, Cout))
    sc1, sh1 = bn_scale_shift(s1, q1, count, p["gamma1"], p["beta1"])

    # conv2 with layer-1 BN + ReLU (and the zero pad) fused into the input read.
    w2 = p["w2"].reshape(9 * Cout, Cout)
    c2, s2, q2 = conv3x3_affine_bn_stats(c1, sc1, sh1, w2,
                                         p["b2"].reshape(1, Cout))
    sc2, sh2 = bn_scale_shift(s2, q2, count, p["gamma2"], p["beta2"])

    h2 = bn_relu(c2, sc2, sh2)
    # TODO(synk): the final NHWC->NCHW conversion is left to XLA for API parity;
    # keeping NHWC at the caller would save one more HBM pass.
    return jnp.transpose(h2, (0, 3, 1, 2))


# ---------------------------------------------------------------------------
# Deterministic parameter init (shapes from the module's __init__)
# ---------------------------------------------------------------------------
def init_params(key, in_ch, out_ch):
    ks = jax.random.split(key, 8)
    cc = 2 * in_ch  # double_conv input channels

    def conv_hwio(k, cin, cout):  # stored directly in HWIO for the kernels
        return 0.1 * jax.random.normal(k, (3, 3, cin, cout), jnp.float32)

    return dict(
        # ConvTranspose2d(in_ch, in_ch, 2, 2): weight (Cin, Cout, 2, 2)
        w_up=0.1 * jax.random.normal(ks[0], (in_ch, in_ch, 2, 2), jnp.float32),
        b_up=0.1 * jax.random.normal(ks[1], (in_ch,), jnp.float32),
        # double_conv(2*in_ch, out_ch)
        w1=conv_hwio(ks[2], cc, out_ch),
        b1=0.1 * jax.random.normal(ks[3], (out_ch,), jnp.float32),
        gamma1=1.0 + 0.1 * jax.random.normal(ks[4], (out_ch,), jnp.float32),
        beta1=0.1 * jax.random.normal(ks[5], (out_ch,), jnp.float32),
        w2=conv_hwio(ks[6], out_ch, out_ch),
        b2=0.1 * jax.random.normal(ks[7], (out_ch,), jnp.float32),
        gamma2=jnp.ones((out_ch,), jnp.float32),
        beta2=jnp.zeros((out_ch,), jnp.float32),
    )


if __name__ == "__main__":
    key = jax.random.PRNGKey(0)
    k_p, k_x1, k_x2 = jax.random.split(key, 3)

    N, in_ch, out_ch = 2, 4, 4
    H, W = 16, 16
    # x1 is the low-resolution feature map (gets upsampled 2x), x2 the skip.
    x1 = jax.random.normal(k_x1, (N, in_ch, H // 2, W // 2), jnp.float32)
    x2 = jax.random.normal(k_x2, (N, in_ch, H, W), jnp.float32)

    params = init_params(k_p, in_ch, out_ch)
    out = jax.jit(up_forward)(x1, x2, params)
    jax.block_until_ready(out)

    assert out.shape == (N, out_ch, H, W), out.shape
    assert bool(jnp.all(jnp.isfinite(out)))
    print("KERNEL_OK")
</pallas_src>

<mosaic_0001>
module attributes {stable_mosaic.version = 11 : i64} {
  func.func @_upsample2x2_kernel(%arg0: i32, %arg1: i32, %arg2: memref<1x4x8x4xf32, #tpu.memory_space<vmem>>, %arg3: memref<4x16xf32, #tpu.memory_space<vmem>>, %arg4: memref<1x16xf32, #tpu.memory_space<vmem>>, %arg5: memref<1x4x2x8x8xf32, #tpu.memory_space<vmem>>) attributes {dimension_semantics = [#tpu.dimension_semantics<parallel>, #tpu.dimension_semantics<parallel>], iteration_bounds = array<i64: 2, 2>, scalar_prefetch = 0 : i64, scratch_operands = 0 : i64, tpu.core_type = #tpu.core_type<tc>, window_params = [{transform_indices = @transform_0, window_bounds = array<i64: 1, 4, 8, 4>}, {pipeline_mode = #tpu.pipeline_mode<synchronous>, transform_indices = @transform_1, window_bounds = array<i64: 4, 16>}, {pipeline_mode = #tpu.pipeline_mode<synchronous>, transform_indices = @transform_2, window_bounds = array<i64: 1, 16>}, {transform_indices = @transform_3, window_bounds = array<i64: 1, 4, 2, 8, 8>}]} {
    %c0 = arith.constant 0 : index
    %c0_0 = arith.constant 0 : index
    %c0_1 = arith.constant 0 : index
    %c0_2 = arith.constant 0 : index
    %0 = vector.load %arg2[%c0, %c0_0, %c0_1, %c0_2] : memref<1x4x8x4xf32, #tpu.memory_space<vmem>>, vector<1x4x8x4xf32>
    %1 = vector.shape_cast %0 : vector<1x4x8x4xf32> to vector<4x8x4xf32>
    %2 = vector.shape_cast %1 : vector<4x8x4xf32> to vector<32x4xf32>
    %c0_3 = arith.constant 0 : index
    %c0_4 = arith.constant 0 : index
    %3 = vector.load %arg3[%c0_3, %c0_4] : memref<4x16xf32, #tpu.memory_space<vmem>>, vector<4x8xf32>
    %c0_5 = arith.constant 0 : index
    %c0_6 = arith.constant 0 : index
    %4 = vector.load %arg4[%c0_5, %c0_6] : memref<1x16xf32, #tpu.memory_space<vmem>>, vector<1x8xf32>
    %cst = arith.constant dense<0.000000e+00> : vector<32x8xf32>
    %5 = tpu.matmul %2, %3, %cst {dimension_numbers = #tpu.dot_dimension_numbers<[1], [0], [0], [1], [0, 0, 1, 1], [], []>} : vector<32x4xf32>, vector<4x8xf32>, vector<32x8xf32> -> vector<32x8xf32>
    %6 = vector.broadcast %4 : vector<1x8xf32> to vector<32x8xf32>
    %7 = arith.addf %5, %6 : vector<32x8xf32>
    %8 = vector.shape_cast %7 : vector<32x8xf32> to vector<4x8x8xf32>
    %c0_7 = arith.constant 0 : index
    %c0_8 = arith.constant 0 : index
    %c0_9 = arith.constant 0 : index
    %c0_10 = arith.constant 0 : index
    %c0_11 = arith.constant 0 : index
    %9 = vector.load %arg5[%c0_7, %c0_8, %c0_9, %c0_10, %c0_11] : memref<1x4x2x8x8xf32, #tpu.memory_space<vmem>>, vector<1x4x1x8x8xf32>
    %10 = vector.shape_cast %9 : vector<1x4x1x8x8xf32> to vector<4x8x8xf32>
    %11 = vector.shape_cast %8 : vector<4x8x8xf32> to vector<1x4x1x8x8xf32>
    tpu.vector_store %arg5[%c0_7, %c0_8, %c0_9, %c0_10, %c0_11], %11 {strides = array<i32>} : memref<1x4x2x8x8xf32, #tpu.memory_space<vmem>>, vector<1x4x1x8x8xf32>,
    %c0_12 = arith.constant 0 : index
    %c8 = arith.constant 8 : index
    %12 = vector.load %arg3[%c0_12, %c8] : memref<4x16xf32, #tpu.memory_space<vmem>>, vector<4x8xf32>
    %c0_13 = arith.constant 0 : index
    %c8_14 = arith.constant 8 : index
    %13 = vector.load %arg4[%c0_13, %c8_14] : memref<1x16xf32, #tpu.memory_space<vmem>>, vector<1x8xf32>
    %cst_15 = arith.constant dense<0.000000e+00> : vector<32x8xf32>
    %14 = tpu.matmul %2, %12, %cst_15 {dimension_numbers = #tpu.dot_dimension_numbers<[1], [0], [0], [1], [0, 0, 1, 1], [], []>} : vector<32x4xf32>, vector<4x8xf32>, vector<32x8xf32> -> vector<32x8xf32>
    %15 = vector.broadcast %13 : vector<1x8xf32> to vector<32x8xf32>
    %16 = arith.addf %14, %15 : vector<32x8xf32>
    %17 = vector.shape_cast %16 : vector<32x8xf32> to vector<4x8x8xf32>
    %c0_16 = arith.constant 0 : index
    %c0_17 = arith.constant 0 : index
    %c1 = arith.constant 1 : index
    %c0_18 = arith.constant 0 : index
    %c0_19 = arith.constant 0 : index
    %18 = vector.load %arg5[%c0_16, %c0_17, %c1, %c0_18, %c0_19] : memref<1x4x2x8x8xf32, #tpu.memory_space<vmem>>, vector<1x4x1x8x8xf32>
    %19 = vector.shape_cast %18 : vector<1x4x1x8x8xf32> to vector<4x8x8xf32>
    %20 = vector.shape_cast %17 : vector<4x8x8xf32> to vector<1x4x1x8x8xf32>
    tpu.vector_store %arg5[%c0_16, %c0_17, %c1, %c0_18, %c0_19], %20 {strides = array<i32>} : memref<1x4x2x8x8xf32, #tpu.memory_space<vmem>>, vector<1x4x1x8x8xf32>,
    return
  }
  func.func @transform_0(%arg0: i32, %arg1: i32) -> (i32, i32, i32, i32) {
    %c0_i32 = arith.constant 0 : i32
    %c0_i32_0 = arith.constant 0 : i32
    %c0_i32_1 = arith.constant 0 : i32
    return %arg0, %arg1, %c0_i32, %c0_i32_0 : i32, i32, i32, i32
  }
  func.func @transform_1(%arg0: i32, %arg1: i32) -> (i32, i32) {
    %c0_i32 = arith.constant 0 : i32
    %c0_i32_0 = arith.constant 0 : i32
    %c0_i32_1 = arith.constant 0 : i32
    return %c0_i32, %c0_i32_0 : i32, i32
  }
  func.func @transform_2(%arg0: i32, %arg1: i32) -> (i32, i32) {
    %c0_i32 = arith.constant 0 : i32
    %c0_i32_0 = arith.constant 0 : i32
    %c0_i32_1 = arith.constant 0 : i32
    return %c0_i32, %c0_i32_0 : i32, i32
  }
  func.func @transform_3(%arg0: i32, %arg1: i32) -> (i32, i32, i32, i32, i32) {
    %c0_i32 = arith.constant 0 : i32
    %c0_i32_0 = arith.constant 0 : i32
    %c0_i32_1 = arith.constant 0 : i32
    %c0_i32_2 = arith.constant 0 : i32
    return %arg0, %arg1, %c0_i32, %c0_i32_0, %c0_i32_1 : i32, i32, i32, i32, i32
  }
}

module attributes {stable_mosaic.version = 11 : i64} {
  func.func @_conv3x3_two_src_kernel(%arg0: i32, %arg1: i32, %arg2: memref<1x16x16x4xf32, #tpu.memory_space<vmem>>, %arg3: memref<1x16x16x4xf32, #tpu.memory_space<vmem>>, %arg4: memref<36x4xf32, #tpu.memory_space<vmem>>, %arg5: memref<36x4xf32, #tpu.memory_space<vmem>>, %arg6: memref<1x4xf32, #tpu.memory_space<vmem>>, %arg7: memref<1x8x16x4xf32, #tpu.memory_space<vmem>>, %arg8: memref<1x1x4xf32, #tpu.memory_space<vmem>>, %arg9: memref<1x1x4xf32, #tpu.memory_space<vmem>>, %arg10: memref<18x18x4xf32, #tpu.memory_space<vmem>>, %arg11: memref<18x18x4xf32, #tpu.memory_space<vmem>>) attributes {dimension_semantics = [#tpu.dimension_semantics<parallel>, #tpu.dimension_semantics<arbitrary>], iteration_bounds = array<i64: 2, 2>, scalar_prefetch = 0 : i64, scratch_operands = 2 : i64, tpu.core_type = #tpu.core_type<tc>, window_params = [{transform_indices = @transform_0, window_bounds = array<i64: 1, 16, 16, 4>}, {transform_indices = @transform_1, window_bounds = array<i64: 1, 16, 16, 4>}, {pipeline_mode = #tpu.pipeline_mode<synchronous>, transform_indices = @transform_2, window_bounds = array<i64: 36, 4>}, {pipeline_mode = #tpu.pipeline_mode<synchronous>, transform_indices = @transform_3, window_bounds = array<i64: 36, 4>}, {pipeline_mode = #tpu.pipeline_mode<synchronous>, transform_indices = @transform_4, window_bounds = array<i64: 1, 4>}, {transform_indices = @transform_5, window_bounds = array<i64: 1, 8, 16, 4>}, {transform_indices = @transform_6, window_bounds = array<i64: 1, 1, 4>}, {transform_indices = @transform_7, window_bounds = array<i64: 1, 1, 4>}]} {
    %c0_i32 = arith.constant 0 : i32
    %0 = arith.cmpi eq, %arg1, %c0_i32 : i32
    %1 = arith.extui %0 : i1 to i32
    %c0_i32_0 = arith.constant 0 : i32
    %2 = arith.cmpi ne, %1, %c0_i32_0 : i32
    scf.if %2 {
      %cst_29 = arith.constant 0.000000e+00 : f32
      %55 = vector.broadcast %cst_29 : f32 to vector<1x1x4xf32>
      %c0_30 = arith.constant 0 : index
      %c0_31 = arith.constant 0 : index
      %c0_32 = arith.constant 0 : index
      %56 = vector.load %arg8[%c0_30, %c0_31, %c0_32] : memref<1x1x4xf32, #tpu.memory_space<vmem>>, vector<1x1x4xf32>
      tpu.vector_store %arg8[%c0_30, %c0_31, %c0_32], %55 {strides = array<i32>} : memref<1x1x4xf32, #tpu.memory_space<vmem>>, vector<1x1x4xf32>,
      %cst_33 = arith.constant 0.000000e+00 : f32
      %57 = vector.broadcast %cst_33 : f32 to vector<1x1x4xf32>
      %c0_34 = arith.constant 0 : index
      %c0_35 = arith.constant 0 : index
      %c0_36 = arith.constant 0 : index
      %58 = vector.load %arg9[%c0_34, %c0_35, %c0_36] : memref<1x1x4xf32, #tpu.memory_space<vmem>>, vector<1x1x4xf32>
      tpu.vector_store %arg9[%c0_34, %c0_35, %c0_36], %57 {strides = array<i32>} : memref<1x1x4xf32, #tpu.memory_space<vmem>>, vector<1x1x4xf32>,
      %c0_37 = arith.constant 0 : index
      %c0_38 = arith.constant 0 : index
      %c0_39 = arith.constant 0 : index
      %c0_40 = arith.constant 0 : index
      %59 = vector.load %arg2[%c0_37, %c0_38, %c0_39, %c0_40] : memref<1x16x16x4xf32, #tpu.memory_space<vmem>>, vector<1x16x16x4xf32>
      %60 = vector.shape_cast %59 : vector<1x16x16x4xf32> to vector<16x16x4xf32>
      %cst_41 = arith.constant 0.000000e+00 : f32
      %61 = vector.broadcast %cst_41 : f32 to vector<18x18x4xf32>
      %c0_42 = arith.constant 0 : index
      %c0_43 = arith.constant 0 : index
      %c0_44 = arith.constant 0 : index
      %62 = vector.load %arg10[%c0_42, %c0_43, %c0_44] : memref<18x18x4xf32, #tpu.memory_space<vmem>>, vector<18x18x4xf32>
      tpu.vector_store %arg10[%c0_42, %c0_43, %c0_44], %61 {strides = array<i32>} : memref<18x18x4xf32, #tpu.memory_space<vmem>>, vector<18x18x4xf32>,
      %c1 = arith.constant 1 : index
      %c1_45 = arith.constant 1 : index
      %c0_46 = arith.constant 0 : index
      %63 = vector.load %arg10[%c1, %c1_45, %c0_46] : memref<18x18x4xf32, #tpu.memory_space<vmem>>, vector<16x16x4xf32>
      tpu.vector_store %arg10[%c1, %c1_45, %c0_46], %60 {strides = array<i32>} : memref<18x18x4xf32, #tpu.memory_space<vmem>>, vector<16x16x4xf32>,
      %c0_47 = arith.constant 0 : index
      %c0_48 = arith.constant 0 : index
      %c0_49 = arith.constant 0 : index
      %c0_50 = arith.constant 0 : index
      %64 = vector.load %arg3[%c0_47, %c0_48, %c0_49, %c0_50] : memref<1x16x16x4xf32, #tpu.memory_space<vmem>>, vector<1x16x16x4xf32>
      %65 = vector.shape_cast %64 : vector<1x16x16x4xf32> to vector<16x16x4xf32>
      %cst_51 = arith.constant 0.000000e+00 : f32
      %66 = vector.broadcast %cst_51 : f32 to vector<18x18x4xf32>
      %c0_52 = arith.constant 0 : index
      %c0_53 = arith.constant 0 : index
      %c0_54 = arith.constant 0 : index
      %67 = vector.load %arg11[%c0_52, %c0_53, %c0_54] : memref<18x18x4xf32, #tpu.memory_space<vmem>>, vector<18x18x4xf32>
      tpu.vector_store %arg11[%c0_52, %c0_53, %c0_54], %66 {strides = array<i32>} : memref<18x18x4xf32, #tpu.memory_space<vmem>>, vector<18x18x4xf32>,
      %c1_55 = arith.constant 1 : index
      %c1_56 = arith.constant 1 : index
      %c0_57 = arith.constant 0 : index
      %68 = vector.load %arg11[%c1_55, %c1_56, %c0_57] : memref<18x18x4xf32, #tpu.memory_space<vmem>>, vector<16x16x4xf32>
      tpu.vector_store %arg11[%c1_55, %c1_56, %c0_57], %65 {strides = array<i32>} : memref<18x18x4xf32, #tpu.memory_space<vmem>>, vector<16x16x4xf32>,
    } else {
    }
    %c8_i32 = arith.constant 8 : i32
    %3 = arith.muli %arg1, %c8_i32 : i32
    %4 = tpu.assume_multiple %3, 8 : i32
    %c0 = arith.constant 0 : index
    %c0_1 = arith.constant 0 : index
    %5 = vector.load %arg6[%c0, %c0_1] : memref<1x4xf32, #tpu.memory_space<vmem>>, vector<1x4xf32>
    %6 = vector.shape_cast %5 : vector<1x4xf32> to vector<1x4xf32>
    %7 = vector.broadcast %6 : vector<1x4xf32> to vector<128x4xf32>
    %8 = arith.index_cast %4 : i32 to index
    %c0_2 = arith.constant 0 : index
    %c0_3 = arith.constant 0 : index
    %9 = vector.load %arg10[%8, %c0_2, %c0_3] : memref<18x18x4xf32, #tpu.memory_space<vmem>>, vector<10x18x4xf32>
    %10 = vector.extract_strided_slice %9 {offsets = [0, 0, 0], sizes = [8, 16, 4], strides = [1, 1, 1]} : vector<10x18x4xf32> to vector<8x16x4xf32>
    %11 = vector.extract_strided_slice %9 {offsets = [0, 1, 0], sizes = [8, 16, 4], strides = [1, 1, 1]} : vector<10x18x4xf32> to vector<8x16x4xf32>
    %12 = vector.extract_strided_slice %9 {offsets = [0, 2, 0], sizes = [8, 16, 4], strides = [1, 1, 1]} : vector<10x18x4xf32> to vector<8x16x4xf32>
    %13 = vector.extract_strided_slice %9 {offsets = [1, 0, 0], sizes = [8, 16, 4], strides = [1, 1, 1]} : vector<10x18x4xf32> to vector<8x16x4xf32>
    %14 = vector.extract_strided_slice %9 {offsets = [1, 1, 0], sizes = [8, 16, 4], strides = [1, 1, 1]} : vector<10x18x4xf32> to vector<8x16x4xf32>
    %15 = vector.extract_strided_slice %9 {offsets = [1, 2, 0], sizes = [8, 16, 4], strides = [1, 1, 1]} : vector<10x18x4xf32> to vector<8x16x4xf32>
    %16 = vector.extract_strided_slice %9 {offsets = [2, 0, 0], sizes = [8, 16, 4], strides = [1, 1, 1]} : vector<10x18x4xf32> to vector<8x16x4xf32>
    %17 = vector.extract_strided_slice %9 {offsets = [2, 1, 0], sizes = [8, 16, 4], strides = [1, 1, 1]} : vector<10x18x4xf32> to vector<8x16x4xf32>
    %18 = vector.extract_strided_slice %9 {offsets = [2, 2, 0], sizes = [8, 16, 4], strides = [1, 1, 1]} : vector<10x18x4xf32> to vector<8x16x4xf32>
    %19 = tpu.concatenate %10, %11, %12, %13, %14, %15, %16, %17, %18 in 2 : vector<8x16x4xf32>, vector<8x16x4xf32>, vector<8x16x4xf32>, vector<8x16x4xf32>, vector<8x16x4xf32>, vector<8x16x4xf32>, vector<8x16x4xf32>, vector<8x16x4xf32>, vector<8x16x4xf32> -> vector<8x16x36xf32>
    %20 = vector.shape_cast %19 : vector<8x16x36xf32> to vector<128x36xf32>
    %c0_4 = arith.constant 0 : index
    %c0_5 = arith.constant 0 : index
    %21 = vector.load %arg4[%c0_4, %c0_5] : memref<36x4xf32, #tpu.memory_space<vmem>>, vector<36x4xf32>
    %cst = arith.constant dense<0.000000e+00> : vector<128x4xf32>
    %22 = tpu.matmul %20, %21, %cst {dimension_numbers = #tpu.dot_dimension_numbers<[1], [0], [0], [1], [0, 0, 1, 1], [], []>} : vector<128x36xf32>, vector<36x4xf32>, vector<128x4xf32> -> vector<128x4xf32>
    %23 = arith.addf %7, %22 : vector<128x4xf32>
    %24 = arith.index_cast %4 : i32 to index
    %c0_6 = arith.constant 0 : index
    %c0_7 = arith.constant 0 : index
    %25 = vector.load %arg11[%24, %c0_6, %c0_7] : memref<18x18x4xf32, #tpu.memory_space<vmem>>, vector<10x18x4xf32>
    %26 = vector.extract_strided_slice %25 {offsets = [0, 0, 0], sizes = [8, 16, 4], strides = [1, 1, 1]} : vector<10x18x4xf32> to vector<8x16x4xf32>
    %27 = vector.extract_strided_slice %25 {offsets = [0, 1, 0], sizes = [8, 16, 4], strides = [1, 1, 1]} : vector<10x18x4xf32> to vector<8x16x4xf32>
    %28 = vector.extract_strided_slice %25 {offsets = [0, 2, 0], sizes = [8, 16, 4], strides = [1, 1, 1]} : vector<10x18x4xf32> to vector<8x16x4xf32>
    %29 = vector.extract_strided_slice %25 {offsets = [1, 0, 0], sizes = [8, 16, 4], strides = [1, 1, 1]} : vector<10x18x4xf32> to vector<8x16x4xf32>
    %30 = vector.extract_strided_slice %25 {offsets = [1, 1, 0], sizes = [8, 16, 4], strides = [1, 1, 1]} : vector<10x18x4xf32> to vector<8x16x4xf32>
    %31 = vector.extract_strided_slice %25 {offsets = [1, 2, 0], sizes = [8, 16, 4], strides = [1, 1, 1]} : vector<10x18x4xf32> to vector<8x16x4xf32>
    %32 = vector.extract_strided_slice %25 {offsets = [2, 0, 0], sizes = [8, 16, 4], strides = [1, 1, 1]} : vector<10x18x4xf32> to vector<8x16x4xf32>
    %33 = vector.extract_strided_slice %25 {offsets = [2, 1, 0], sizes = [8, 16, 4], strides = [1, 1, 1]} : vector<10x18x4xf32> to vector<8x16x4xf32>
    %34 = vector.extract_strided_slice %25 {offsets = [2, 2, 0], sizes = [8, 16, 4], strides = [1, 1, 1]} : vector<10x18x4xf32> to vector<8x16x4xf32>
    %35 = tpu.concatenate %26, %27, %28, %29, %30, %31, %32, %33, %34 in 2 : vector<8x16x4xf32>, vector<8x16x4xf32>, vector<8x16x4xf32>, vector<8x16x4xf32>, vector<8x16x4xf32>, vector<8x16x4xf32>, vector<8x16x4xf32>, vector<8x16x4xf32>, vector<8x16x4xf32> -> vector<8x16x36xf32>
    %36 = vector.shape_cast %35 : vector<8x16x36xf32> to vector<128x36xf32>
    %c0_8 = arith.constant 0 : index
    %c0_9 = arith.constant 0 : index
    %37 = vector.load %arg5[%c0_8, %c0_9] : memref<36x4xf32, #tpu.memory_space<vmem>>, vector<36x4xf32>
    %cst_10 = arith.constant dense<0.000000e+00> : vector<128x4xf32>
    %38 = tpu.matmul %36, %37, %cst_10 {dimension_numbers = #tpu.dot_dimension_numbers<[1], [0], [0], [1], [0, 0, 1, 1], [], []>} : vector<128x36xf32>, vector<36x4xf32>, vector<128x4xf32> -> vector<128x4xf32>
    %39 = arith.addf %23, %38 : vector<128x4xf32>
    %40 = vector.shape_cast %39 : vector<128x4xf32> to vector<8x16x4xf32>
    %c0_11 = arith.constant 0 : index
    %c0_12 = arith.constant 0 : index
    %c0_13 = arith.constant 0 : index
    %c0_14 = arith.constant 0 : index
    %41 = vector.load %arg7[%c0_11, %c0_12, %c0_13, %c0_14] : memref<1x8x16x4xf32, #tpu.memory_space<vmem>>, vector<1x8x16x4xf32>
    %42 = vector.shape_cast %41 : vector<1x8x16x4xf32> to vector<8x16x4xf32>
    %43 = vector.shape_cast %40 : vector<8x16x4xf32> to vector<1x8x16x4xf32>
    tpu.vector_store %arg7[%c0_11, %c0_12, %c0_13, %c0_14], %43 {strides = array<i32>} : memref<1x8x16x4xf32, #tpu.memory_space<vmem>>, vector<1x8x16x4xf32>,
    %c0_15 = arith.constant 0 : index
    %c0_16 = arith.constant 0 : index
    %c0_17 = arith.constant 0 : index
    %44 = vector.load %arg8[%c0_15, %c0_16, %c0_17] : memref<1x1x4xf32, #tpu.memory_space<vmem>>, vector<1x1x4xf32>
    %cst_18 = arith.constant dense<0.000000e+00> : vector<4xf32>
    %45 = vector.multi_reduction <add>, %39, %cst_18 [0] : vector<128x4xf32> to vector<4xf32>
    %46 = vector.shape_cast %45 : vector<4xf32> to vector<1x1x4xf32>
    %47 = arith.addf %44, %46 : vector<1x1x4xf32>
    %c0_19 = arith.constant 0 : index
    %c0_20 = arith.constant 0 : index
    %c0_21 = arith.constant 0 : index
    %48 = vector.load %arg8[%c0_19, %c0_20, %c0_21] : memref<1x1x4xf32, #tpu.memory_space<vmem>>, vector<1x1x4xf32>
    tpu.vector_store %arg8[%c0_19, %c0_20, %c0_21], %47 {strides = array<i32>} : memref<1x1x4xf32, #tpu.memory_space<vmem>>, vector<1x1x4xf32>,
    %c0_22 = arith.constant 0 : index
    %c0_23 = arith.constant 0 : index
    %c0_24 = arith.constant 0 : index
    %49 = vector.load %arg9[%c0_22, %c0_23, %c0_24] : memref<1x1x4xf32, #tpu.memory_space<vmem>>, vector<1x1x4xf32>
    %50 = arith.mulf %39, %39 : vector<128x4xf32>
    %cst_25 = arith.constant dense<0.000000e+00> : vector<4xf32>
    %51 = vector.multi_reduction <add>, %50, %cst_25 [0] : vector<128x4xf32> to vector<4xf32>
    %52 = vector.shape_cast %51 : vector<4xf32> to vector<1x1x4xf32>
    %53 = arith.addf %49, %52 : vector<1x1x4xf32>
    %c0_26 = arith.constant 0 : index
    %c0_27 = arith.constant 0 : index
    %c0_28 = arith.constant 0 : index
    %54 = vector.load %arg9[%c0_26, %c0_27, %c0_28] : memref<1x1x4xf32, #tpu.memory_space<vmem>>, vector<1x1x4xf32>
    tpu.vector_store %arg9[%c0_26, %c0_27, %c0_28], %53 {strides = array<i32>} : memref<1x1x4xf32, #tpu.memory_space<vmem>>, vector<1x1x4xf32>,
    return
  }
  func.func @transform_0(%arg0: i32, %arg1: i32) -> (i32, i32, i32, i32) {
    %c0_i32 = arith.constant 0 : i32
    %c0_i32_0 = arith.constant 0 : i32
    %c0_i32_1 = arith.constant 0 : i32
    %c0_i32_2 = arith.constant 0 : i32
    return %arg0, %c0_i32, %c0_i32_0, %c0_i32_1 : i32, i32, i32, i32
  }
  func.func @transform_1(%arg0: i32, %arg1: i32) -> (i32, i32, i32, i32) {
    %c0_i32 = arith.constant 0 : i32
    %c0_i32_0 = arith.constant 0 : i32
    %c0_i32_1 = arith.constant 0 : i32
    %c0_i32_2 = arith.constant 0 : i32
    return %arg0, %c0_i32, %c0_i32_0, %c0_i32_1 : i32, i32, i32, i32
  }
  func.func @transform_2(%arg0: i32, %arg1: i32) -> (i32, i32) {
    %c0_i32 = arith.constant 0 : i32
    %c0_i32_0 = arith.constant 0 : i32
    %c0_i32_1 = arith.constant 0 : i32
    return %c0_i32, %c0_i32_0 : i32, i32
  }
  func.func @transform_3(%arg0: i32, %arg1: i32) -> (i32, i32) {
    %c0_i32 = arith.constant 0 : i32
    %c0_i32_0 = arith.constant 0 : i32
    %c0_i32_1 = arith.constant 0 : i32
    return %c0_i32, %c0_i32_0 : i32, i32
  }
  func.func @transform_4(%arg0: i32, %arg1: i32) -> (i32, i32) {
    %c0_i32 = arith.constant 0 : i32
    %c0_i32_0 = arith.constant 0 : i32
    %c0_i32_1 = arith.constant 0 : i32
    return %c0_i32, %c0_i32_0 : i32, i32
  }
  func.func @transform_5(%arg0: i32, %arg1: i32) -> (i32, i32, i32, i32) {
    %c0_i32 = arith.constant 0 : i32
    %c0_i32_0 = arith.constant 0 : i32
    %c0_i32_1 = arith.constant 0 : i32
    return %arg0, %arg1, %c0_i32, %c0_i32_0 : i32, i32, i32, i32
  }
  func.func @transform_6(%arg0: i32, %arg1: i32) -> (i32, i32, i32) {
    %c0_i32 = arith.constant 0 : i32
    %c0_i32_0 = arith.constant 0 : i32
    %c0_i32_1 = arith.constant 0 : i32
    return %arg0, %c0_i32, %c0_i32_0 : i32, i32, i32
  }
  func.func @transform_7(%arg0: i32, %arg1: i32) -> (i32, i32, i32) {
    %c0_i32 = arith.constant 0 : i32
    %c0_i32_0 = arith.constant 0 : i32
    %c0_i32_1 = arith.constant 0 : i32
    return %arg0, %c0_i32, %c0_i32_0 : i32, i32, i32
  }
}

module attributes {stable_mosaic.version = 11 : i64} {
  func.func @_conv3x3_affine_src_kernel(%arg0: i32, %arg1: i32, %arg2: memref<1x16x16x4xf32, #tpu.memory_space<vmem>>, %arg3: memref<1x4xf32, #tpu.memory_space<vmem>>, %arg4: memref<1x4xf32, #tpu.memory_space<vmem>>, %arg5: memref<36x4xf32, #tpu.memory_space<vmem>>, %arg6: memref<1x4xf32, #tpu.memory_space<vmem>>, %arg7: memref<1x8x16x4xf32, #tpu.memory_space<vmem>>, %arg8: memref<1x1x4xf32, #tpu.memory_space<vmem>>, %arg9: memref<1x1x4xf32, #tpu.memory_space<vmem>>, %arg10: memref<18x18x4xf32, #tpu.memory_space<vmem>>) attributes {dimension_semantics = [#tpu.dimension_semantics<parallel>, #tpu.dimension_semantics<arbitrary>], iteration_bounds = array<i64: 2, 2>, scalar_prefetch = 0 : i64, scratch_operands = 1 : i64, tpu.core_type = #tpu.core_type<tc>, window_params = [{transform_indices = @transform_0, window_bounds = array<i64: 1, 16, 16, 4>}, {pipeline_mode = #tpu.pipeline_mode<synchronous>, transform_indices = @transform_1, window_bounds = array<i64: 1, 4>}, {pipeline_mode = #tpu.pipeline_mode<synchronous>, transform_indices = @transform_2, window_bounds = array<i64: 1, 4>}, {pipeline_mode = #tpu.pipeline_mode<synchronous>, transform_indices = @transform_3, window_bounds = array<i64: 36, 4>}, {pipeline_mode = #tpu.pipeline_mode<synchronous>, transform_indices = @transform_4, window_bounds = array<i64: 1, 4>}, {transform_indices = @transform_5, window_bounds = array<i64: 1, 8, 16, 4>}, {transform_indices = @transform_6, window_bounds = array<i64: 1, 1, 4>}, {transform_indices = @transform_7, window_bounds = array<i64: 1, 1, 4>}]} {
    %c0_i32 = arith.constant 0 : i32
    %0 = arith.cmpi eq, %arg1, %c0_i32 : i32
    %1 = arith.extui %0 : i1 to i32
    %c0_i32_0 = arith.constant 0 : i32
    %2 = arith.cmpi ne, %1, %c0_i32_0 : i32
    scf.if %2 {
      %cst_24 = arith.constant 0.000000e+00 : f32
      %39 = vector.broadcast %cst_24 : f32 to vector<1x1x4xf32>
      %c0_25 = arith.constant 0 : index
      %c0_26 = arith.constant 0 : index
      %c0_27 = arith.constant 0 : index
      %40 = vector.load %arg8[%c0_25, %c0_26, %c0_27] : memref<1x1x4xf32, #tpu.memory_space<vmem>>, vector<1x1x4xf32>
      tpu.vector_store %arg8[%c0_25, %c0_26, %c0_27], %39 {strides = array<i32>} : memref<1x1x4xf32, #tpu.memory_space<vmem>>, vector<1x1x4xf32>,
      %cst_28 = arith.constant 0.000000e+00 : f32
      %41 = vector.broadcast %cst_28 : f32 to vector<1x1x4xf32>
      %c0_29 = arith.constant 0 : index
      %c0_30 = arith.constant 0 : index
      %c0_31 = arith.constant 0 : index
      %42 = vector.load %arg9[%c0_29, %c0_30, %c0_31] : memref<1x1x4xf32, #tpu.memory_space<vmem>>, vector<1x1x4xf32>
      tpu.vector_store %arg9[%c0_29, %c0_30, %c0_31], %41 {strides = array<i32>} : memref<1x1x4xf32, #tpu.memory_space<vmem>>, vector<1x1x4xf32>,
      %c0_32 = arith.constant 0 : index
      %c0_33 = arith.constant 0 : index
      %c0_34 = arith.constant 0 : index
      %c0_35 = arith.constant 0 : index
      %43 = vector.load %arg2[%c0_32, %c0_33, %c0_34, %c0_35] : memref<1x16x16x4xf32, #tpu.memory_space<vmem>>, vector<1x16x16x4xf32>
      %44 = vector.shape_cast %43 : vector<1x16x16x4xf32> to vector<16x16x4xf32>
      %c0_36 = arith.constant 0 : index
      %c0_37 = arith.constant 0 : index
      %45 = vector.load %arg3[%c0_36, %c0_37] : memref<1x4xf32, #tpu.memory_space<vmem>>, vector<1x4xf32>
      %46 = vector.shape_cast %45 : vector<1x4xf32> to vector<4xf32>
      %47 = vector.shape_cast %46 : vector<4xf32> to vector<1x1x4xf32>
      %48 = vector.broadcast %47 : vector<1x1x4xf32> to vector<16x16x4xf32>
      %49 = arith.mulf %44, %48 : vector<16x16x4xf32>
      %c0_38 = arith.constant 0 : index
      %c0_39 = arith.constant 0 : index
      %50 = vector.load %arg4[%c0_38, %c0_39] : memref<1x4xf32, #tpu.memory_space<vmem>>, vector<1x4xf32>
      %51 = vector.shape_cast %50 : vector<1x4xf32> to vector<4xf32>
      %52 = vector.shape_cast %51 : vector<4xf32> to vector<1x1x4xf32>
      %53 = vector.broadcast %52 : vector<1x1x4xf32> to vector<16x16x4xf32>
      %54 = arith.addf %49, %53 : vector<16x16x4xf32>
      %cst_40 = arith.constant 0.000000e+00 : f32
      %55 = vector.broadcast %cst_40 : f32 to vector<16x16x4xf32>
      %56 = arith.maximumf %54, %55 : vector<16x16x4xf32>
      %cst_41 = arith.constant 0.000000e+00 : f32
      %57 = vector.broadcast %cst_41 : f32 to vector<18x18x4xf32>
      %c0_42 = arith.constant 0 : index
      %c0_43 = arith.constant 0 : index
      %c0_44 = arith.constant 0 : index
      %58 = vector.load %arg10[%c0_42, %c0_43, %c0_44] : memref<18x18x4xf32, #tpu.memory_space<vmem>>, vector<18x18x4xf32>
      tpu.vector_store %arg10[%c0_42, %c0_43, %c0_44], %57 {strides = array<i32>} : memref<18x18x4xf32, #tpu.memory_space<vmem>>, vector<18x18x4xf32>,
      %c1 = arith.constant 1 : index
      %c1_45 = arith.constant 1 : index
      %c0_46 = arith.constant 0 : index
      %59 = vector.load %arg10[%c1, %c1_45, %c0_46] : memref<18x18x4xf32, #tpu.memory_space<vmem>>, vector<16x16x4xf32>
      tpu.vector_store %arg10[%c1, %c1_45, %c0_46], %56 {strides = array<i32>} : memref<18x18x4xf32, #tpu.memory_space<vmem>>, vector<16x16x4xf32>,
    } else {
    }
    %c8_i32 = arith.constant 8 : i32
    %3 = arith.muli %arg1, %c8_i32 : i32
    %4 = tpu.assume_multiple %3, 8 : i32
    %c0 = arith.constant 0 : index
    %c0_1 = arith.constant 0 : index
    %5 = vector.load %arg6[%c0, %c0_1] : memref<1x4xf32, #tpu.memory_space<vmem>>, vector<1x4xf32>
    %6 = vector.shape_cast %5 : vector<1x4xf32> to vector<1x4xf32>
    %7 = vector.broadcast %6 : vector<1x4xf32> to vector<128x4xf32>
    %8 = arith.index_cast %4 : i32 to index
    %c0_2 = arith.constant 0 : index
    %c0_3 = arith.constant 0 : index
    %9 = vector.load %arg10[%8, %c0_2, %c0_3] : memref<18x18x4xf32, #tpu.memory_space<vmem>>, vector<10x18x4xf32>
    %10 = vector.extract_strided_slice %9 {offsets = [0, 0, 0], sizes = [8, 16, 4], strides = [1, 1, 1]} : vector<10x18x4xf32> to vector<8x16x4xf32>
    %11 = vector.extract_strided_slice %9 {offsets = [0, 1, 0], sizes = [8, 16, 4], strides = [1, 1, 1]} : vector<10x18x4xf32> to vector<8x16x4xf32>
    %12 = vector.extract_strided_slice %9 {offsets = [0, 2, 0], sizes = [8, 16, 4], strides = [1, 1, 1]} : vector<10x18x4xf32> to vector<8x16x4xf32>
    %13 = vector.extract_strided_slice %9 {offsets = [1, 0, 0], sizes = [8, 16, 4], strides = [1, 1, 1]} : vector<10x18x4xf32> to vector<8x16x4xf32>
    %14 = vector.extract_strided_slice %9 {offsets = [1, 1, 0], sizes = [8, 16, 4], strides = [1, 1, 1]} : vector<10x18x4xf32> to vector<8x16x4xf32>
    %15 = vector.extract_strided_slice %9 {offsets = [1, 2, 0], sizes = [8, 16, 4], strides = [1, 1, 1]} : vector<10x18x4xf32> to vector<8x16x4xf32>
    %16 = vector.extract_strided_slice %9 {offsets = [2, 0, 0], sizes = [8, 16, 4], strides = [1, 1, 1]} : vector<10x18x4xf32> to vector<8x16x4xf32>
    %17 = vector.extract_strided_slice %9 {offsets = [2, 1, 0], sizes = [8, 16, 4], strides = [1, 1, 1]} : vector<10x18x4xf32> to vector<8x16x4xf32>
    %18 = vector.extract_strided_slice %9 {offsets = [2, 2, 0], sizes = [8, 16, 4], strides = [1, 1, 1]} : vector<10x18x4xf32> to vector<8x16x4xf32>
    %19 = tpu.concatenate %10, %11, %12, %13, %14, %15, %16, %17, %18 in 2 : vector<8x16x4xf32>, vector<8x16x4xf32>, vector<8x16x4xf32>, vector<8x16x4xf32>, vector<8x16x4xf32>, vector<8x16x4xf32>, vector<8x16x4xf32>, vector<8x16x4xf32>, vector<8x16x4xf32> -> vector<8x16x36xf32>
    %20 = vector.shape_cast %19 : vector<8x16x36xf32> to vector<128x36xf32>
    %c0_4 = arith.constant 0 : index
    %c0_5 = arith.constant 0 : index
    %21 = vector.load %arg5[%c0_4, %c0_5] : memref<36x4xf32, #tpu.memory_space<vmem>>, vector<36x4xf32>
    %cst = arith.constant dense<0.000000e+00> : vector<128x4xf32>
    %22 = tpu.matmul %20, %21, %cst {dimension_numbers = #tpu.dot_dimension_numbers<[1], [0], [0], [1], [0, 0, 1, 1], [], []>} : vector<128x36xf32>, vector<36x4xf32>, vector<128x4xf32> -> vector<128x4xf32>
    %23 = arith.addf %7, %22 : vector<128x4xf32>
    %24 = vector.shape_cast %23 : vector<128x4xf32> to vector<8x16x4xf32>
    %c0_6 = arith.constant 0 : index
    %c0_7 = arith.constant 0 : index
    %c0_8 = arith.constant 0 : index
    %c0_9 = arith.constant 0 : index
    %25 = vector.load %arg7[%c0_6, %c0_7, %c0_8, %c0_9] : memref<1x8x16x4xf32, #tpu.memory_space<vmem>>, vector<1x8x16x4xf32>
    %26 = vector.shape_cast %25 : vector<1x8x16x4xf32> to vector<8x16x4xf32>
    %27 = vector.shape_cast %24 : vector<8x16x4xf32> to vector<1x8x16x4xf32>
    tpu.vector_store %arg7[%c0_6, %c0_7, %c0_8, %c0_9], %27 {strides = array<i32>} : memref<1x8x16x4xf32, #tpu.memory_space<vmem>>, vector<1x8x16x4xf32>,
    %c0_10 = arith.constant 0 : index
    %c0_11 = arith.constant 0 : index
    %c0_12 = arith.constant 0 : index
    %28 = vector.load %arg8[%c0_10, %c0_11, %c0_12] : memref<1x1x4xf32, #tpu.memory_space<vmem>>, vector<1x1x4xf32>
    %cst_13 = arith.constant dense<0.000000e+00> : vector<4xf32>
    %29 = vector.multi_reduction <add>, %23, %cst_13 [0] : vector<128x4xf32> to vector<4xf32>
    %30 = vector.shape_cast %29 : vector<4xf32> to vector<1x1x4xf32>
    %31 = arith.addf %28, %30 : vector<1x1x4xf32>
    %c0_14 = arith.constant 0 : index
    %c0_15 = arith.constant 0 : index
    %c0_16 = arith.constant 0 : index
    %32 = vector.load %arg8[%c0_14, %c0_15, %c0_16] : memref<1x1x4xf32, #tpu.memory_space<vmem>>, vector<1x1x4xf32>
    tpu.vector_store %arg8[%c0_14, %c0_15, %c0_16], %31 {strides = array<i32>} : memref<1x1x4xf32, #tpu.memory_space<vmem>>, vector<1x1x4xf32>,
    %c0_17 = arith.constant 0 : index
    %c0_18 = arith.constant 0 : index
    %c0_19 = arith.constant 0 : index
    %33 = vector.load %arg9[%c0_17, %c0_18, %c0_19] : memref<1x1x4xf32, #tpu.memory_space<vmem>>, vector<1x1x4xf32>
    %34 = arith.mulf %23, %23 : vector<128x4xf32>
    %cst_20 = arith.constant dense<0.000000e+00> : vector<4xf32>
    %35 = vector.multi_reduction <add>, %34, %cst_20 [0] : vector<128x4xf32> to vector<4xf32>
    %36 = vector.shape_cast %35 : vector<4xf32> to vector<1x1x4xf32>
    %37 = arith.addf %33, %36 : vector<1x1x4xf32>
    %c0_21 = arith.constant 0 : index
    %c0_22 = arith.constant 0 : index
    %c0_23 = arith.constant 0 : index
    %38 = vector.load %arg9[%c0_21, %c0_22, %c0_23] : memref<1x1x4xf32, #tpu.memory_space<vmem>>, vector<1x1x4xf32>
    tpu.vector_store %arg9[%c0_21, %c0_22, %c0_23], %37 {strides = array<i32>} : memref<1x1x4xf32, #tpu.memory_space<vmem>>, vector<1x1x4xf32>,
    return
  }
  func.func @transform_0(%arg0: i32, %arg1: i32) -> (i32, i32, i32, i32) {
    %c0_i32 = arith.constant 0 : i32
    %c0_i32_0 = arith.constant 0 : i32
    %c0_i32_1 = arith.constant 0 : i32
    %c0_i32_2 = arith.constant 0 : i32
    return %arg0, %c0_i32, %c0_i32_0, %c0_i32_1 : i32, i32, i32, i32
  }
  func.func @transform_1(%arg0: i32, %arg1: i32) -> (i32, i32) {
    %c0_i32 = arith.constant 0 : i32
    %c0_i32_0 = arith.constant 0 : i32
    %c0_i32_1 = arith.constant 0 : i32
    return %c0_i32, %c0_i32_0 : i32, i32
  }
  func.func @transform_2(%arg0: i32, %arg1: i32) -> (i32, i32) {
    %c0_i32 = arith.constant 0 : i32
    %c0_i32_0 = arith.constant 0 : i32
    %c0_i32_1 = arith.constant 0 : i32
    return %c0_i32, %c0_i32_0 : i32, i32
  }
  func.func @transform_3(%arg0: i32, %arg1: i32) -> (i32, i32) {
    %c0_i32 = arith.constant 0 : i32
    %c0_i32_0 = arith.constant 0 : i32
    %c0_i32_1 = arith.constant 0 : i32
    return %c0_i32, %c0_i32_0 : i32, i32
  }
  func.func @transform_4(%arg0: i32, %arg1: i32) -> (i32, i32) {
    %c0_i32 = arith.constant 0 : i32
    %c0_i32_0 = arith.constant 0 : i32
    %c0_i32_1 = arith.constant 0 : i32
    return %c0_i32, %c0_i32_0 : i32, i32
  }
  func.func @transform_5(%arg0: i32, %arg1: i32) -> (i32, i32, i32, i32) {
    %c0_i32 = arith.constant 0 : i32
    %c0_i32_0 = arith.constant 0 : i32
    %c0_i32_1 = arith.constant 0 : i32
    return %arg0, %arg1, %c0_i32, %c0_i32_0 : i32, i32, i32, i32
  }
  func.func @transform_6(%arg0: i32, %arg1: i32) -> (i32, i32, i32) {
    %c0_i32 = arith.constant 0 : i32
    %c0_i32_0 = arith.constant 0 : i32
    %c0_i32_1 = arith.constant 0 : i32
    return %arg0, %c0_i32, %c0_i32_0 : i32, i32, i32
  }
  func.func @transform_7(%arg0: i32, %arg1: i32) -> (i32, i32, i32) {
    %c0_i32 = arith.constant 0 : i32
    %c0_i32_0 = arith.constant 0 : i32
    %c0_i32_1 = arith.constant 0 : i32
    return %arg0, %c0_i32, %c0_i32_0 : i32, i32, i32
  }
}

module attributes {stable_mosaic.version = 11 : i64} {
  func.func @_bn_relu_kernel(%arg0: i32, %arg1: i32, %arg2: memref<1x8x16x4xf32, #tpu.memory_space<vmem>>, %arg3: memref<1x4xf32, #tpu.memory_space<vmem>>, %arg4: memref<1x4xf32, #tpu.memory_space<vmem>>, %arg5: memref<1x8x16x4xf32, #tpu.memory_space<vmem>>) attributes {dimension_semantics = [#tpu.dimension_semantics<parallel>, #tpu.dimension_semantics<parallel>], iteration_bounds = array<i64: 2, 2>, scalar_prefetch = 0 : i64, scratch_operands = 0 : i64, tpu.core_type = #tpu.core_type<tc>, window_params = [{transform_indices = @transform_0, window_bounds = array<i64: 1, 8, 16, 4>}, {pipeline_mode = #tpu.pipeline_mode<synchronous>, transform_indices = @transform_1, window_bounds = array<i64: 1, 4>}, {pipeline_mode = #tpu.pipeline_mode<synchronous>, transform_indices = @transform_2, window_bounds = array<i64: 1, 4>}, {transform_indices = @transform_3, window_bounds = array<i64: 1, 8, 16, 4>}]} {
    %c0 = arith.constant 0 : index
    %c0_0 = arith.constant 0 : index
    %c0_1 = arith.constant 0 : index
    %c0_2 = arith.constant 0 : index
    %0 = vector.load %arg2[%c0, %c0_0, %c0_1, %c0_2] : memref<1x8x16x4xf32, #tpu.memory_space<vmem>>, vector<1x8x16x4xf32>
    %c0_3 = arith.constant 0 : index
    %c0_4 = arith.constant 0 : index
    %1 = vector.load %arg3[%c0_3, %c0_4] : memref<1x4xf32, #tpu.memory_space<vmem>>, vector<1x4xf32>
    %2 = vector.shape_cast %1 : vector<1x4xf32> to vector<4xf32>
    %3 = vector.shape_cast %2 : vector<4xf32> to vector<1x1x1x4xf32>
    %4 = vector.broadcast %3 : vector<1x1x1x4xf32> to vector<1x8x16x4xf32>
    %5 = arith.mulf %0, %4 : vector<1x8x16x4xf32>
    %c0_5 = arith.constant 0 : index
    %c0_6 = arith.constant 0 : index
    %6 = vector.load %arg4[%c0_5, %c0_6] : memref<1x4xf32, #tpu.memory_space<vmem>>, vector<1x4xf32>
    %7 = vector.shape_cast %6 : vector<1x4xf32> to vector<4xf32>
    %8 = vector.shape_cast %7 : vector<4xf32> to vector<1x1x1x4xf32>
    %9 = vector.broadcast %8 : vector<1x1x1x4xf32> to vector<1x8x16x4xf32>
    %10 = arith.addf %5, %9 : vector<1x8x16x4xf32>
    %cst = arith.constant 0.000000e+00 : f32
    %11 = vector.broadcast %cst : f32 to vector<1x8x16x4xf32>
    %12 = arith.maximumf %10, %11 : vector<1x8x16x4xf32>
    %c0_7 = arith.constant 0 : index
    %c0_8 = arith.constant 0 : index
    %c0_9 = arith.constant 0 : index
    %c0_10 = arith.constant 0 : index
    %13 = vector.load %arg5[%c0_7, %c0_8, %c0_9, %c0_10] : memref<1x8x16x4xf32, #tpu.memory_space<vmem>>, vector<1x8x16x4xf32>
    tpu.vector_store %arg5[%c0_7, %c0_8, %c0_9, %c0_10], %12 {strides = array<i32>} : memref<1x8x16x4xf32, #tpu.memory_space<vmem>>, vector<1x8x16x4xf32>,
    return
  }
  func.func @transform_0(%arg0: i32, %arg1: i32) -> (i32, i32, i32, i32) {
    %c0_i32 = arith.constant 0 : i32
    %c0_i32_0 = arith.constant 0 : i32
    %c0_i32_1 = arith.constant 0 : i32
    return %arg0, %arg1, %c0_i32, %c0_i32_0 : i32, i32, i32, i32
  }
  func.func @transform_1(%arg0: i32, %arg1: i32) -> (i32, i32) {
    %c0_i32 = arith.constant 0 : i32
    %c0_i32_0 = arith.constant 0 : i32
    %c0_i32_1 = arith.constant 0 : i32
    return %c0_i32, %c0_i32_0 : i32, i32
  }
  func.func @transform_2(%arg0: i32, %arg1: i32) -> (i32, i32) {
    %c0_i32 = arith.constant 0 : i32
    %c0_i32_0 = arith.constant 0 : i32
    %c0_i32_1 = arith.constant 0 : i32
    return %c0_i32, %c0_i32_0 : i32, i32
  }
  func.func @transform_3(%arg0: i32, %arg1: i32) -> (i32, i32, i32, i32) {
    %c0_i32 = arith.constant 0 : i32
    %c0_i32_0 = arith.constant 0 : i32
    %c0_i32_1 = arith.constant 0 : i32
    return %arg0, %arg1, %c0_i32, %c0_i32_0 : i32, i32, i32, i32
  }
}

</mosaic_0001>

<bundles_post_ra>
// kernel: tile.9
= control target key start
LH: loop header
LB: loop body
LE: loop exit
PB: predicated region body
PF: predicated region fallthrough
CT: control target
= control target key end

     0   :  { %vm8_vm0 = vcmask 31744   ;;  %s40_s8 = smov 4   ;;  %s41_s9 = smov 8   ;;  %vm14_vm1 = vcmask 130144   ;;  %vm20_vm2 = vcmask 97344   ;;  %vm26_vm3 = vcmask 64544   ;;  %s58_s0 = inlined_call_operand.vmem [shape: f32[4,4], index: 0, kind: input, shape index: {}]   ;;  %s59_s1 = inlined_call_operand.vmem [shape: f32[1,16], index: 1, kind: output, shape index: {}]  }
   0x1   :  { %v5_v0 = vld [vmem:[%s58_s0] sm:$0xf]  ;;  %s39_s0 = smov 12  }
   0x2   :  { %6 = vst [vmem:[#allocation1] sm:$0xf] %v5_v0 }
   0x9   :  { %v11_v1 = vld [vmem:[#allocation1 + $0x3] sm:$0x1]   ;;  %v23_v2 = vld [vmem:[#allocation1 + $0x1] sm:$0x1]   ;;  %v7_v3 = vld [vmem:[#allocation1] sm:$0x1]  }
   0xa   :  { %12 = vrot.lane.b32.xlu0 %v11_v1, %s39_s0  ;;  %24 = vrot.lane.b32.xlu1 %v23_v2, %s40_s8  ;;  %v17_v4 = vld [vmem:[#allocation1 + $0x2] sm:$0x1]   ;;  %9 = vst.msk [vmem:[#allocation0] sm:$0x1] %vm8_vm0, %v7_v3  }
   0xe   :  { %18 = vrot.lane.b32.xlu0 %v17_v4, %s41_s9 }
  0x7c   :  { %v13_v5 = vpop.permute.xlu0 %12   ;;  %v25_v6 = vpop.permute.xlu1 %24  }
  0x7d   :  { %15 = vst.msk [vmem:[#allocation0] sm:$0x1] %vm14_vm1, %v13_v5  }
  0x80   :  { %v19_v7 = vpop.permute.xlu0 %18  }
  0x81   :  { %21 = vst.msk [vmem:[#allocation0] sm:$0x1] %vm20_vm2, %v19_v7  }
  0x82   :  { %27 = vst.msk [vmem:[#allocation0] sm:$0x1] %vm26_vm3, %v25_v6  }
  0x89   :  { %v32_v8 = vld [vmem:[#allocation0] sm:$0x1] }
  0x8a   :  { %35 = vst [vmem:[%s59_s1] sm:$0x1] %v32_v8 }

// kernel: tile.8
= control target key start
LH: loop header
LB: loop body
LE: loop exit
PB: predicated region body
PF: predicated region fallthrough
CT: control target
= control target key end

     0   :  { %s22_s0 = inlined_call_operand.vmem [shape: f32[4], index: 0, kind: input, shape index: {}]   ;;  %s23_s1 = inlined_call_operand.vmem [shape: f32[4,4], index: 1, kind: output, shape index: {}]  }
   0x1   :  { %v4_v0 = vld [vmem:[%s22_s0] ss:$0 sm:$0xff] }
   0x2   :  { %5 = vst [vmem:[%s23_s1] sm:$0xf] %v4_v0 }

// kernel: up_forward.4
= control target key start
LH: loop header
LB: loop body
LE: loop exit
PB: predicated region body
PF: predicated region fallthrough
CT: control target
= control target key end

     0   :  { %s690_s12 = smov 0   ;;  %s692_s13 = smov 0   ;;  %s770_s0 = inlined_call_operand.vmem [shape: f32[2,8,8,4], index: 0, kind: input, shape index: {}]   ;;  %s771_s1 = inlined_call_operand.vmem [shape: f32[4,16], index: 1, kind: input, shape index: {}]   ;;  %s772_s2 = inlined_call_operand.vmem [shape: f32[1,16], index: 2, kind: input, shape index: {}]   ;;  %s773_s3 = inlined_call_operand.vmem [shape: f32[2,8,2,8,8], index: 3, kind: output, shape index: {}]  }
   0x1   :  { %s694_s14 = smov 0   ;;  %s696_s15 = smov 0  }
   0x2   :  { %s698_s16 = smov 0  }
   0x3 LB: > { %s22_s17 = sadd.s32 1, %s659_s14  ;;  %s25_s18 = sadd.s32 1, %s663_s15  ;;  %s667_s16 = sphi %s698_s16, %s13_s16   ;;  %s663_s15 = sphi %s696_s15, %s777_s15   ;;  %s659_s14 = sphi %s694_s14, %s776_s14   ;;  %s655_s13 = sphi %s692_s13, %s775_s13   ;;  %s651_s12 = sphi %s690_s12, %s774_s12  }
   0x4   : > { %p23_p0 = scmp.ge.s32.totalorder %s22_s17, 2  ;;  %p536_p1 = scmp.ge.s32.totalorder %s667_s16, 1 }
   0x5   : > { %p158_p2 = scmp.lt.s32.totalorder %s667_s16, 5 }
   0x6   : > { %s779_s17 = smov (%p23_p0, %s22_s17), 0  ;;  %s781_s18 = smov (!%p23_p0, %s25_s18), %s663_s15 }
   0x7   : > { %p159_p3 = pnand %p536_p1, %p158_p2  ;;  %p27_p4 = scmp.ge.s32.totalorder %s781_s18, 2 }
   0x8   : > { %s669_s23 = smov (!%p159_p3), 120   ;;  %s537_s24 = sshll.u32 (!%p159_p3), %s651_s12, 2 }
   0x9   : > { %s783_s18 = smov (%p27_p4, %s781_s18), 0  ;;  %162 = sbr.rel (%p159_p3) target bundleno = 334 (0x14e), region = 32 }
   0xa   : > { %p192_p5 = scmp.lt.s32.totalorder (!%p159_p3), %s655_s13, 1  ;;  %p194_p6 = scmp.lt.s32.totalorder (!%p159_p3), %s537_s24, 7 }
   0xe   : > { %v331_v0 = vld [vmem:[%s771_s1] sm:$0xf]  ;;  %vm237_vm0 = vcmask 1043456   ;;  %s785_s13 = smov (!%p192_p5, %s655_s13), 1  ;;  %s787_s24 = smov (!%p194_p6, %s537_s24), 7  ;;  %vm224_vm1 = vcmask 31744  }
   0xf   : > { %v216_v1 = vld [vmem:[%s771_s1] sm:$0xf]  ;;  %339 = vrot.lane.b32.xlu0 %v331_v0, %s669_s23  ;;  %s538_s27 = sshll.u32 %s785_s13, 3  ;;  %s542_s28 = sshll.u32 %s785_s13, 4  ;;  %vm326_vm2 = vcmask 64512  }
  0x10   : > { %572 = vmatprep.subr.msk.mxu0 %vm237_vm0, %v216_v1  ;;  %v550_v2 = vld [vmem:[%s772_s2] ss:$0 sm:$0xff]  ;;  %s197_s29 = sadd.s32 %s538_s27, %s787_s24  ;;  %s541_s30 = sshll.u32 %s787_s24, 1 }
  0x11   : > { %573 = vmatpush3.msk.msra.mxu0 %vm237_vm0, %v216_v1  ;;  %s539_s4 = sshll.u32 %s197_s29, 3  ;;  %s208_s5 = sadd.s32 %s542_s28, %s541_s30 }
  0x12   : > { %s199_s8 = scalar_lea.vmem %s770_s0, %s539_s4  ;;  %s543_s9 = sshll.u32 %s208_s5, 3 }
  0x13   : > { %341 = vrot.lane.b32.xlu0 %v550_v2, %s669_s23  ;;  %v212_v3 = vld [vmem:[%s199_s8] sm:$0xff]  ;;  %v213_v4 = vld [vmem:[%s199_s8 + $0x8] sm:$0xff]  ;;  %v214_v5 = vld [vmem:[%s199_s8 + $0x10] sm:$0xff]  ;;  %s210_s12 = scalar_lea.vmem %s773_s3, %s543_s9 }
  0x14   : > { %574 = vmatprep.mubr.msk.f32.mxu0 %vm224_vm1, %v212_v3  ;;  %582 = vmatprep.mubr.msk.f32.mxu1 %vm224_vm1, %v212_v3  ;;  %v215_v6 = vld [vmem:[%s199_s8 + $0x18] sm:$0xff] }
  0x15   : > { %575 = vmatmul.mubr.msk.f32.vlgmr.msra.gmra.mxu0 %vm224_vm1, %v213_v4 }
  0x16   : > { %577 = vmatprep.mubr.msk.f32.mxu0 %vm224_vm1, %v214_v5 }
  0x19   : > { %578 = vmatmul.mubr.msk.f32.gmra.mxu0 %vm224_vm1, %v215_v6 }
  0x81   : > { %v340_v7 = vpop.permute.xlu0 %339 }
  0x82   : > { %580 = vmatprep.subr.msk.mxu1 %vm237_vm0, %v340_v7 }
  0x83   : > { %581 = vmatpush3.msk.msra.mxu1 %vm237_vm0, %v340_v7 }
  0x84   : > { %583 = vmatmul.mubr.msk.f32.vlgmr.msra.gmra.mxu1 %vm224_vm1, %v213_v4 }
  0x85   : > { %585 = vmatprep.mubr.msk.f32.mxu1 %vm224_vm1, %v214_v5  ;;  %v342_v16 = vpop.permute.xlu0 %341 }
  0x88   : > { %586 = vmatmul.mubr.msk.f32.gmra.mxu1 %vm224_vm1, %v215_v6 }
  0xd5   : > { %v576_v8 = vpop.f32.mrf.mxu0 }
  0xd6   : > { %v313_v9 = vadd.f32 %v576_v8, %v550_v2 }
  0xd7   : > { %v307_v10 = vpop.f32.mrf.mxu0 }
  0xd8   : > { %328 = vst.msk [vmem:[%s210_s12 + $0x10] sm:$0xff] %vm326_vm2, %v313_v9  ;;  %v308_v11 = vadd.f32 %v550_v2, %v307_v10 }
  0xd9   : > { %v579_v12 = vpop.f32.mrf.mxu0 }
  0xda   : > { %327 = vst.msk [vmem:[%s210_s12] sm:$0xff] %vm326_vm2, %v308_v11  ;;  %v323_v13 = vadd.f32 %v579_v12, %v550_v2 }
  0xdb   : > { %v317_v14 = vpop.f32.mrf.mxu0 }
  0xdc   : > { %330 = vst.msk [vmem:[%s210_s12 + $0x30] sm:$0xff] %vm326_vm2, %v323_v13  ;;  %v318_v15 = vadd.f32 %v550_v2, %v317_v14 }
  0xde   : > { %329 = vst.msk [vmem:[%s210_s12 + $0x20] sm:$0xff] %vm326_vm2, %v318_v15 }
 0x144   : > { %v584_v17 = vpop.f32.mrf.mxu1 }
 0x145   : > { %v418_v18 = vadd.f32 %v584_v17, %v342_v16 }
 0x146   : > { %v412_v19 = vpop.f32.mrf.mxu1 }
 0x147   : > { %557 = vst.msk [vmem:[%s210_s12 + $0x18] sm:$0xff] %vm326_vm2, %v418_v18  ;;  %v413_v20 = vadd.f32 %v412_v19, %v342_v16 }
 0x148   : > { %v587_v21 = vpop.f32.mrf.mxu1 }
 0x149   : > { %556 = vst.msk [vmem:[%s210_s12 + $0x8] sm:$0xff] %vm326_vm2, %v413_v20  ;;  %v428_v22 = vadd.f32 %v587_v21, %v342_v16 }
 0x14a   : > { %v422_v23 = vpop.f32.mrf.mxu1 }
 0x14b   : > { %559 = vst.msk [vmem:[%s210_s12 + $0x38] sm:$0xff] %vm326_vm2, %v428_v22  ;;  %v423_v24 = vadd.f32 %v422_v23, %v342_v16 }
 0x14d   : > { %558 = vst.msk [vmem:[%s210_s12 + $0x28] sm:$0xff] %vm326_vm2, %v423_v24 }
 0x14e PF: > { %s13_s16 = sadd.s32 1, %s667_s16   ;;  %s774_s12 = smov %s659_s14 }
 0x14f   : > { %p10_p7 = scmp.ge.s32.totalorder %s13_s16, 6   ;;  %s775_s13 = smov %s663_s15 }
 0x150   : > { %s776_s14 = smov %s779_s17  ;;  %s777_s15 = smov %s783_s18 }
 0x151   :  { %12 = sbr.rel (!%p10_p7) target bundleno = 3 (0x3), region = 63 }

// kernel: up_forward.7
= control target key start
LH: loop header
LB: loop body
LE: loop exit
PB: predicated region body
PF: predicated region fallthrough
CT: control target
= control target key end

     0   :  { %s526_s12 = smov 0   ;;  %s528_s13 = smov 0   ;;  %s671_s0 = inlined_call_operand.vmem [shape: f32[2,16,16,4], index: 0, kind: input, shape index: {}]   ;;  %s672_s1 = inlined_call_operand.vmem [shape: f32[1,4], index: 1, kind: input, shape index: {}]   ;;  %s673_s2 = inlined_call_operand.vmem [shape: f32[1,4], index: 2, kind: input, shape index: {}]   ;;  %s674_s3 = inlined_call_operand.vmem [shape: f32[2,16,16,4], index: 3, kind: output, shape index: {}]  }
   0x1   :  { %s530_s14 = smov 0   ;;  %s532_s15 = smov 0  }
   0x2   :  { %s534_s16 = smov 0  }
   0x3 LB: > { %s22_s17 = sadd.s32 1, %s496_s14  ;;  %s25_s18 = sadd.s32 1, %s500_s15  ;;  %s504_s16 = sphi %s534_s16, %s13_s16   ;;  %s500_s15 = sphi %s532_s15, %s678_s15   ;;  %s496_s14 = sphi %s530_s14, %s677_s14   ;;  %s492_s13 = sphi %s528_s13, %s676_s13   ;;  %s488_s12 = sphi %s526_s12, %s675_s12  }
   0x4   : > { %p23_p0 = scmp.ge.s32.totalorder %s22_s17, 2  ;;  %p413_p1 = scmp.ge.s32.totalorder %s504_s16, 1 }
   0x5   : > { %p159_p2 = scmp.lt.s32.totalorder %s504_s16, 5 }
   0x6   : > { %s680_s17 = smov (%p23_p0, %s22_s17), 0  ;;  %s682_s18 = smov (!%p23_p0, %s25_s18), %s500_s15 }
   0x7   : > { %p160_p3 = pnand %p413_p1, %p159_p2  ;;  %p27_p4 = scmp.ge.s32.totalorder %s682_s18, 2 }
   0x8   : > { %s414_s19 = sshll.u32 (!%p160_p3), %s488_s12, 3  ;;  %p194_p5 = scmp.lt.s32.totalorder (!%p160_p3), %s492_s13, 1 }
   0x9   : > { %s684_s18 = smov (%p27_p4, %s682_s18), 0  ;;  %163 = sbr.rel (%p160_p3) target bundleno = 37 (0x25), region = 32 }
   0xa   : > { %p196_p6 = scmp.lt.s32.totalorder (!%p160_p3), %s414_s19, 15 }
   0xe   : > { %s686_s13 = smov (!%p194_p5, %s492_s13), 1  ;;  %s688_s19 = smov (!%p196_p6, %s414_s19), 15  ;;  %v559_v0 = vld [vmem:[%s672_s1] ss:$0 sm:$0xff]  ;;  %vm293_vm0 = vcmask 31744  }
   0xf   : > { %s416_s20 = sshll.u32 %s686_s13, 5  ;;  %s415_s21 = sshll.u32 %s688_s19, 1  ;;  %v569_v1 = vld [vmem:[%s673_s2] ss:$0 sm:$0xff] }
  0x10   : > { %s200_s22 = sadd.s32 %s416_s20, %s415_s21 }
  0x11   : > { %s417_s23 = sshll.u32 %s200_s22, 3 }
  0x12   : > { %s564_s28 = scalar_lea.vmem %s671_s0, %s417_s23  ;;  %s592_s6 = scalar_lea.vmem %s674_s3, %s417_s23 }
  0x13   : > { %v215_v2 = vld [vmem:[%s564_s28] sm:$0xff]  ;;  %v216_v3 = vld [vmem:[%s564_s28 + $0x8] sm:$0xff]  ;;  %v217_v4 = vld [vmem:[%s564_s28 + $0x10] sm:$0xff] }
  0x14   : > { %v238_v5 = vmul.f32 %v559_v0, %v215_v2  ;;  %v239_v6 = vmul.f32 %v559_v0, %v216_v3  ;;  %v240_v7 = vmul.f32 %v559_v0, %v217_v4  ;;  %v218_v8 = vld [vmem:[%s564_s28 + $0x18] sm:$0xff]  ;;  %v219_v9 = vld [vmem:[%s564_s28 + $0x20] sm:$0xff]  ;;  %v220_v10 = vld [vmem:[%s564_s28 + $0x28] sm:$0xff] }
  0x15   : > { %v241_v11 = vmul.f32 %v559_v0, %v218_v8  ;;  %v242_v12 = vmul.f32 %v559_v0, %v219_v9  ;;  %v243_v13 = vmul.f32 %v559_v0, %v220_v10  ;;  %v221_v14 = vld [vmem:[%s564_s28 + $0x30] sm:$0xff]  ;;  %v222_v15 = vld [vmem:[%s564_s28 + $0x38] sm:$0xff]  ;;  %v223_v24 = vld [vmem:[%s564_s28 + $0x40] sm:$0xff] }
  0x16   : > { %v261_v16 = vadd.f32 %v569_v1, %v238_v5  ;;  %v262_v17 = vadd.f32 %v569_v1, %v239_v6  ;;  %v263_v18 = vadd.f32 %v569_v1, %v240_v7  ;;  %v244_v19 = vmul.f32 %v559_v0, %v221_v14  ;;  %v224_v25 = vld [vmem:[%s564_s28 + $0x48] sm:$0xff]  ;;  %v225_v26 = vld [vmem:[%s564_s28 + $0x50] sm:$0xff]  ;;  %v226_v31 = vld [vmem:[%s564_s28 + $0x58] sm:$0xff] }
  0x17   : > { %v264_v20 = vadd.f32 %v569_v1, %v241_v11  ;;  %v265_v21 = vadd.f32 %v569_v1, %v242_v12  ;;  %v266_v22 = vadd.f32 %v569_v1, %v243_v13  ;;  %v245_v23 = vmul.f32 %v559_v0, %v222_v15  ;;  %v227_v32 = vld [vmem:[%s564_s28 + $0x60] sm:$0xff]  ;;  %v228_v33 = vld [vmem:[%s564_s28 + $0x68] sm:$0xff]  ;;  %v229_v38 = vld [vmem:[%s564_s28 + $0x70] sm:$0xff] }
  0x18   : > { %v277_v27 = vmax.f32 %v261_v16, 0.0  ;;  %v278_v28 = vmax.f32 %v262_v17, 0.0  ;;  %v279_v29 = vmax.f32 %v263_v18, 0.0  ;;  %v267_v30 = vadd.f32 %v569_v1, %v244_v19  ;;  %v230_v43 = vld [vmem:[%s564_s28 + $0x78] sm:$0xff] }
  0x19   : > { %v280_v34 = vmax.f32 %v264_v20, 0.0  ;;  %v281_v35 = vmax.f32 %v265_v21, 0.0  ;;  %v282_v36 = vmax.f32 %v266_v22, 0.0  ;;  %v268_v37 = vadd.f32 %v569_v1, %v245_v23 }
  0x1a   : > { %294 = vst.msk [vmem:[%s592_s6] sm:$0xff] %vm293_vm0, %v277_v27  ;;  %295 = vst.msk [vmem:[%s592_s6 + $0x8] sm:$0xff] %vm293_vm0, %v278_v28  ;;  %v283_v39 = vmax.f32 %v267_v30, 0.0  ;;  %v246_v40 = vmul.f32 %v559_v0, %v223_v24  ;;  %v247_v41 = vmul.f32 %v559_v0, %v224_v25  ;;  %v248_v42 = vmul.f32 %v559_v0, %v225_v26 }
  0x1b   : > { %296 = vst.msk [vmem:[%s592_s6 + $0x10] sm:$0xff] %vm293_vm0, %v279_v29  ;;  %297 = vst.msk [vmem:[%s592_s6 + $0x18] sm:$0xff] %vm293_vm0, %v280_v34  ;;  %v284_v44 = vmax.f32 %v268_v37, 0.0  ;;  %v249_v45 = vmul.f32 %v559_v0, %v226_v31  ;;  %v250_v46 = vmul.f32 %v559_v0, %v227_v32  ;;  %v251_v47 = vmul.f32 %v559_v0, %v228_v33 }
  0x1c   : > { %298 = vst.msk [vmem:[%s592_s6 + $0x20] sm:$0xff] %vm293_vm0, %v281_v35  ;;  %299 = vst.msk [vmem:[%s592_s6 + $0x28] sm:$0xff] %vm293_vm0, %v282_v36  ;;  %v269_v48 = vadd.f32 %v569_v1, %v246_v40  ;;  %v270_v49 = vadd.f32 %v569_v1, %v247_v41  ;;  %v271_v50 = vadd.f32 %v569_v1, %v248_v42 }
  0x1d   : > { %300 = vst.msk [vmem:[%s592_s6 + $0x30] sm:$0xff] %vm293_vm0, %v283_v39  ;;  %v252_v51 = vmul.f32 %v559_v0, %v229_v38  ;;  %301 = vst.msk [vmem:[%s592_s6 + $0x38] sm:$0xff] %vm293_vm0, %v284_v44  ;;  %v272_v52 = vadd.f32 %v569_v1, %v249_v45  ;;  %v273_v53 = vadd.f32 %v569_v1, %v250_v46 }
  0x1e   : > { %v274_v54 = vadd.f32 %v569_v1, %v251_v47  ;;  %v253_v55 = vmul.f32 %v559_v0, %v230_v43  ;;  %v285_v56 = vmax.f32 %v269_v48, 0.0  ;;  %v286_v57 = vmax.f32 %v270_v49, 0.0 }
  0x1f   : > { %v287_v58 = vmax.f32 %v271_v50, 0.0  ;;  %v275_v59 = vadd.f32 %v569_v1, %v252_v51  ;;  %v288_v60 = vmax.f32 %v272_v52, 0.0  ;;  %v289_v61 = vmax.f32 %v273_v53, 0.0 }
  0x20   : > { %v290_v62 = vmax.f32 %v274_v54, 0.0  ;;  %v276_v63 = vadd.f32 %v569_v1, %v253_v55  ;;  %302 = vst.msk [vmem:[%s592_s6 + $0x40] sm:$0xff] %vm293_vm0, %v285_v56  ;;  %303 = vst.msk [vmem:[%s592_s6 + $0x48] sm:$0xff] %vm293_vm0, %v286_v57 }
  0x21   : > { %304 = vst.msk [vmem:[%s592_s6 + $0x50] sm:$0xff] %vm293_vm0, %v287_v58  ;;  %v291_v2 = vmax.f32 %v275_v59, 0.0  ;;  %305 = vst.msk [vmem:[%s592_s6 + $0x58] sm:$0xff] %vm293_vm0, %v288_v60 }
  0x22   : > { %306 = vst.msk [vmem:[%s592_s6 + $0x60] sm:$0xff] %vm293_vm0, %v289_v61  ;;  %307 = vst.msk [vmem:[%s592_s6 + $0x68] sm:$0xff] %vm293_vm0, %v290_v62  ;;  %v292_v0 = vmax.f32 %v276_v63, 0.0 }
  0x23   : > { %308 = vst.msk [vmem:[%s592_s6 + $0x70] sm:$0xff] %vm293_vm0, %v291_v2 }
  0x24   : > { %309 = vst.msk [vmem:[%s592_s6 + $0x78] sm:$0xff] %vm293_vm0, %v292_v0 }
  0x25 PF: > { %s13_s16 = sadd.s32 1, %s504_s16   ;;  %s675_s12 = smov %s496_s14 }
  0x26   : > { %p10_p7 = scmp.ge.s32.totalorder %s13_s16, 6   ;;  %s676_s13 = smov %s500_s15 }
  0x27   : > { %s677_s14 = smov %s680_s17  ;;  %s678_s15 = smov %s684_s18 }
  0x28   :  { %12 = sbr.rel (!%p10_p7) target bundleno = 3 (0x3), region = 62 }

// kernel: up_forward.6
= control target key start
LH: loop header
LB: loop body
LE: loop exit
PB: predicated region body
PF: predicated region fallthrough
CT: control target
= control target key end

     0   :  { %s1965_s24 = smov 0   ;;  %s1967_s25 = smov 0   ;;  %s2878_s0 = inlined_call_operand.vmem [shape: f32[2,16,16,4], index: 0, kind: input, shape index: {}]   ;;  %s2879_s1 = inlined_call_operand.vmem [shape: f32[1,4], index: 1, kind: input, shape index: {}]   ;;  %s2880_s2 = inlined_call_operand.vmem [shape: f32[1,4], index: 2, kind: input, shape index: {}]   ;;  %s2881_s3 = inlined_call_operand.vmem [shape: f32[36,4], index: 3, kind: input, shape index: {}]   ;;  %s2882_s4 = inlined_call_operand.vmem [shape: f32[1,4], index: 4, kind: input, shape index: {}]   ;;  %s2883_s5 = inlined_call_operand.vmem [shape: f32[2,16,16,4], index: 5, kind: output, shape index: {0}]   ;;  %s2884_s6 = inlined_call_operand.vmem [shape: f32[2,1,4], index: 6, kind: output, shape index: {1}]   ;;  %s2885_s7 = inlined_call_operand.vmem [shape: f32[2,1,4], index: 7, kind: output, shape index: {2}]  }
   0x1   :  { %s1969_s26 = smov 0   ;;  %s1971_s27 = smov 0  }
   0x2   :  { %s1973_s28 = smov 0  }
   0x3 LB: > { %s27_s29 = sadd.s32 1, %s1906_s26  ;;  %s30_s30 = sadd.s32 1, %s1910_s27  ;;  %s1914_s28 = sphi %s1973_s28, %s18_s28   ;;  %s1910_s27 = sphi %s1971_s27, %s2893_s27   ;;  %s1906_s26 = sphi %s1969_s26, %s2892_s26   ;;  %s1902_s25 = sphi %s1967_s25, %s2891_s25   ;;  %s1898_s24 = sphi %s1965_s24, %s2890_s24  }
   0x4   : > { %p28_p0 = scmp.ge.s32.totalorder %s27_s29, 2  ;;  %p1729_p1 = scmp.ge.s32.totalorder %s1914_s28, 1 }
   0x5   : > { %p256_p2 = scmp.lt.s32.totalorder %s1914_s28, 5 }
   0x6   : > { %s2895_s29 = smov (%p28_p0, %s27_s29), 0  ;;  %s2897_s30 = smov (!%p28_p0, %s30_s30), %s1910_s27 }
   0x7   : > { %2886 = sst [smem:[#allocation3_spill]] %s2895_s29  ;;  %p257_p3 = pnand %p1729_p1, %p256_p2 }
   0x8   : > { %p32_p4 = scmp.ge.s32.totalorder %s2897_s30, 2  ;;  %p299_p5 = scmp.lt.s32.totalorder (!%p257_p3), %s1902_s25, 1 }
   0x9   : > { %260 = sbr.rel (%p257_p3) target bundleno = 667 (0x29b), region = 40  ;;  %s1732_s8 = sshll.u32 (!%p257_p3), %s1898_s24, 3 }
   0xa   : > { %s2899_s30 = smov (%p32_p4, %s2897_s30), 0  ;;  %p307_p6 = scmp.lt.s32.totalorder (!%p257_p3), %s1732_s8, 15 }
   0xb   : > { %2887 = sst [smem:[#allocation4_spill]] %s2899_s30  ;;  %p1736_p7 = scmp.ne.s32.totalorder (!%p257_p3), %s1898_s24, 0 }
   0xe   : > { %s2901_s25 = smov (!%p299_p5, %s1902_s25), 1  ;;  %s2903_s8 = smov (!%p307_p6, %s1732_s8), 15 }
   0xf   : > { %s1761_s9 = sshll.u32 %s2901_s25, 8  ;;  %s1734_s10 = sshll.u32 %s2901_s25, 5 }
  0x10   : > { %s2001_s13 = scalar_lea.vmem %s2878_s0, %s1761_s9  ;;  %s1733_s14 = sshll.u32 %s2903_s8, 1 }
  0x11   : > { %s311_s15 = sadd.s32 %s1734_s10, %s1733_s14  ;;  %s2006_s18 = scalar_lea.vmem %s2884_s6, %s2901_s25 }
  0x12   : > { %s1735_s19 = sshll.u32 %s311_s15, 3  ;;  %s2011_s22 = scalar_lea.vmem %s2885_s7, %s2901_s25 }
  0x13   : > { %s2016_s29 = scalar_lea.vmem %s2883_s5, %s1735_s19  ;;  %324 = sbr.rel (%p1736_p7) target bundleno = 69 (0x45), region = 44 }
  0x18   : > { %vm470_vm0 = vcmask 31744   ;;  %vm473_vm1 = vcmask 25600   ;;  %vm325_vm2 = vcmask 24576   ;;  %v328_v0 = vld [vmem:[%s2001_s13] sm:$0xff]  ;;  %v329_v1 = vld [vmem:[%s2001_s13 + $0x8] sm:$0xff]  ;;  %v1916_v2 = vmov 0.0  }
  0x19   : > { %475 = vst.msk [vmem:[#allocation2 + $0x18] sm:$0xff] %vm470_vm0, %v1916_v2  ;;  %471 = vst.msk [vmem:[#allocation2] sm:$0xff] %vm470_vm0, %v1916_v2  ;;  %v2082_v3 = vld [vmem:[%s2879_s1] ss:$0 sm:$0xff]  ;;  %v330_v5 = vld [vmem:[%s2001_s13 + $0x10] sm:$0xff] }
  0x1a   : > { %472 = vst.msk [vmem:[#allocation2 + $0x8] sm:$0xff] %vm470_vm0, %v1916_v2  ;;  %476 = vst.msk [vmem:[#allocation2 + $0x20] sm:$0xff] %vm470_vm0, %v1916_v2  ;;  %v2087_v4 = vld [vmem:[%s2880_s2] ss:$0 sm:$0xff]  ;;  %v367_v6 = vmul.f32 %v2082_v3, %v328_v0  ;;  %v368_v7 = vmul.f32 %v2082_v3, %v329_v1  ;;  %v369_v8 = vmul.f32 %v2082_v3, %v330_v5  ;;  %v331_v9 = vld [vmem:[%s2001_s13 + $0x18] sm:$0xff] }
  0x1b   : > { %478 = vst.msk [vmem:[#allocation2 + $0x30] sm:$0xff] %vm470_vm0, %v1916_v2  ;;  %479 = vst.msk [vmem:[#allocation2 + $0x38] sm:$0xff] %vm470_vm0, %v1916_v2  ;;  %v332_v10 = vld [vmem:[%s2001_s13 + $0x20] sm:$0xff]  ;;  %v333_v11 = vld [vmem:[%s2001_s13 + $0x28] sm:$0xff]  ;;  %v370_v12 = vmul.f32 %v2082_v3, %v331_v9 }
  0x1c   : > { %481 = vst.msk [vmem:[#allocation2 + $0x48] sm:$0xff] %vm470_vm0, %v1916_v2  ;;  %482 = vst.msk [vmem:[#allocation2 + $0x50] sm:$0xff] %vm470_vm0, %v1916_v2  ;;  %v371_v13 = vmul.f32 %v2082_v3, %v332_v10  ;;  %v372_v14 = vmul.f32 %v2082_v3, %v333_v11  ;;  %v334_v15 = vld [vmem:[%s2001_s13 + $0x30] sm:$0xff]  ;;  %v335_v16 = vld [vmem:[%s2001_s13 + $0x38] sm:$0xff]  ;;  %v406_v17 = vadd.f32 %v2087_v4, %v367_v6 }
  0x1d   : > { %484 = vst.msk [vmem:[#allocation2 + $0x60] sm:$0xff] %vm470_vm0, %v1916_v2  ;;  %485 = vst.msk [vmem:[#allocation2 + $0x68] sm:$0xff] %vm470_vm0, %v1916_v2  ;;  %v407_v18 = vadd.f32 %v2087_v4, %v368_v7  ;;  %v408_v19 = vadd.f32 %v2087_v4, %v369_v8  ;;  %v373_v20 = vmul.f32 %v2082_v3, %v334_v15  ;;  %v336_v25 = vld [vmem:[%s2001_s13 + $0x40] sm:$0xff]  ;;  %v337_v26 = vld [vmem:[%s2001_s13 + $0x48] sm:$0xff] }
  0x1e   : > { %487 = vst.msk [vmem:[#allocation2 + $0x78] sm:$0xff] %vm470_vm0, %v1916_v2  ;;  %488 = vst.msk [vmem:[#allocation2 + $0x80] sm:$0xff] %vm470_vm0, %v1916_v2  ;;  %v409_v21 = vadd.f32 %v2087_v4, %v370_v12  ;;  %v410_v22 = vadd.f32 %v2087_v4, %v371_v13  ;;  %v411_v23 = vadd.f32 %v2087_v4, %v372_v14  ;;  %v338_v27 = vld [vmem:[%s2001_s13 + $0x50] sm:$0xff]  ;;  %v438_v28 = vmax.f32 %v406_v17, 0.0  ;;  %v339_v32 = vld [vmem:[%s2001_s13 + $0x58] sm:$0xff] }
  0x1f   : > { %490 = vst.msk [vmem:[#allocation2 + $0x90] sm:$0xff] %vm470_vm0, %v1916_v2  ;;  %491 = vst.msk [vmem:[#allocation2 + $0x98] sm:$0xff] %vm470_vm0, %v1916_v2  ;;  %v374_v24 = vmul.f32 %v2082_v3, %v335_v16  ;;  %v439_v29 = vmax.f32 %v407_v18, 0.0  ;;  %v440_v30 = vmax.f32 %v408_v19, 0.0  ;;  %v412_v31 = vadd.f32 %v2087_v4, %v373_v20  ;;  %v340_v33 = vld [vmem:[%s2001_s13 + $0x60] sm:$0xff]  ;;  %v341_v34 = vld [vmem:[%s2001_s13 + $0x68] sm:$0xff] }
  0x20   : > { %493 = vst.msk [vmem:[#allocation2 + $0xa8] sm:$0xff] %vm470_vm0, %v1916_v2  ;;  %494 = vst.msk [vmem:[#allocation2 + $0xb0] sm:$0xff] %vm470_vm0, %v1916_v2  ;;  %v441_v35 = vmax.f32 %v409_v21, 0.0  ;;  %v442_v36 = vmax.f32 %v410_v22, 0.0  ;;  %v443_v37 = vmax.f32 %v411_v23, 0.0  ;;  %v342_v39 = vld [vmem:[%s2001_s13 + $0x70] sm:$0xff]  ;;  %v375_v41 = vmul.f32 %v2082_v3, %v336_v25 }
  0x21   : > { %496 = vst.msk [vmem:[#allocation2 + $0xc0] sm:$0xff] %vm470_vm0, %v1916_v2  ;;  %497 = vst.msk [vmem:[#allocation2 + $0xc8] sm:$0xff] %vm470_vm0, %v1916_v2  ;;  %v413_v38 = vadd.f32 %v2087_v4, %v374_v24  ;;  %v444_v40 = vmax.f32 %v412_v31, 0.0  ;;  %v376_v42 = vmul.f32 %v2082_v3, %v337_v26  ;;  %v377_v43 = vmul.f32 %v2082_v3, %v338_v27  ;;  %v343_v44 = vld [vmem:[%s2001_s13 + $0x78] sm:$0xff]  ;;  %v344_v57 = vld [vmem:[%s2001_s13 + $0x80] sm:$0xff] }
  0x22   : > { %499 = vst.msk [vmem:[#allocation2 + $0xd8] sm:$0xff] %vm470_vm0, %v1916_v2  ;;  %500 = vst.msk [vmem:[#allocation2 + $0xe0] sm:$0xff] %vm470_vm0, %v1916_v2  ;;  %v378_v46 = vmul.f32 %v2082_v3, %v339_v32  ;;  %v379_v47 = vmul.f32 %v2082_v3, %v340_v33  ;;  %v380_v48 = vmul.f32 %v2082_v3, %v341_v34  ;;  %v345_v58 = vld [vmem:[%s2001_s13 + $0x88] sm:$0xff]  ;;  %v346_v59 = vld [vmem:[%s2001_s13 + $0x90] sm:$0xff] }
  0x23   : > { %502 = vst.msk [vmem:[#allocation2 + $0xf0] sm:$0xff] %vm470_vm0, %v1916_v2  ;;  %503 = vst.msk [vmem:[#allocation2 + $0xf8] sm:$0xff] %vm470_vm0, %v1916_v2  ;;  %v445_v45 = vmax.f32 %v413_v38, 0.0  ;;  %v414_v49 = vadd.f32 %v2087_v4, %v375_v41  ;;  %v415_v50 = vadd.f32 %v2087_v4, %v376_v42  ;;  %v416_v51 = vadd.f32 %v2087_v4, %v377_v43  ;;  %v347_v0 = vld [vmem:[%s2001_s13 + $0x98] sm:$0xff]  ;;  %v348_v1 = vld [vmem:[%s2001_s13 + $0xa0] sm:$0xff] }
  0x24   : > { %505 = vst.msk [vmem:[#allocation2 + $0x108] sm:$0xff] %vm470_vm0, %v1916_v2  ;;  %506 = vst.msk [vmem:[#allocation2 + $0x110] sm:$0xff] %vm470_vm0, %v1916_v2  ;;  %v381_v52 = vmul.f32 %v2082_v3, %v342_v39  ;;  %v417_v53 = vadd.f32 %v2087_v4, %v378_v46  ;;  %v418_v54 = vadd.f32 %v2087_v4, %v379_v47  ;;  %v350_v9 = vld [vmem:[%s2001_s13 + $0xb0] sm:$0xff]  ;;  %v351_v14 = vld [vmem:[%s2001_s13 + $0xb8] sm:$0xff] }
  0x25   : > { %508 = vst.msk [vmem:[#allocation2 + $0x120] sm:$0xff] %vm470_vm0, %v1916_v2  ;;  %509 = vst.msk [vmem:[#allocation2 + $0x128] sm:$0xff] %vm470_vm0, %v1916_v2  ;;  %v419_v55 = vadd.f32 %v2087_v4, %v380_v48  ;;  %v382_v56 = vmul.f32 %v2082_v3, %v343_v44  ;;  %v446_v60 = vmax.f32 %v414_v49, 0.0  ;;  %v447_v61 = vmax.f32 %v415_v50, 0.0  ;;  %v352_v27 = vld [vmem:[%s2001_s13 + $0xc0] sm:$0xff]  ;;  %v355_v34 = vld [vmem:[%s2001_s13 + $0xd8] sm:$0xff] }
  0x26   : > { %511 = vst.msk [vmem:[#allocation2 + $0x138] sm:$0xff] %vm470_vm0, %v1916_v2  ;;  %512 = vst.msk [vmem:[#allocation2 + $0x140] sm:$0xff] %vm470_vm0, %v1916_v2  ;;  %v448_v62 = vmax.f32 %v416_v51, 0.0  ;;  %v420_v63 = vadd.f32 %v2087_v4, %v381_v52  ;;  %v449_v5 = vmax.f32 %v417_v53, 0.0  ;;  %v450_v6 = vmax.f32 %v418_v54, 0.0  ;;  %v358_v41 = vld [vmem:[%s2001_s13 + $0xf0] sm:$0xff] }
  0x27   : > { %514 = vst.msk [vmem:[#allocation2 + $0x150] sm:$0xff] %vm470_vm0, %v1916_v2  ;;  %515 = vst.msk [vmem:[#allocation2 + $0x158] sm:$0xff] %vm470_vm0, %v1916_v2  ;;  %v451_v7 = vmax.f32 %v419_v55, 0.0  ;;  %v421_v8 = vadd.f32 %v2087_v4, %v382_v56  ;;  %v383_v11 = vmul.f32 %v2082_v3, %v344_v57  ;;  %v384_v12 = vmul.f32 %v2082_v3, %v345_v58  ;;  %v359_v46 = vld [vmem:[%s2001_s13 + $0xf8] sm:$0xff] }
  0x28   : > { %517 = vst.msk [vmem:[#allocation2 + $0x168] sm:$0xff] %vm470_vm0, %v1916_v2  ;;  %518 = vst.msk [vmem:[#allocation2 + $0x170] sm:$0xff] %vm470_vm0, %v1916_v2  ;;  %v452_v10 = vmax.f32 %v420_v63, 0.0  ;;  %v385_v13 = vmul.f32 %v2082_v3, %v346_v59  ;;  %v386_v16 = vmul.f32 %v2082_v3, %v347_v0  ;;  %v387_v17 = vmul.f32 %v2082_v3, %v348_v1 }
  0x29   : > { %520 = vst.msk [vmem:[#allocation2 + $0x180] sm:$0xff] %vm470_vm0, %v1916_v2  ;;  %521 = vst.msk [vmem:[#allocation2 + $0x188] sm:$0xff] %vm470_vm0, %v1916_v2  ;;  %v453_v15 = vmax.f32 %v421_v8, 0.0  ;;  %v422_v19 = vadd.f32 %v2087_v4, %v383_v11  ;;  %v423_v20 = vadd.f32 %v2087_v4, %v384_v12  ;;  %v389_v22 = vmul.f32 %v2082_v3, %v350_v9 }
  0x2a   : > { %523 = vst.msk [vmem:[#allocation2 + $0x198] sm:$0xff] %vm470_vm0, %v1916_v2  ;;  %524 = vst.msk [vmem:[#allocation2 + $0x1a0] sm:$0xff] %vm470_vm0, %v1916_v2  ;;  %v424_v21 = vadd.f32 %v2087_v4, %v385_v13  ;;  %v425_v23 = vadd.f32 %v2087_v4, %v386_v16  ;;  %v426_v24 = vadd.f32 %v2087_v4, %v387_v17 }
  0x2b   : > { %477 = vst.msk [vmem:[#allocation2 + $0x28] sm:$0x3] %vm473_vm1, %v1916_v2  ;;  %474 = vst.msk [vmem:[#allocation2 + $0x10] sm:$0x3] %vm473_vm1, %v1916_v2  ;;  %v390_v26 = vmul.f32 %v2082_v3, %v351_v14  ;;  %v455_v31 = vmax.f32 %v423_v20, 0.0  ;;  %v428_v33 = vadd.f32 %v2087_v4, %v389_v22  ;;  %v391_v43 = vmul.f32 %v2082_v3, %v352_v27 }
  0x2c   : > { %480 = vst.msk [vmem:[#allocation2 + $0x40] sm:$0x3] %vm473_vm1, %v1916_v2  ;;  %483 = vst.msk [vmem:[#allocation2 + $0x58] sm:$0x3] %vm473_vm1, %v1916_v2  ;;  %v456_v32 = vmax.f32 %v424_v21, 0.0  ;;  %v458_v38 = vmax.f32 %v426_v24, 0.0  ;;  %v394_v48 = vmul.f32 %v2082_v3, %v355_v34  ;;  %v397_v54 = vmul.f32 %v2082_v3, %v358_v41 }
  0x2d   : > { %486 = vst.msk [vmem:[#allocation2 + $0x70] sm:$0x3] %vm473_vm1, %v1916_v2  ;;  %489 = vst.msk [vmem:[#allocation2 + $0x88] sm:$0x3] %vm473_vm1, %v1916_v2  ;;  %v460_v42 = vmax.f32 %v428_v33, 0.0  ;;  %v430_v51 = vadd.f32 %v2087_v4, %v391_v43  ;;  %v398_v58 = vmul.f32 %v2082_v3, %v359_v46 }
  0x2e   : > { %492 = vst.msk [vmem:[#allocation2 + $0xa0] sm:$0x3] %vm473_vm1, %v1916_v2  ;;  %495 = vst.msk [vmem:[#allocation2 + $0xb8] sm:$0x3] %vm473_vm1, %v1916_v2  ;;  %v433_v55 = vadd.f32 %v2087_v4, %v394_v48 }
  0x2f   : > { %498 = vst.msk [vmem:[#allocation2 + $0xd0] sm:$0x3] %vm473_vm1, %v1916_v2  ;;  %501 = vst.msk [vmem:[#allocation2 + $0xe8] sm:$0x3] %vm473_vm1, %v1916_v2  ;;  %v462_v59 = vmax.f32 %v430_v51, 0.0 }
  0x30   : > { %504 = vst.msk [vmem:[#allocation2 + $0x100] sm:$0x3] %vm473_vm1, %v1916_v2  ;;  %507 = vst.msk [vmem:[#allocation2 + $0x118] sm:$0x3] %vm473_vm1, %v1916_v2  ;;  %v465_v63 = vmax.f32 %v433_v55, 0.0 }
  0x31   : > { %510 = vst.msk [vmem:[#allocation2 + $0x130] sm:$0x3] %vm473_vm1, %v1916_v2  ;;  %513 = vst.msk [vmem:[#allocation2 + $0x148] sm:$0x3] %vm473_vm1, %v1916_v2 }
  0x32   : > { %516 = vst.msk [vmem:[#allocation2 + $0x160] sm:$0x3] %vm473_vm1, %v1916_v2  ;;  %519 = vst.msk [vmem:[#allocation2 + $0x178] sm:$0x3] %vm473_vm1, %v1916_v2 }
  0x33   : > { %522 = vst.msk [vmem:[#allocation2 + $0x190] sm:$0x3] %vm473_vm1, %v1916_v2  ;;  %525 = vst.msk [vmem:[#allocation2 + $0x1a8] sm:$0x3] %vm473_vm1, %v1916_v2 }
  0x34   : > { %326 = vst.msk [vmem:[%s2006_s18] sm:$0x1] %vm325_vm2, %v1916_v2  ;;  %327 = vst.msk [vmem:[%s2011_s22] sm:$0x1] %vm325_vm2, %v1916_v2  ;;  %v349_v2 = vld [vmem:[%s2001_s13 + $0xa8] sm:$0xff] }
  0x35   : > { %527 = vst.msk [vmem:[#allocation2 + $0x19] sm:$0xff] %vm470_vm0, %v438_v28  ;;  %528 = vst.msk [vmem:[#allocation2 + $0x21] sm:$0xff] %vm470_vm0, %v439_v29  ;;  %v388_v18 = vmul.f32 %v2082_v3, %v349_v2  ;;  %v353_v28 = vld [vmem:[%s2001_s13 + $0xc8] sm:$0xff]  ;;  %v354_v29 = vld [vmem:[%s2001_s13 + $0xd0] sm:$0xff]  ;;  %v437_v2 = vadd.f32 %v2087_v4, %v398_v58 }
  0x36   : > { %529 = vst.msk [vmem:[#allocation2 + $0x31] sm:$0xff] %vm470_vm0, %v440_v30  ;;  %530 = vst.msk [vmem:[#allocation2 + $0x39] sm:$0xff] %vm470_vm0, %v441_v35  ;;  %v454_v30 = vmax.f32 %v422_v19, 0.0  ;;  %v356_v35 = vld [vmem:[%s2001_s13 + $0xe0] sm:$0xff]  ;;  %v392_v44 = vmul.f32 %v2082_v3, %v353_v28 }
  0x37   : > { %531 = vst.msk [vmem:[#allocation2 + $0x49] sm:$0xff] %vm470_vm0, %v442_v36  ;;  %532 = vst.msk [vmem:[#allocation2 + $0x51] sm:$0xff] %vm470_vm0, %v443_v37  ;;  %v427_v25 = vadd.f32 %v2087_v4, %v388_v18  ;;  %v357_v36 = vld [vmem:[%s2001_s13 + $0xe8] sm:$0xff]  ;;  %v457_v37 = vmax.f32 %v425_v23, 0.0  ;;  %v395_v49 = vmul.f32 %v2082_v3, %v356_v35 }
  0x38   : > { %533 = vst.msk [vmem:[#allocation2 + $0x61] sm:$0xff] %vm470_vm0, %v444_v40  ;;  %534 = vst.msk [vmem:[#allocation2 + $0x69] sm:$0xff] %vm470_vm0, %v445_v45  ;;  %v429_v40 = vadd.f32 %v2087_v4, %v390_v26  ;;  %v393_v45 = vmul.f32 %v2082_v3, %v354_v29  ;;  %v396_v50 = vmul.f32 %v2082_v3, %v357_v36  ;;  %v469_v3 = vmax.f32 %v437_v2, 0.0 }
  0x39   : > { %535 = vst.msk [vmem:[#allocation2 + $0x79] sm:$0xff] %vm470_vm0, %v446_v60  ;;  %536 = vst.msk [vmem:[#allocation2 + $0x81] sm:$0xff] %vm470_vm0, %v447_v61  ;;  %v459_v39 = vmax.f32 %v427_v25, 0.0  ;;  %v431_v52 = vadd.f32 %v2087_v4, %v392_v44  ;;  %v434_v56 = vadd.f32 %v2087_v4, %v395_v49 }
  0x3a   : > { %537 = vst.msk [vmem:[#allocation2 + $0x91] sm:$0xff] %vm470_vm0, %v448_v62  ;;  %538 = vst.msk [vmem:[#allocation2 + $0x99] sm:$0xff] %vm470_vm0, %v449_v5  ;;  %v461_v47 = vmax.f32 %v429_v40, 0.0  ;;  %v432_v53 = vadd.f32 %v2087_v4, %v393_v45  ;;  %v435_v57 = vadd.f32 %v2087_v4, %v396_v50  ;;  %v436_v62 = vadd.f32 %v2087_v4, %v397_v54 }
  0x3b   : > { %539 = vst.msk [vmem:[#allocation2 + $0xa9] sm:$0xff] %vm470_vm0, %v450_v6  ;;  %540 = vst.msk [vmem:[#allocation2 + $0xb1] sm:$0xff] %vm470_vm0, %v451_v7  ;;  %v463_v60 = vmax.f32 %v431_v52, 0.0  ;;  %v466_v0 = vmax.f32 %v434_v56, 0.0 }
  0x3c   : > { %541 = vst.msk [vmem:[#allocation2 + $0xc1] sm:$0xff] %vm470_vm0, %v452_v10  ;;  %542 = vst.msk [vmem:[#allocation2 + $0xc9] sm:$0xff] %vm470_vm0, %v453_v15  ;;  %v464_v61 = vmax.f32 %v432_v53, 0.0  ;;  %v467_v1 = vmax.f32 %v435_v57, 0.0  ;;  %v468_v5 = vmax.f32 %v436_v62, 0.0 }
  0x3d   : > { %543 = vst.msk [vmem:[#allocation2 + $0xd9] sm:$0xff] %vm470_vm0, %v454_v30  ;;  %544 = vst.msk [vmem:[#allocation2 + $0xe1] sm:$0xff] %vm470_vm0, %v455_v31 }
  0x3e   : > { %545 = vst.msk [vmem:[#allocation2 + $0xf1] sm:$0xff] %vm470_vm0, %v456_v32  ;;  %546 = vst.msk [vmem:[#allocation2 + $0xf9] sm:$0xff] %vm470_vm0, %v457_v37 }
  0x3f   : > { %547 = vst.msk [vmem:[#allocation2 + $0x109] sm:$0xff] %vm470_vm0, %v458_v38  ;;  %548 = vst.msk [vmem:[#allocation2 + $0x111] sm:$0xff] %vm470_vm0, %v459_v39 }
  0x40   : > { %549 = vst.msk [vmem:[#allocation2 + $0x121] sm:$0xff] %vm470_vm0, %v460_v42  ;;  %550 = vst.msk [vmem:[#allocation2 + $0x129] sm:$0xff] %vm470_vm0, %v461_v47 }
  0x41   : > { %551 = vst.msk [vmem:[#allocation2 + $0x139] sm:$0xff] %vm470_vm0, %v462_v59  ;;  %552 = vst.msk [vmem:[#allocation2 + $0x141] sm:$0xff] %vm470_vm0, %v463_v60 }
  0x42   : > { %553 = vst.msk [vmem:[#allocation2 + $0x151] sm:$0xff] %vm470_vm0, %v464_v61  ;;  %554 = vst.msk [vmem:[#allocation2 + $0x159] sm:$0xff] %vm470_vm0, %v465_v63 }
  0x43   : > { %555 = vst.msk [vmem:[#allocation2 + $0x169] sm:$0xff] %vm470_vm0, %v466_v0  ;;  %556 = vst.msk [vmem:[#allocation2 + $0x171] sm:$0xff] %vm470_vm0, %v467_v1 }
  0x44   : > { %557 = vst.msk [vmem:[#allocation2 + $0x181] sm:$0xff] %vm470_vm0, %v468_v5  ;;  %558 = vst.msk [vmem:[#allocation2 + $0x189] sm:$0xff] %vm470_vm0, %v469_v3 }
  0x45 PF: > { %s1741_s10 = smul.u32 192, %s1898_s24  ;;  %vm712_vm3 = vcmask 1045504   ;;  %vm623_vm4 = vcmask 1046528   ;;  %s1917_s24 = smov 8   ;;  %v1255_v33 = vld [vmem:[%s2881_s3 + $0x20] sm:$0xf] }
  0x46   : > { %s1918_s12 = smov 4   ;;  %s1919_s13 = smov 12   ;;  %vm1305_vm5 = vcmask 1043456   ;;  %v1254_v36 = vld [vmem:[%s2881_s3 + $0x18] sm:$0xff]  ;;  %v1253_v38 = vld [vmem:[%s2881_s3 + $0x10] sm:$0xff]  ;;  %v1252_v40 = vld [vmem:[%s2881_s3 + $0x8] sm:$0xff] }
  0x47   : > { %s2216_s11 = scalar_lea.vmem [#allocation2], %s1741_s10  ;;  %s1920_s14 = smov 16   ;;  %1783 = vmatprep.subr.msk.mxu0 %vm1305_vm5, %v1255_v33  ;;  %1817 = vmatprep.subr.msk.mxu1 %vm1305_vm5, %v1255_v33  ;;  %v1251_v44 = vld [vmem:[%s2881_s3] sm:$0xff]  ;;  %vm1115_vm6 = vcmask 31744   ;;  %vm1132_vm7 = vcmask 64512   ;;  %vm1149_vm8 = vcmask 97280  }
  0x48   : > { %s1921_s15 = smov 20   ;;  %s1922_s16 = smov 24   ;;  %1784 = vmatpush3.msk.msra.mxu0 %vm1305_vm5, %v1255_v33  ;;  %1822 = vmatpush3.msk.msra.mxu1 %vm1305_vm5, %v1255_v33  ;;  %vm1166_vm9 = vcmask 130048   ;;  %vm1183_vm10 = vcmask 162816   ;;  %vm1200_vm11 = vcmask 195584   ;;  %vm1217_vm12 = vcmask 228352  }
  0x49   : > { %1785 = vmatprep.subr.mxu0 %v1254_v36  ;;  %1818 = vmatprep.subr.mxu1 %v1254_v36  ;;  %s1923_s9 = smov 28   ;;  %s1924_s19 = smov 32   ;;  %vm1234_vm13 = vcmask 261120   ;;  %vm1256_vm14 = vcmask 293888   ;;  %vm1525_vm15 = vcmask 24576  }
  0x4a   : > { %1786 = vmatpush3.msra.mxu0 %v1254_v36  ;;  %1823 = vmatpush3.msra.mxu1 %v1254_v36 }
  0x4b   : > { %v2219_v4 = vld [vmem:[%s2216_s11] sm:$0xff]  ;;  %v2222_v6 = vld [vmem:[%s2216_s11 + $0x8] sm:$0xff]  ;;  %v571_v7 = vld [vmem:[%s2216_s11 + $0x10] sm:$0x3]  ;;  %1787 = vmatprep.subr.mxu0 %v1253_v38  ;;  %1819 = vmatprep.subr.mxu1 %v1253_v38 }
  0x4c   : > { %v713_v8 = vrot.slane %v2219_v4, 2  ;;  %v714_v9 = vrot.slane %v2222_v6, 2  ;;  %v624_v10 = vrot.slane %v2219_v4, 1  ;;  %v625_v11 = vrot.slane %v2222_v6, 1  ;;  %v2236_v18 = vld [vmem:[%s2216_s11 + $0x20] sm:$0xff]  ;;  %v2239_v19 = vld [vmem:[%s2216_s11 + $0x18] sm:$0xff]  ;;  %1788 = vmatpush3.msra.mxu0 %v1253_v38  ;;  %1824 = vmatpush3.msra.mxu1 %v1253_v38 }
  0x4d   : > { %v716_v12 = vrot.slane %v571_v7, 2  ;;  %v627_v13 = vrot.slane %v571_v7, 1  ;;  %v629_v20 = vrot.slane %v2239_v19, 1  ;;  %v630_v21 = vrot.slane %v2236_v18, 1  ;;  %v574_v22 = vld [vmem:[%s2216_s11 + $0x28] sm:$0x3]  ;;  %1789 = vmatprep.subr.mxu0 %v1252_v40  ;;  %1820 = vmatprep.subr.mxu1 %v1252_v40 }
  0x4e   : > { %v715_v14 = vsel %vm712_vm3, %v713_v8, %v714_v9  ;;  %v626_v15 = vsel %vm623_vm4, %v624_v10, %v625_v11  ;;  %v718_v24 = vrot.slane %v2239_v19, 2  ;;  %v719_v25 = vrot.slane %v2236_v18, 2  ;;  %v2262_v30 = vld [vmem:[%s2216_s11 + $0x30] sm:$0xff]  ;;  %v2266_v32 = vld [vmem:[%s2216_s11 + $0x38] sm:$0xff]  ;;  %v577_v39 = vld [vmem:[%s2216_s11 + $0x40] sm:$0x3]  ;;  %1790 = vmatpush3.msra.mxu0 %v1252_v40  ;;  %1825 = vmatpush3.msra.mxu1 %v1252_v40 }
  0x4f   : > { %753 = vrot.lane.b32.xlu1 %v715_v14, %s1917_s24  ;;  %664 = vrot.lane.b32.xlu0 %v626_v15, %s1918_s12  ;;  %v717_v16 = vsel %vm712_vm3, %v714_v9, %v716_v12  ;;  %v628_v17 = vsel %vm623_vm4, %v625_v11, %v627_v13  ;;  %v631_v23 = vsel %vm623_vm4, %v629_v20, %v630_v21  ;;  %v632_v26 = vrot.slane %v574_v22, 1  ;;  %v2313_v49 = vld [vmem:[%s2216_s11 + $0x48] sm:$0xff]  ;;  %v2316_v50 = vld [vmem:[%s2216_s11 + $0x50] sm:$0xff] }
  0x50   : > { %v720_v27 = vsel %vm712_vm3, %v718_v24, %v719_v25  ;;  %v721_v29 = vrot.slane %v574_v22, 2  ;;  %v634_v34 = vrot.slane %v2262_v30, 1  ;;  %v635_v35 = vrot.slane %v2266_v32, 1  ;;  %1791 = vmatprep.subr.mxu0 %v1251_v44  ;;  %1821 = vmatprep.subr.mxu1 %v1251_v44  ;;  %v580_v54 = vld [vmem:[%s2216_s11 + $0x58] sm:$0x3]  ;;  %v2348_v62 = vld [vmem:[%s2216_s11 + $0x60] sm:$0xff] }
  0x51   : > { %v633_v28 = vsel %vm623_vm4, %v630_v21, %v632_v26  ;;  %v723_v41 = vrot.slane %v2262_v30, 2  ;;  %v724_v42 = vrot.slane %v2266_v32, 2  ;;  %v637_v43 = vrot.slane %v577_v39, 1  ;;  %1792 = vmatpush3.msra.mxu0 %v1251_v44  ;;  %1826 = vmatpush3.msra.mxu1 %v1251_v44  ;;  %v2351_v63 = vld [vmem:[%s2216_s11 + $0x68] sm:$0xff]  ;;  %v583_v5 = vld [vmem:[%s2216_s11 + $0x70] sm:$0x3] }
  0x52   : > { %v722_v31 = vsel %vm712_vm3, %v719_v25, %v721_v29  ;;  %v636_v37 = vsel %vm623_vm4, %v634_v34, %v635_v35  ;;  %v726_v47 = vrot.slane %v577_v39, 2  ;;  %v639_v51 = vrot.slane %v2313_v49, 1  ;;  %v2383_v15 = vld [vmem:[%s2216_s11 + $0x78] sm:$0xff]  ;;  %v2390_v20 = vld [vmem:[%s2216_s11 + $0x80] sm:$0xff] }
  0x53   : > { %755 = vrot.lane.b32.xlu1 %v717_v16, %s1917_s24  ;;  %666 = vrot.lane.b32.xlu0 %v628_v17, %s1918_s12  ;;  %v725_v45 = vsel %vm712_vm3, %v723_v41, %v724_v42  ;;  %v638_v46 = vsel %vm623_vm4, %v635_v35, %v637_v43  ;;  %v640_v52 = vrot.slane %v2316_v50, 1  ;;  %v728_v55 = vrot.slane %v2313_v49, 2 }
  0x54   : > { %v727_v48 = vsel %vm712_vm3, %v724_v42, %v726_v47  ;;  %v729_v56 = vrot.slane %v2316_v50, 2  ;;  %v642_v57 = vrot.slane %v580_v54, 1  ;;  %v731_v60 = vrot.slane %v580_v54, 2 }
  0x55   : > { %v641_v53 = vsel %vm623_vm4, %v639_v51, %v640_v52  ;;  %v644_v0 = vrot.slane %v2348_v62, 1  ;;  %v645_v1 = vrot.slane %v2351_v63, 1  ;;  %v733_v3 = vrot.slane %v2348_v62, 2 }
  0x56   : > { %v730_v58 = vsel %vm712_vm3, %v728_v55, %v729_v56  ;;  %v643_v59 = vsel %vm623_vm4, %v640_v52, %v642_v57  ;;  %v732_v61 = vsel %vm712_vm3, %v729_v56, %v731_v60  ;;  %v734_v7 = vrot.slane %v2351_v63, 2  ;;  %v2437_v52 = vld [vmem:[%s2216_s11 + $0x90] sm:$0xff]  ;;  %v2445_v55 = vld [vmem:[%s2216_s11 + $0x98] sm:$0xff] }
  0x57   : > { %805 = vrot.lane.b32.xlu1 %v2236_v18, %s1919_s13  ;;  %803 = vrot.lane.b32.xlu0 %v2239_v19, %s1919_s13  ;;  %v646_v2 = vsel %vm623_vm4, %v644_v0, %v645_v1  ;;  %v647_v8 = vrot.slane %v583_v5, 1  ;;  %v736_v11 = vrot.slane %v583_v5, 2  ;;  %v649_v21 = vrot.slane %v2383_v15, 1 }
  0x58   : > { %v735_v9 = vsel %vm712_vm3, %v733_v3, %v734_v7  ;;  %v650_v22 = vrot.slane %v2390_v20, 1  ;;  %v738_v29 = vrot.slane %v2383_v15, 2  ;;  %v655_v60 = vrot.slane %v2445_v55, 1 }
  0x59   : > { %v648_v10 = vsel %vm623_vm4, %v645_v1, %v647_v8  ;;  %v737_v12 = vsel %vm712_vm3, %v734_v7, %v736_v11 }
  0x5a   : > { %v651_v25 = vsel %vm623_vm4, %v649_v21, %v650_v22 }
  0x5b   : > { %668 = vrot.lane.b32.xlu1 %v631_v23, %s1918_s12  ;;  %857 = vrot.lane.b32.xlu0 %v631_v23, %s1920_s14 }
  0x5f   : > { %910 = vrot.lane.b32.xlu1 %v720_v27, %s1921_s15  ;;  %859 = vrot.lane.b32.xlu0 %v633_v28, %s1920_s14 }
  0x63   : > { %757 = vrot.lane.b32.xlu1 %v720_v27, %s1917_s24  ;;  %670 = vrot.lane.b32.xlu0 %v633_v28, %s1918_s12  ;;  %v586_v28 = vld [vmem:[%s2216_s11 + $0x88] sm:$0x3] }
  0x64   : > { %v652_v33 = vrot.slane %v586_v28, 1  ;;  %v741_v40 = vrot.slane %v586_v28, 2 }
  0x67   : > { %960 = vrot.lane.b32.xlu1 %v2262_v30, %s1922_s16  ;;  %912 = vrot.lane.b32.xlu0 %v722_v31, %s1921_s15 }
  0x6b   : > { %807 = vrot.lane.b32.xlu1 %v2262_v30, %s1919_s13  ;;  %759 = vrot.lane.b32.xlu0 %v722_v31, %s1917_s24  ;;  %v739_v31 = vrot.slane %v2390_v20, 2 }
  0x6d   : > { %v740_v36 = vsel %vm712_vm3, %v738_v29, %v739_v31  ;;  %v742_v43 = vsel %vm712_vm3, %v739_v31, %v741_v40 }
  0x6f   : > { %1014 = vrot.lane.b32.xlu1 %v636_v37, %s1923_s9  ;;  %962 = vrot.lane.b32.xlu0 %v2266_v32, %s1922_s16 }
  0x73   : > { %861 = vrot.lane.b32.xlu1 %v636_v37, %s1920_s14  ;;  %809 = vrot.lane.b32.xlu0 %v2266_v32, %s1919_s13 }
  0x77   : > { %1067 = vrot.lane.b32.xlu1 %v725_v45, %s1924_s19  ;;  %1016 = vrot.lane.b32.xlu0 %v638_v46, %s1923_s9 }
  0x7b   : > { %863 = vrot.lane.b32.xlu1 %v638_v46, %s1920_s14  ;;  %672 = vrot.lane.b32.xlu0 %v636_v37, %s1918_s12  ;;  %v653_v37 = vsel %vm623_vm4, %v650_v22, %v652_v33 }
  0x7f   : > { %1069 = vrot.lane.b32.xlu1 %v727_v48, %s1924_s19  ;;  %914 = vrot.lane.b32.xlu0 %v725_v45, %s1921_s15 }
  0x83   : > { %761 = vrot.lane.b32.xlu1 %v725_v45, %s1917_s24  ;;  %674 = vrot.lane.b32.xlu0 %v638_v46, %s1918_s12 }
  0x87   : > { %964 = vrot.lane.b32.xlu1 %v2313_v49, %s1922_s16  ;;  %916 = vrot.lane.b32.xlu0 %v727_v48, %s1921_s15 }
  0x8b   : > { %811 = vrot.lane.b32.xlu1 %v2313_v49, %s1919_s13  ;;  %763 = vrot.lane.b32.xlu0 %v727_v48, %s1917_s24 }
  0x8f   : > { %1018 = vrot.lane.b32.xlu1 %v641_v53, %s1923_s9  ;;  %966 = vrot.lane.b32.xlu0 %v2316_v50, %s1922_s16 }
  0x93   : > { %865 = vrot.lane.b32.xlu1 %v641_v53, %s1920_s14  ;;  %813 = vrot.lane.b32.xlu0 %v2316_v50, %s1919_s13 }
  0x97   : > { %1071 = vrot.lane.b32.xlu1 %v730_v58, %s1924_s19  ;;  %1020 = vrot.lane.b32.xlu0 %v643_v59, %s1923_s9 }
  0x9b   : > { %867 = vrot.lane.b32.xlu1 %v643_v59, %s1920_s14  ;;  %676 = vrot.lane.b32.xlu0 %v641_v53, %s1918_s12 }
  0x9f   : > { %1073 = vrot.lane.b32.xlu1 %v732_v61, %s1924_s19  ;;  %918 = vrot.lane.b32.xlu0 %v730_v58, %s1921_s15 }
  0xa3   : > { %765 = vrot.lane.b32.xlu1 %v730_v58, %s1917_s24  ;;  %678 = vrot.lane.b32.xlu0 %v643_v59, %s1918_s12  ;;  %v654_v59 = vrot.slane %v2437_v52, 1 }
  0xa5   : > { %v656_v7 = vsel %vm623_vm4, %v654_v59, %v655_v60 }
  0xa7   : > { %968 = vrot.lane.b32.xlu1 %v2348_v62, %s1922_s16  ;;  %920 = vrot.lane.b32.xlu0 %v732_v61, %s1921_s15 }
  0xab   : > { %815 = vrot.lane.b32.xlu1 %v2348_v62, %s1919_s13  ;;  %767 = vrot.lane.b32.xlu0 %v732_v61, %s1917_s24 }
  0xaf   : > { %1022 = vrot.lane.b32.xlu1 %v646_v2, %s1923_s9  ;;  %970 = vrot.lane.b32.xlu0 %v2351_v63, %s1922_s16 }
  0xb3   : > { %869 = vrot.lane.b32.xlu1 %v646_v2, %s1920_s14  ;;  %817 = vrot.lane.b32.xlu0 %v2351_v63, %s1919_s13 }
  0xb7   : > { %1075 = vrot.lane.b32.xlu1 %v735_v9, %s1924_s19  ;;  %1024 = vrot.lane.b32.xlu0 %v648_v10, %s1923_s9 }
  0xbb   : > { %871 = vrot.lane.b32.xlu1 %v648_v10, %s1920_s14  ;;  %680 = vrot.lane.b32.xlu0 %v646_v2, %s1918_s12 }
  0xbf   : > { %1077 = vrot.lane.b32.xlu1 %v737_v12, %s1924_s19  ;;  %922 = vrot.lane.b32.xlu0 %v735_v9, %s1921_s15 }
  0xc1   : > { %v754_v13 = vpop.permute.xlu1 %753  ;;  %v665_v14 = vpop.permute.xlu0 %664 }
  0xc2   : > { %v1116_v46 = vsel %vm1115_vm6, %v2219_v4, %v665_v14  ;;  %v743_v14 = vrot.slane %v2437_v52, 2 }
  0xc3   : > { %769 = vrot.lane.b32.xlu1 %v735_v9, %s1917_s24  ;;  %682 = vrot.lane.b32.xlu0 %v648_v10, %s1918_s12  ;;  %v1133_v51 = vsel %vm1132_vm7, %v1116_v46, %v754_v13  ;;  %v589_v10 = vld [vmem:[%s2216_s11 + $0xa0] sm:$0x3]  ;;  %v2513_v46 = vld [vmem:[%s2216_s11 + $0xa8] sm:$0xff] }
  0xc4   : > { %v746_v31 = vrot.slane %v589_v10, 2 }
  0xc5   : > { %v2385_v16 = vpop.permute.xlu1 %755  ;;  %v2387_v17 = vpop.permute.xlu0 %666 }
  0xc6   : > { %v1117_v61 = vsel %vm1115_vm6, %v2222_v6, %v2387_v17  ;;  %v657_v17 = vrot.slane %v589_v10, 1 }
  0xc7   : > { %972 = vrot.lane.b32.xlu1 %v2383_v15, %s1922_s16  ;;  %924 = vrot.lane.b32.xlu0 %v737_v12, %s1921_s15  ;;  %v1134_v3 = vsel %vm1132_vm7, %v1117_v61, %v2385_v16  ;;  %v744_v16 = vrot.slane %v2445_v55, 2 }
  0xc9   : > { %v2397_v23 = vpop.permute.xlu1 %805  ;;  %v804_v24 = vpop.permute.xlu0 %803 }
  0xca   : > { %v1150_v53 = vsel %vm1149_vm8, %v1133_v51, %v804_v24  ;;  %v1151_v6 = vsel %vm1149_vm8, %v1134_v3, %v2397_v23 }
  0xcb   : > { %819 = vrot.lane.b32.xlu1 %v2383_v15, %s1919_s13  ;;  %771 = vrot.lane.b32.xlu0 %v737_v12, %s1917_s24 }
  0xcd   : > { %v2403_v26 = vpop.permute.xlu1 %668  ;;  %v858_v27 = vpop.permute.xlu0 %857 }
  0xce   : > { %v1167_v56 = vsel %vm1166_vm9, %v1150_v53, %v858_v27  ;;  %v658_v27 = vsel %vm623_vm4, %v655_v60, %v657_v17  ;;  %v2522_v53 = vld [vmem:[%s2216_s11 + $0xb0] sm:$0xff] }
  0xcf   : > { %1026 = vrot.lane.b32.xlu1 %v651_v25, %s1923_s9  ;;  %974 = vrot.lane.b32.xlu0 %v2390_v20, %s1922_s16 }
  0xd1   : > { %v911_v34 = vpop.permute.xlu1 %910  ;;  %v860_v35 = vpop.permute.xlu0 %859 }
  0xd2   : > { %v1184_v57 = vsel %vm1183_vm10, %v1167_v56, %v911_v34  ;;  %v1168_v11 = vsel %vm1166_vm9, %v1151_v6, %v860_v35  ;;  %v747_v35 = vsel %vm712_vm3, %v744_v16, %v746_v31  ;;  %v660_v56 = vrot.slane %v2522_v53, 1 }
  0xd3   : > { %873 = vrot.lane.b32.xlu1 %v651_v25, %s1920_s14  ;;  %821 = vrot.lane.b32.xlu0 %v2390_v20, %s1919_s13 }
  0xd5   : > { %v2416_v38 = vpop.permute.xlu1 %757  ;;  %v2418_v39 = vpop.permute.xlu0 %670 }
  0xd6   : > { %v1119_v60 = vsel %vm1115_vm6, %v2236_v18, %v2418_v39  ;;  %v592_v18 = vld [vmem:[%s2216_s11 + $0xb8] sm:$0x3] }
  0xd7   : > { %1079 = vrot.lane.b32.xlu1 %v740_v36, %s1924_s19  ;;  %1028 = vrot.lane.b32.xlu0 %v653_v37, %s1923_s9  ;;  %v662_v6 = vrot.slane %v592_v18, 1 }
  0xd9   : > { %v961_v41 = vpop.permute.xlu1 %960  ;;  %v913_v42 = vpop.permute.xlu0 %912 }
  0xda   : > { %v1201_v58 = vsel %vm1200_vm11, %v1184_v57, %v961_v41  ;;  %v1185_v12 = vsel %vm1183_vm10, %v1168_v11, %v913_v42  ;;  %v1118_v42 = vsel %vm1115_vm6, %v2239_v19, %v2403_v26 }
  0xdb   : > { %875 = vrot.lane.b32.xlu1 %v653_v37, %s1920_s14  ;;  %684 = vrot.lane.b32.xlu0 %v651_v25, %s1918_s12  ;;  %v745_v25 = vsel %vm712_vm3, %v743_v14, %v744_v16  ;;  %v663_v14 = vsel %vm623_vm4, %v660_v56, %v662_v6 }
  0xdd   : > { %v2425_v44 = vpop.permute.xlu1 %807  ;;  %v2427_v45 = vpop.permute.xlu0 %759 }
  0xde   : > { %v1136_v61 = vsel %vm1132_vm7, %v1119_v60, %v2427_v45 }
  0xdf   : > { %1081 = vrot.lane.b32.xlu1 %v742_v43, %s1924_s19  ;;  %926 = vrot.lane.b32.xlu0 %v740_v36, %s1921_s15 }
  0xe1   : > { %v1015_v47 = vpop.permute.xlu1 %1014  ;;  %v963_v48 = vpop.permute.xlu0 %962 }
  0xe2   : > { %v1218_v0 = vsel %vm1217_vm12, %v1201_v58, %v1015_v47  ;;  %v1202_v13 = vsel %vm1200_vm11, %v1185_v12, %v963_v48 }
  0xe3   : > { %773 = vrot.lane.b32.xlu1 %v740_v36, %s1917_s24  ;;  %686 = vrot.lane.b32.xlu0 %v653_v37, %s1918_s12 }
  0xe5   : > { %v2440_v54 = vpop.permute.xlu1 %861  ;;  %v2442_v4 = vpop.permute.xlu0 %809 }
  0xe7   : > { %976 = vrot.lane.b32.xlu1 %v2437_v52, %s1922_s16  ;;  %928 = vrot.lane.b32.xlu0 %v742_v43, %s1921_s15 }
  0xe9   : > { %v1068_v1 = vpop.permute.xlu1 %1067  ;;  %v1017_v2 = vpop.permute.xlu0 %1016 }
  0xea   : > { %v1235_v5 = vsel %vm1234_vm13, %v1218_v0, %v1068_v1  ;;  %v1219_v21 = vsel %vm1217_vm12, %v1202_v13, %v1017_v2  ;;  %v1153_v1 = vsel %vm1149_vm8, %v1136_v61, %v2442_v4  ;;  %v749_v4 = vrot.slane %v2522_v53, 2  ;;  %v595_v61 = vld [vmem:[%s2216_s11 + $0xd0] sm:$0x3] }
  0xeb   : > { %823 = vrot.lane.b32.xlu1 %v2437_v52, %s1919_s13  ;;  %775 = vrot.lane.b32.xlu0 %v742_v43, %s1917_s24  ;;  %v1135_v43 = vsel %vm1132_vm7, %v1118_v42, %v2416_v38 }
  0xec   : > { %1793 = vmatprep.mubr.msk.f32.mxu0 %vm1256_vm14, %v1235_v5  ;;  %v1152_v47 = vsel %vm1149_vm8, %v1135_v43, %v2425_v44  ;;  %v659_v44 = vrot.slane %v2513_v46, 1 }
  0xed   : > { %v2469_v8 = vpop.permute.xlu1 %863  ;;  %v2471_v9 = vpop.permute.xlu0 %672  ;;  %v1169_v19 = vsel %vm1166_vm9, %v1152_v47, %v2440_v54  ;;  %v594_v47 = vld [vmem:[%s2216_s11 + $0xc8] sm:$0xff] }
  0xee   : > { %v661_v0 = vsel %vm623_vm4, %v659_v44, %v660_v56  ;;  %v1170_v39 = vsel %vm1166_vm9, %v1153_v1, %v2469_v8  ;;  %v906_v1 = vrot.slane %v594_v47, 2 }
  0xef   : > { %1030 = vrot.lane.b32.xlu1 %v656_v7, %s1923_s9  ;;  %978 = vrot.lane.b32.xlu0 %v2445_v55, %s1922_s16 }
  0xf1   : > { %v1070_v22 = vpop.permute.xlu1 %1069  ;;  %v915_v23 = vpop.permute.xlu0 %914 }
  0xf2   : > { %v1236_v24 = vsel %vm1234_vm13, %v1219_v21, %v1070_v22  ;;  %v1186_v26 = vsel %vm1183_vm10, %v1169_v19, %v915_v23  ;;  %v751_v21 = vrot.slane %v592_v18, 2  ;;  %v855_v18 = vrot.slane %v595_v61, 1 }
  0xf3   : > { %877 = vrot.lane.b32.xlu1 %v656_v7, %s1920_s14  ;;  %825 = vrot.lane.b32.xlu0 %v2445_v55, %s1919_s13 }
  0xf4   : > { %1794 = vmatmul.mubr.msk.f32.vlgmr.msra.gmra.mxu0 %vm1256_vm14, %v1236_v24  ;;  %v752_v24 = vsel %vm712_vm3, %v749_v4, %v751_v21  ;;  %v597_v21 = vld [vmem:[%s2216_s11 + $0xe0] sm:$0xff] }
  0xf5   : > { %v2490_v28 = vpop.permute.xlu1 %761  ;;  %v2492_v29 = vpop.permute.xlu0 %674 }
  0xf7   : > { %1083 = vrot.lane.b32.xlu1 %v745_v25, %s1924_s19  ;;  %1032 = vrot.lane.b32.xlu0 %v658_v27, %s1923_s9 }
  0xf9   : > { %v965_v33 = vpop.permute.xlu1 %964  ;;  %v917_v34 = vpop.permute.xlu0 %916 }
  0xfa   : > { %v1203_v38 = vsel %vm1200_vm11, %v1186_v26, %v965_v33  ;;  %v1187_v3 = vsel %vm1183_vm10, %v1170_v39, %v917_v34  ;;  %v1120_v34 = vsel %vm1115_vm6, %v2262_v30, %v2471_v9  ;;  %v853_v26 = vrot.slane %v594_v47, 1 }
  0xfb   : > { %879 = vrot.lane.b32.xlu1 %v658_v27, %s1920_s14  ;;  %688 = vrot.lane.b32.xlu0 %v656_v7, %s1918_s12  ;;  %v748_v7 = vrot.slane %v2513_v46, 2 }
  0xfd   : > { %v2499_v36 = vpop.permute.xlu1 %811  ;;  %v2501_v37 = vpop.permute.xlu0 %763  ;;  %v750_v13 = vsel %vm712_vm3, %v748_v7, %v749_v4  ;;  %v856_v7 = vsel %vm623_vm4, %v853_v26, %v855_v18 }
  0xff   : > { %1085 = vrot.lane.b32.xlu1 %v747_v35, %s1924_s19  ;;  %930 = vrot.lane.b32.xlu0 %v745_v25, %s1921_s15 }
 0x101   : > { %v1019_v40 = vpop.permute.xlu1 %1018  ;;  %v967_v41 = vpop.permute.xlu0 %966 }
 0x102   : > { %v1220_v57 = vsel %vm1217_vm12, %v1203_v38, %v1019_v40  ;;  %v1204_v45 = vsel %vm1200_vm11, %v1187_v3, %v967_v41  ;;  %v593_v40 = vld [vmem:[%s2216_s11 + $0xc0] sm:$0xff] }
 0x103   : > { %777 = vrot.lane.b32.xlu1 %v745_v25, %s1917_s24  ;;  %690 = vrot.lane.b32.xlu0 %v658_v27, %s1918_s12 }
 0x105   : > { %v2517_v48 = vpop.permute.xlu1 %865  ;;  %v2519_v51 = vpop.permute.xlu0 %813 }
 0x107   : > { %980 = vrot.lane.b32.xlu1 %v2513_v46, %s1922_s16  ;;  %932 = vrot.lane.b32.xlu0 %v747_v35, %s1921_s15 }
 0x109   : > { %v1072_v58 = vpop.permute.xlu1 %1071  ;;  %v1021_v59 = vpop.permute.xlu0 %1020 }
 0x10a   : > { %v1237_v54 = vsel %vm1234_vm13, %v1220_v57, %v1072_v58  ;;  %v1221_v10 = vsel %vm1217_vm12, %v1204_v45, %v1021_v59 }
 0x10b   : > { %827 = vrot.lane.b32.xlu1 %v2513_v46, %s1919_s13  ;;  %779 = vrot.lane.b32.xlu0 %v747_v35, %s1917_s24  ;;  %v1137_v35 = vsel %vm1132_vm7, %v1120_v34, %v2490_v28  ;;  %v852_v28 = vrot.slane %v593_v40, 1 }
 0x10c   : > { %1796 = vmatprep.mubr.msk.f32.mxu0 %vm1256_vm14, %v1237_v54  ;;  %v1154_v41 = vsel %vm1149_vm8, %v1137_v35, %v2499_v36 }
 0x10d   : > { %v2547_v2 = vpop.permute.xlu1 %867  ;;  %v2549_v5 = vpop.permute.xlu0 %676  ;;  %v1171_v19 = vsel %vm1166_vm9, %v1154_v41, %v2517_v48  ;;  %v1121_v48 = vsel %vm1115_vm6, %v2266_v32, %v2492_v29  ;;  %v854_v58 = vsel %vm623_vm4, %v852_v28, %v853_v26  ;;  %v1063_v41 = vrot.slane %v597_v21, 2 }
 0x10e   : > { %v1138_v57 = vsel %vm1132_vm7, %v1121_v48, %v2501_v37 }
 0x10f   : > { %1034 = vrot.lane.b32.xlu1 %v661_v0, %s1923_s9  ;;  %982 = vrot.lane.b32.xlu0 %v2522_v53, %s1922_s16  ;;  %v1155_v59 = vsel %vm1149_vm8, %v1138_v57, %v2519_v51 }
 0x110   : > { %v1172_v32 = vsel %vm1166_vm9, %v1155_v59, %v2547_v2 }
 0x111   : > { %v1074_v11 = vpop.permute.xlu1 %1073  ;;  %v919_v12 = vpop.permute.xlu0 %918 }
 0x112   : > { %v1238_v8 = vsel %vm1234_vm13, %v1221_v10, %v1074_v11  ;;  %v1188_v30 = vsel %vm1183_vm10, %v1171_v19, %v919_v12  ;;  %v908_v10 = vrot.slane %v595_v61, 2 }
 0x113   : > { %881 = vrot.lane.b32.xlu1 %v661_v0, %s1920_s14  ;;  %829 = vrot.lane.b32.xlu0 %v2522_v53, %s1919_s13 }
 0x114   : > { %1797 = vmatmul.mubr.msk.f32.gmra.mxu0 %vm1256_vm14, %v1238_v8  ;;  %v909_v8 = vsel %vm712_vm3, %v906_v1, %v908_v10 }
 0x115   : > { %v2569_v16 = vpop.permute.xlu1 %765  ;;  %v2571_v17 = vpop.permute.xlu0 %678 }
 0x117   : > { %1087 = vrot.lane.b32.xlu1 %v750_v13, %s1924_s19  ;;  %1036 = vrot.lane.b32.xlu0 %v663_v14, %s1923_s9 }
 0x119   : > { %v969_v22 = vpop.permute.xlu1 %968  ;;  %v921_v23 = vpop.permute.xlu0 %920 }
 0x11a   : > { %v1205_v9 = vsel %vm1200_vm11, %v1188_v30, %v969_v22  ;;  %v1189_v29 = vsel %vm1183_vm10, %v1172_v32, %v921_v23  ;;  %v596_v22 = vld [vmem:[%s2216_s11 + $0xd8] sm:$0xff]  ;;  %v598_v23 = vld [vmem:[%s2216_s11 + $0xe8] sm:$0x3] }
 0x11b   : > { %883 = vrot.lane.b32.xlu1 %v663_v14, %s1920_s14  ;;  %692 = vrot.lane.b32.xlu0 %v661_v0, %s1918_s12  ;;  %v905_v0 = vrot.slane %v593_v40, 2  ;;  %v1065_v28 = vrot.slane %v598_v23, 2 }
 0x11d   : > { %v2578_v25 = vpop.permute.xlu1 %815  ;;  %v2580_v27 = vpop.permute.xlu0 %767  ;;  %v907_v2 = vsel %vm712_vm3, %v905_v0, %v906_v1 }
 0x11f   : > { %1089 = vrot.lane.b32.xlu1 %v752_v24, %s1924_s19  ;;  %934 = vrot.lane.b32.xlu0 %v750_v13, %s1921_s15 }
 0x121   : > { %v1023_v31 = vpop.permute.xlu1 %1022  ;;  %v971_v33 = vpop.permute.xlu0 %970 }
 0x122   : > { %v1222_v36 = vsel %vm1217_vm12, %v1205_v9, %v1023_v31  ;;  %v1206_v37 = vsel %vm1200_vm11, %v1189_v29, %v971_v33  ;;  %v1009_v31 = vrot.slane %v596_v22, 1  ;;  %v1012_v33 = vrot.slane %v598_v23, 1 }
 0x123   : > { %781 = vrot.lane.b32.xlu1 %v750_v13, %s1917_s24  ;;  %694 = vrot.lane.b32.xlu0 %v663_v14, %s1918_s12 }
 0x125   : > { %v2594_v42 = vpop.permute.xlu1 %869  ;;  %v2596_v43 = vpop.permute.xlu0 %817 }
 0x127   : > { %984 = vrot.lane.b32.xlu1 %v593_v40, %s1922_s16  ;;  %936 = vrot.lane.b32.xlu0 %v752_v24, %s1921_s15 }
 0x129   : > { %v1076_v38 = vpop.permute.xlu1 %1075  ;;  %v1025_v44 = vpop.permute.xlu0 %1024 }
 0x12a   : > { %v1239_v56 = vsel %vm1234_vm13, %v1222_v36, %v1076_v38  ;;  %v1223_v51 = vsel %vm1217_vm12, %v1206_v37, %v1025_v44  ;;  %v1066_v44 = vsel %vm712_vm3, %v1063_v41, %v1065_v28 }
 0x12b   : > { %831 = vrot.lane.b32.xlu1 %v593_v40, %s1919_s13  ;;  %783 = vrot.lane.b32.xlu0 %v752_v24, %s1917_s24  ;;  %v1010_v24 = vrot.slane %v597_v21, 1  ;;  %v1122_v40 = vsel %vm1115_vm6, %v2313_v49, %v2549_v5 }
 0x12c   : > { %1799 = vmatprep.mubr.msk.f32.mxu0 %vm1256_vm14, %v1239_v56  ;;  %v1139_v19 = vsel %vm1132_vm7, %v1122_v40, %v2569_v16 }
 0x12d   : > { %v2618_v54 = vpop.permute.xlu1 %871  ;;  %v2620_v60 = vpop.permute.xlu0 %680  ;;  %v1013_v30 = vsel %vm623_vm4, %v1010_v24, %v1012_v33  ;;  %v1011_v9 = vsel %vm623_vm4, %v1009_v31, %v1010_v24  ;;  %v1156_v26 = vsel %vm1149_vm8, %v1139_v19, %v2578_v25 }
 0x12e   : > { %v1173_v49 = vsel %vm1166_vm9, %v1156_v26, %v2594_v42  ;;  %v1123_v42 = vsel %vm1115_vm6, %v2316_v50, %v2571_v17  ;;  %v1124_v10 = vsel %vm1115_vm6, %v2348_v62, %v2620_v60 }
 0x12f   : > { %1038 = vrot.lane.b32.xlu1 %v854_v58, %s1923_s9  ;;  %986 = vrot.lane.b32.xlu0 %v594_v47, %s1922_s16  ;;  %v1140_v59 = vsel %vm1132_vm7, %v1123_v42, %v2580_v27 }
 0x130   : > { %v1157_v61 = vsel %vm1149_vm8, %v1140_v59, %v2596_v43 }
 0x131   : > { %v1078_v39 = vpop.permute.xlu1 %1077  ;;  %v923_v3 = vpop.permute.xlu0 %922  ;;  %v1174_v37 = vsel %vm1166_vm9, %v1157_v61, %v2618_v54 }
 0x132   : > { %v1240_v45 = vsel %vm1234_vm13, %v1223_v51, %v1078_v39  ;;  %v1190_v5 = vsel %vm1183_vm10, %v1173_v49, %v923_v3 }
 0x133   : > { %885 = vrot.lane.b32.xlu1 %v854_v58, %s1920_s14  ;;  %833 = vrot.lane.b32.xlu0 %v594_v47, %s1919_s13  ;;  %v1062_v47 = vrot.slane %v596_v22, 2 }
 0x134   : > { %1800 = vmatmul.mubr.msk.f32.gmra.mxu0 %vm1256_vm14, %v1240_v45 }
 0x135   : > { %v2636_v4 = vpop.permute.xlu1 %769  ;;  %v2638_v6 = vpop.permute.xlu0 %682  ;;  %v1064_v56 = vsel %vm712_vm3, %v1062_v47, %v1063_v41 }
 0x136   : > { %v1125_v62 = vsel %vm1115_vm6, %v2351_v63, %v2638_v6 }
 0x137   : > { %1091 = vrot.lane.b32.xlu1 %v907_v2, %s1924_s19  ;;  %1040 = vrot.lane.b32.xlu0 %v856_v7, %s1923_s9 }
 0x139   : > { %v973_v11 = vpop.permute.xlu1 %972  ;;  %v925_v12 = vpop.permute.xlu0 %924 }
 0x13a   : > { %v1207_v16 = vsel %vm1200_vm11, %v1190_v5, %v973_v11  ;;  %v1191_v0 = vsel %vm1183_vm10, %v1174_v37, %v925_v12  ;;  %v1141_v11 = vsel %vm1132_vm7, %v1124_v10, %v2636_v4 }
 0x13b   : > { %938 = vrot.lane.b32.xlu1 %v907_v2, %s1921_s15  ;;  %887 = vrot.lane.b32.xlu0 %v856_v7, %s1920_s14 }
 0x13d   : > { %v820_v13 = vpop.permute.xlu1 %819  ;;  %v2645_v14 = vpop.permute.xlu0 %771 }
 0x13e   : > { %v1158_v12 = vsel %vm1149_vm8, %v1141_v11, %v820_v13  ;;  %v1142_v60 = vsel %vm1132_vm7, %v1125_v62, %v2645_v14 }
 0x13f   : > { %940 = vrot.lane.b32.xlu1 %v909_v8, %s1921_s15  ;;  %1093 = vrot.lane.b32.xlu0 %v909_v8, %s1924_s19 }
 0x141   : > { %v1027_v34 = vpop.permute.xlu1 %1026  ;;  %v975_v35 = vpop.permute.xlu0 %974 }
 0x142   : > { %v1224_v48 = vsel %vm1217_vm12, %v1207_v16, %v1027_v34  ;;  %v1208_v50 = vsel %vm1200_vm11, %v1191_v0, %v975_v35 }
 0x143   : > { %990 = vrot.lane.b32.xlu1 %v597_v21, %s1922_s16  ;;  %988 = vrot.lane.b32.xlu0 %v596_v22, %s1922_s16 }
 0x145   : > { %v874_v36 = vpop.permute.xlu1 %873  ;;  %v822_v38 = vpop.permute.xlu0 %821 }
 0x146   : > { %v1175_v22 = vsel %vm1166_vm9, %v1158_v12, %v874_v36  ;;  %v1159_v4 = vsel %vm1149_vm8, %v1142_v60, %v822_v38 }
 0x147   : > { %1044 = vrot.lane.b32.xlu1 %v1013_v30, %s1923_s9  ;;  %1042 = vrot.lane.b32.xlu0 %v1011_v9, %s1923_s9 }
 0x149   : > { %v1080_v25 = vpop.permute.xlu1 %1079  ;;  %v1029_v57 = vpop.permute.xlu0 %1028 }
 0x14a   : > { %v1241_v58 = vsel %vm1234_vm13, %v1224_v48, %v1080_v25  ;;  %v1225_v17 = vsel %vm1217_vm12, %v1208_v50, %v1029_v57 }
 0x14b   : > { %1097 = vrot.lane.b32.xlu1 %v1066_v44, %s1924_s19  ;;  %1095 = vrot.lane.b32.xlu0 %v1064_v56, %s1924_s19 }
 0x14c   : > { %1802 = vmatprep.mubr.msk.f32.mxu0 %vm1256_vm14, %v1241_v58 }
 0x14d   : > { %v876_v32 = vpop.permute.xlu1 %875  ;;  %v685_v29 = vpop.permute.xlu0 %684 }
 0x14e   : > { %v1176_v41 = vsel %vm1166_vm9, %v1159_v4, %v876_v32  ;;  %v1126_v44 = vsel %vm1115_vm6, %v2383_v15, %v685_v29 }
 0x151   : > { %v1082_v1 = vpop.permute.xlu1 %1081  ;;  %v927_v18 = vpop.permute.xlu0 %926 }
 0x152   : > { %v1242_v27 = vsel %vm1234_vm13, %v1225_v17, %v1082_v1  ;;  %v1192_v23 = vsel %vm1183_vm10, %v1175_v22, %v927_v18 }
 0x153   : > { %1803 = vmatmul.mubr.msk.f32.gmra.mxu0 %vm1256_vm14, %v1242_v27 }
 0x155   : > { %v774_v51 = vpop.permute.xlu1 %773  ;;  %v687_v39 = vpop.permute.xlu0 %686 }
 0x156   : > { %v1143_v56 = vsel %vm1132_vm7, %v1126_v44, %v774_v51  ;;  %v1127_v15 = vsel %vm1115_vm6, %v2390_v20, %v687_v39 }
 0x159   : > { %v977_v43 = vpop.permute.xlu1 %976  ;;  %v929_v3 = vpop.permute.xlu0 %928 }
 0x15a   : > { %v1209_v24 = vsel %vm1200_vm11, %v1192_v23, %v977_v43  ;;  %v1193_v47 = vsel %vm1183_vm10, %v1176_v41, %v929_v3 }
 0x15d   : > { %v824_v45 = vpop.permute.xlu1 %823  ;;  %v776_v2 = vpop.permute.xlu0 %775 }
 0x15e   : > { %v1160_v48 = vsel %vm1149_vm8, %v1143_v56, %v824_v45  ;;  %v1144_v29 = vsel %vm1132_vm7, %v1127_v15, %v776_v2 }
 0x161   : > { %v1031_v7 = vpop.permute.xlu1 %1030  ;;  %v979_v54 = vpop.permute.xlu0 %978 }
 0x162   : > { %v1226_v31 = vsel %vm1217_vm12, %v1209_v24, %v1031_v7  ;;  %v1210_v19 = vsel %vm1200_vm11, %v1193_v47, %v979_v54 }
 0x165   : > { %v878_v8 = vpop.permute.xlu1 %877  ;;  %v826_v21 = vpop.permute.xlu0 %825 }
 0x166   : > { %v1177_v58 = vsel %vm1166_vm9, %v1160_v48, %v878_v8  ;;  %v1161_v50 = vsel %vm1149_vm8, %v1144_v29, %v826_v21 }
 0x169   : > { %v1084_v33 = vpop.permute.xlu1 %1083  ;;  %v1033_v34 = vpop.permute.xlu0 %1032 }
 0x16a   : > { %v1243_v35 = vsel %vm1234_vm13, %v1226_v31, %v1084_v33  ;;  %v1227_v30 = vsel %vm1217_vm12, %v1210_v19, %v1033_v34 }
 0x16b   : > { %1805 = vmatprep.mubr.msk.f32.mxu1 %vm1256_vm14, %v1243_v35 }
 0x16d   : > { %v880_v13 = vpop.permute.xlu1 %879  ;;  %v689_v40 = vpop.permute.xlu0 %688 }
 0x16e   : > { %v1178_v18 = vsel %vm1166_vm9, %v1161_v50, %v880_v13  ;;  %v1128_v21 = vsel %vm1115_vm6, %v2437_v52, %v689_v40 }
 0x171   : > { %v1086_v9 = vpop.permute.xlu1 %1085  ;;  %v931_v28 = vpop.permute.xlu0 %930 }
 0x172   : > { %v1244_v63 = vsel %vm1234_vm13, %v1227_v30, %v1086_v9  ;;  %v1194_v42 = vsel %vm1183_vm10, %v1177_v58, %v931_v28 }
 0x173   : > { %1806 = vmatmul.mubr.msk.f32.vlgmr.msra.gmra.mxu1 %vm1256_vm14, %v1244_v63 }
 0x175   : > { %v778_v6 = vpop.permute.xlu1 %777  ;;  %v691_v14 = vpop.permute.xlu0 %690 }
 0x176   : > { %v1145_v22 = vsel %vm1132_vm7, %v1128_v21, %v778_v6  ;;  %v1129_v52 = vsel %vm1115_vm6, %v2445_v55, %v691_v14  ;;  %v2756_v14 = vld [vmem:[%s2882_s4] ss:$0 sm:$0xff] }
 0x179   : > { %v981_v26 = vpop.permute.xlu1 %980  ;;  %v933_v36 = vpop.permute.xlu0 %932 }
 0x17a   : > { %v1211_v59 = vsel %vm1200_vm11, %v1194_v42, %v981_v26  ;;  %v1195_v27 = vsel %vm1183_vm10, %v1178_v18, %v933_v36 }
 0x17d   : > { %v828_v38 = vpop.permute.xlu1 %827  ;;  %v780_v49 = vpop.permute.xlu0 %779 }
 0x17e   : > { %v1162_v23 = vsel %vm1149_vm8, %v1145_v22, %v828_v38  ;;  %v1146_v40 = vsel %vm1132_vm7, %v1129_v52, %v780_v49 }
 0x181   : > { %v1035_v5 = vpop.permute.xlu1 %1034  ;;  %v983_v16 = vpop.permute.xlu0 %982 }
 0x182   : > { %v1228_v61 = vsel %vm1217_vm12, %v1211_v59, %v1035_v5  ;;  %v1212_v51 = vsel %vm1200_vm11, %v1195_v27, %v983_v16 }
 0x185   : > { %v882_v25 = vpop.permute.xlu1 %881  ;;  %v830_v57 = vpop.permute.xlu0 %829 }
 0x186   : > { %v1179_v33 = vsel %vm1166_vm9, %v1162_v23, %v882_v25  ;;  %v1163_v41 = vsel %vm1149_vm8, %v1146_v40, %v830_v57 }
 0x189   : > { %v1088_v32 = vpop.permute.xlu1 %1087  ;;  %v1037_v37 = vpop.permute.xlu0 %1036 }
 0x18a   : > { %v1245_v0 = vsel %vm1234_vm13, %v1228_v61, %v1088_v32  ;;  %v1229_v43 = vsel %vm1217_vm12, %v1212_v51, %v1037_v37 }
 0x18b   : > { %1808 = vmatprep.mubr.msk.f32.mxu1 %vm1256_vm14, %v1245_v0 }
 0x18d   : > { %v884_v17 = vpop.permute.xlu1 %883  ;;  %v693_v1 = vpop.permute.xlu0 %692 }
 0x18e   : > { %v1180_v30 = vsel %vm1166_vm9, %v1163_v41, %v884_v17  ;;  %v1130_v16 = vsel %vm1115_vm6, %v2513_v46, %v693_v1 }
 0x191   : > { %v1090_v3 = vpop.permute.xlu1 %1089  ;;  %v935_v45 = vpop.permute.xlu0 %934 }
 0x192   : > { %v1246_v20 = vsel %vm1234_vm13, %v1229_v43, %v1090_v3  ;;  %v1196_v34 = vsel %vm1183_vm10, %v1179_v33, %v935_v45 }
 0x193   : > { %1809 = vmatmul.mubr.msk.f32.gmra.mxu1 %vm1256_vm14, %v1246_v20 }
 0x195   : > { %v782_v39 = vpop.permute.xlu1 %781  ;;  %v695_v2 = vpop.permute.xlu0 %694 }
 0x196   : > { %v1147_v56 = vsel %vm1132_vm7, %v1130_v16, %v782_v39  ;;  %v1131_v48 = vsel %vm1115_vm6, %v2522_v53, %v695_v2 }
 0x199   : > { %v985_v7 = vpop.permute.xlu1 %984  ;;  %v937_v54 = vpop.permute.xlu0 %936 }
 0x19a   : > { %v1213_v35 = vsel %vm1200_vm11, %v1196_v34, %v985_v7  ;;  %v1197_v9 = vsel %vm1183_vm10, %v1180_v30, %v937_v54 }
 0x19d   : > { %v832_v10 = vpop.permute.xlu1 %831  ;;  %v784_v11 = vpop.permute.xlu0 %783 }
 0x19e   : > { %v1164_v58 = vsel %vm1149_vm8, %v1147_v56, %v832_v10  ;;  %v1148_v42 = vsel %vm1132_vm7, %v1131_v48, %v784_v11 }
 0x1a1   : > { %v1039_v12 = vpop.permute.xlu1 %1038  ;;  %v987_v8 = vpop.permute.xlu0 %986 }
 0x1a2   : > { %v1230_v62 = vsel %vm1217_vm12, %v1213_v35, %v1039_v12  ;;  %v1214_v28 = vsel %vm1200_vm11, %v1197_v9, %v987_v8 }
 0x1a5   : > { %v886_v24 = vpop.permute.xlu1 %885  ;;  %v834_v31 = vpop.permute.xlu0 %833 }
 0x1a6   : > { %v1165_v59 = vsel %vm1149_vm8, %v1148_v42, %v834_v31  ;;  %v1181_v0 = vsel %vm1166_vm9, %v1164_v58, %v886_v24 }
 0x1a9   : > { %v1092_v60 = vpop.permute.xlu1 %1091  ;;  %v1041_v4 = vpop.permute.xlu0 %1040 }
 0x1aa   : > { %v1247_v13 = vsel %vm1234_vm13, %v1230_v62, %v1092_v60  ;;  %v1231_v63 = vsel %vm1217_vm12, %v1214_v28, %v1041_v4 }
 0x1ab   : > { %1811 = vmatprep.mubr.msk.f32.mxu1 %vm1256_vm14, %v1247_v13 }
 0x1ad   : > { %v939_v47 = vpop.permute.xlu1 %938  ;;  %v888_v19 = vpop.permute.xlu0 %887 }
 0x1ae   : > { %v1182_v15 = vsel %vm1166_vm9, %v1165_v59, %v888_v19  ;;  %v1198_v50 = vsel %vm1183_vm10, %v1181_v0, %v939_v47 }
 0x1b1   : > { %v941_v6 = vpop.permute.xlu1 %940  ;;  %v1094_v26 = vpop.permute.xlu0 %1093 }
 0x1b2   : > { %v1248_v55 = vsel %vm1234_vm13, %v1231_v63, %v1094_v26  ;;  %v1199_v17 = vsel %vm1183_vm10, %v1182_v15, %v941_v6 }
 0x1b3   : > { %1812 = vmatmul.mubr.msk.f32.gmra.mxu1 %vm1256_vm14, %v1248_v55 }
 0x1b4   : > { %v1795_v36 = vpop.f32.mrf.mxu0 }
 0x1b5   : > { %v1455_v38 = vadd.f32 %v1795_v36, %v2756_v14  ;;  %v991_v49 = vpop.permute.xlu1 %990  ;;  %v989_v5 = vpop.permute.xlu0 %988 }
 0x1b6   : > { %v1375_v44 = vpop.f32.mrf.mxu0  ;;  %v1216_v27 = vsel %vm1200_vm11, %v1199_v17, %v991_v49  ;;  %v1215_v43 = vsel %vm1200_vm11, %v1198_v50, %v989_v5 }
 0x1b7   : > { %1471 = vst.msk [vmem:[%s2016_s29 + $0x8] sm:$0xff] %vm1115_vm6, %v1455_v38  ;;  %v1529_v25 = vmul.f32 %v1455_v38, %v1455_v38  ;;  %v1454_v57 = vadd.f32 %v2756_v14, %v1375_v44  ;;  %v1488_v61 = vsel %vm1115_vm6, %v1455_v38, 0.0 }
 0x1b9   : > { %1470 = vst.msk [vmem:[%s2016_s29] sm:$0xff] %vm1115_vm6, %v1454_v57  ;;  %v1487_v46 = vsel %vm1115_vm6, %v1454_v57, 0.0  ;;  %v1528_v32 = vmul.f32 %v1454_v57, %v1454_v57  ;;  %v1045_v37 = vpop.permute.xlu1 %1044  ;;  %v1043_v53 = vpop.permute.xlu0 %1042  ;;  %v1545_v1 = vsel %vm1115_vm6, %v1529_v25, 0.0 }
 0x1ba   : > { %v1489_v29 = vadd.f32 %v1488_v61, %v1487_v46  ;;  %v1233_v3 = vsel %vm1217_vm12, %v1216_v27, %v1045_v37  ;;  %v1232_v45 = vsel %vm1217_vm12, %v1215_v43, %v1043_v53 }
 0x1bb   : > { %v1544_v18 = vsel %vm1115_vm6, %v1528_v32, 0.0 }
 0x1bc   : > { %v1546_v51 = vadd.f32 %v1545_v1, %v1544_v18 }
 0x1bd   : > { %v1098_v20 = vpop.permute.xlu1 %1097  ;;  %v1096_v39 = vpop.permute.xlu0 %1095 }
 0x1be   : > { %v1250_v2 = vsel %vm1234_vm13, %v1233_v3, %v1098_v20  ;;  %v1249_v7 = vsel %vm1234_vm13, %v1232_v45, %v1096_v39 }
 0x1bf   : > { %1814 = vmatprep.mubr.msk.f32.mxu1 %vm1256_vm14, %v1249_v7 }
 0x1c0   : > { %1815 = vmatmul.mubr.msk.f32.gmra.mxu1 %vm1256_vm14, %v1250_v2 }
 0x1d4   : > { %v1798_v54 = vpop.f32.mrf.mxu0 }
 0x1d5   : > { %v1457_v10 = vadd.f32 %v1798_v54, %v2756_v14 }
 0x1d6   : > { %v1385_v11 = vpop.f32.mrf.mxu0 }
 0x1d7   : > { %1473 = vst.msk [vmem:[%s2016_s29 + $0x18] sm:$0xff] %vm1115_vm6, %v1457_v10  ;;  %v1456_v12 = vadd.f32 %v2756_v14, %v1385_v11  ;;  %v1531_v8 = vmul.f32 %v1457_v10, %v1457_v10  ;;  %v1492_v24 = vsel %vm1115_vm6, %v1457_v10, 0.0 }
 0x1d9   : > { %1472 = vst.msk [vmem:[%s2016_s29 + $0x10] sm:$0xff] %vm1115_vm6, %v1456_v12  ;;  %v1490_v21 = vsel %vm1115_vm6, %v1456_v12, 0.0  ;;  %v1530_v22 = vmul.f32 %v1456_v12, %v1456_v12  ;;  %v1549_v35 = vsel %vm1115_vm6, %v1531_v8, 0.0 }
 0x1da   : > { %v1491_v23 = vadd.f32 %v1490_v21, %v1489_v29 }
 0x1db   : > { %v1547_v31 = vsel %vm1115_vm6, %v1530_v22, 0.0 }
 0x1dc   : > { %v1548_v33 = vadd.f32 %v1547_v31, %v1546_v51  ;;  %v1493_v34 = vadd.f32 %v1492_v24, %v1491_v23 }
 0x1de   : > { %v1550_v62 = vadd.f32 %v1549_v35, %v1548_v33 }
 0x1f4   : > { %v1801_v60 = vpop.f32.mrf.mxu0 }
 0x1f5   : > { %v1459_v4 = vadd.f32 %v1801_v60, %v2756_v14 }
 0x1f6   : > { %v1395_v13 = vpop.f32.mrf.mxu0 }
 0x1f7   : > { %1475 = vst.msk [vmem:[%s2016_s29 + $0x28] sm:$0xff] %vm1115_vm6, %v1459_v4  ;;  %v1458_v52 = vadd.f32 %v2756_v14, %v1395_v13  ;;  %v1533_v40 = vmul.f32 %v1459_v4, %v1459_v4  ;;  %v1496_v30 = vsel %vm1115_vm6, %v1459_v4, 0.0 }
 0x1f9   : > { %1474 = vst.msk [vmem:[%s2016_s29 + $0x20] sm:$0xff] %vm1115_vm6, %v1458_v52  ;;  %v1494_v41 = vsel %vm1115_vm6, %v1458_v52, 0.0  ;;  %v1532_v47 = vmul.f32 %v1458_v52, %v1458_v52  ;;  %v1553_v6 = vsel %vm1115_vm6, %v1533_v40, 0.0 }
 0x1fa   : > { %v1495_v19 = vadd.f32 %v1494_v41, %v1493_v34 }
 0x1fb   : > { %v1551_v9 = vsel %vm1115_vm6, %v1532_v47, 0.0 }
 0x1fc   : > { %v1552_v28 = vadd.f32 %v1551_v9, %v1550_v62  ;;  %v1497_v63 = vadd.f32 %v1496_v30, %v1495_v19 }
 0x1fe   : > { %v1554_v26 = vadd.f32 %v1553_v6, %v1552_v28 }
 0x213   : > { %v1804_v55 = vpop.f32.mrf.mxu0 }
 0x214   : > { %v1461_v36 = vadd.f32 %v1804_v55, %v2756_v14 }
 0x215   : > { %v1405_v38 = vpop.f32.mrf.mxu0 }
 0x216   : > { %1477 = vst.msk [vmem:[%s2016_s29 + $0x38] sm:$0xff] %vm1115_vm6, %v1461_v36  ;;  %v1460_v49 = vadd.f32 %v2756_v14, %v1405_v38  ;;  %v1535_v5 = vmul.f32 %v1461_v36, %v1461_v36  ;;  %v1500_v48 = vsel %vm1115_vm6, %v1461_v36, 0.0 }
 0x218   : > { %1476 = vst.msk [vmem:[%s2016_s29 + $0x30] sm:$0xff] %vm1115_vm6, %v1460_v49  ;;  %v1498_v16 = vsel %vm1115_vm6, %v1460_v49, 0.0  ;;  %v1534_v44 = vmul.f32 %v1460_v49, %v1460_v49  ;;  %v1557_v42 = vsel %vm1115_vm6, %v1535_v5, 0.0 }
 0x219   : > { %v1499_v56 = vadd.f32 %v1498_v16, %v1497_v63 }
 0x21a   : > { %v1555_v25 = vsel %vm1115_vm6, %v1534_v44, 0.0 }
 0x21b   : > { %v1556_v57 = vadd.f32 %v1555_v25, %v1554_v26  ;;  %v1501_v58 = vadd.f32 %v1500_v48, %v1499_v56 }
 0x21d   : > { %v1558_v59 = vadd.f32 %v1557_v42, %v1556_v57 }
 0x233   : > { %v1807_v61 = vpop.f32.mrf.mxu1 }
 0x234   : > { %v1463_v46 = vadd.f32 %v1807_v61, %v2756_v14 }
 0x235   : > { %v1415_v32 = vpop.f32.mrf.mxu1 }
 0x236   : > { %1479 = vst.msk [vmem:[%s2016_s29 + $0x48] sm:$0xff] %vm1115_vm6, %v1463_v46  ;;  %v1462_v37 = vadd.f32 %v2756_v14, %v1415_v32  ;;  %v1537_v53 = vmul.f32 %v1463_v46, %v1463_v46  ;;  %v1504_v50 = vsel %vm1115_vm6, %v1463_v46, 0.0  ;;  %v1486_v46 = vld [vmem:[%s2006_s18] sm:$0x1] }
 0x238   : > { %1478 = vst.msk [vmem:[%s2016_s29 + $0x40] sm:$0xff] %vm1115_vm6, %v1462_v37  ;;  %v1502_v0 = vsel %vm1115_vm6, %v1462_v37, 0.0  ;;  %v1536_v15 = vmul.f32 %v1462_v37, %v1462_v37  ;;  %v1561_v27 = vsel %vm1115_vm6, %v1537_v53, 0.0  ;;  %v1527_v53 = vld [vmem:[%s2011_s22] sm:$0x1] }
 0x239   : > { %v1503_v29 = vadd.f32 %v1502_v0, %v1501_v58 }
 0x23a   : > { %v1559_v17 = vsel %vm1115_vm6, %v1536_v15, 0.0 }
 0x23b   : > { %v1560_v1 = vadd.f32 %v1559_v17, %v1558_v59  ;;  %v1505_v18 = vadd.f32 %v1504_v50, %v1503_v29 }
 0x23d   : > { %v1562_v51 = vadd.f32 %v1561_v27, %v1560_v1 }
 0x253   : > { %v1810_v43 = vpop.f32.mrf.mxu1 }
 0x254   : > { %v1465_v3 = vadd.f32 %v1810_v43, %v2756_v14 }
 0x255   : > { %v1425_v45 = vpop.f32.mrf.mxu1 }
 0x256   : > { %1481 = vst.msk [vmem:[%s2016_s29 + $0x58] sm:$0xff] %vm1115_vm6, %v1465_v3  ;;  %v1464_v20 = vadd.f32 %v2756_v14, %v1425_v45  ;;  %v1539_v21 = vmul.f32 %v1465_v3, %v1465_v3  ;;  %v1508_v24 = vsel %vm1115_vm6, %v1465_v3, 0.0 }
 0x258   : > { %1480 = vst.msk [vmem:[%s2016_s29 + $0x50] sm:$0xff] %vm1115_vm6, %v1464_v20  ;;  %v1538_v7 = vmul.f32 %v1464_v20, %v1464_v20  ;;  %v1506_v11 = vsel %vm1115_vm6, %v1464_v20, 0.0  ;;  %v1565_v34 = vsel %vm1115_vm6, %v1539_v21, 0.0 }
 0x259   : > { %v1507_v8 = vadd.f32 %v1506_v11, %v1505_v18 }
 0x25a   : > { %v1563_v12 = vsel %vm1115_vm6, %v1538_v7, 0.0 }
 0x25b   : > { %v1564_v23 = vadd.f32 %v1563_v12, %v1562_v51  ;;  %v1509_v33 = vadd.f32 %v1508_v24, %v1507_v8 }
 0x25d   : > { %v1566_v60 = vadd.f32 %v1565_v34, %v1564_v23 }
 0x273   : > { %v1813_v39 = vpop.f32.mrf.mxu1 }
 0x274   : > { %v1467_v2 = vadd.f32 %v1813_v39, %v2756_v14 }
 0x275   : > { %v1435_v54 = vpop.f32.mrf.mxu1 }
 0x276   : > { %1483 = vst.msk [vmem:[%s2016_s29 + $0x68] sm:$0xff] %vm1115_vm6, %v1467_v2  ;;  %v1466_v10 = vadd.f32 %v2756_v14, %v1435_v54  ;;  %v1541_v13 = vmul.f32 %v1467_v2, %v1467_v2  ;;  %v1512_v47 = vsel %vm1115_vm6, %v1467_v2, 0.0 }
 0x278   : > { %1482 = vst.msk [vmem:[%s2016_s29 + $0x60] sm:$0xff] %vm1115_vm6, %v1466_v10  ;;  %v1540_v22 = vmul.f32 %v1466_v10, %v1466_v10  ;;  %v1510_v31 = vsel %vm1115_vm6, %v1466_v10, 0.0  ;;  %v1569_v9 = vsel %vm1115_vm6, %v1541_v13, 0.0 }
 0x279   : > { %v1511_v62 = vadd.f32 %v1510_v31, %v1509_v33 }
 0x27a   : > { %v1567_v35 = vsel %vm1115_vm6, %v1540_v22, 0.0 }
 0x27b   : > { %v1568_v40 = vadd.f32 %v1567_v35, %v1566_v60  ;;  %v1513_v30 = vadd.f32 %v1512_v47, %v1511_v62 }
 0x27d   : > { %v1570_v55 = vadd.f32 %v1569_v9, %v1568_v40 }
 0x280   : > { %v1816_v4 = vpop.f32.mrf.mxu1 }
 0x281   : > { %v1469_v52 = vadd.f32 %v1816_v4, %v2756_v14 }
 0x282   : > { %v1445_v41 = vpop.f32.mrf.mxu1 }
 0x283   : > { %1485 = vst.msk [vmem:[%s2016_s29 + $0x78] sm:$0xff] %vm1115_vm6, %v1469_v52  ;;  %v1468_v19 = vadd.f32 %v2756_v14, %v1445_v41  ;;  %v1543_v28 = vmul.f32 %v1469_v52, %v1469_v52  ;;  %v1516_v36 = vsel %vm1115_vm6, %v1469_v52, 0.0 }
 0x285   : > { %1484 = vst.msk [vmem:[%s2016_s29 + $0x70] sm:$0xff] %vm1115_vm6, %v1468_v19  ;;  %v1514_v63 = vsel %vm1115_vm6, %v1468_v19, 0.0  ;;  %v1542_v6 = vmul.f32 %v1468_v19, %v1468_v19  ;;  %v1573_v14 = vsel %vm1115_vm6, %v1543_v28, 0.0 }
 0x286   : > { %v1515_v26 = vadd.f32 %v1514_v63, %v1513_v30 }
 0x287   : > { %v1571_v38 = vsel %vm1115_vm6, %v1542_v6, 0.0 }
 0x288   : > { %v1517_v49 = vadd.f32 %v1516_v36, %v1515_v26  ;;  %v1572_v5 = vadd.f32 %v1571_v38, %v1570_v55 }
 0x28a   : > { %v1518_v16 = vrot.slane %v1517_v49, 4  ;;  %v1574_v44 = vadd.f32 %v1573_v14, %v1572_v5 }
 0x28c   : > { %v1519_v56 = vadd.f32 %v1518_v16, %v1517_v49  ;;  %v1575_v48 = vrot.slane %v1574_v44, 4 }
 0x28e   : > { %v1520_v25 = vrot.slane %v1519_v56, 2  ;;  %v1576_v57 = vadd.f32 %v1575_v48, %v1574_v44 }
 0x290   : > { %v1521_v58 = vadd.f32 %v1520_v25, %v1519_v56  ;;  %v1577_v42 = vrot.slane %v1576_v57, 2 }
 0x292   : > { %v1522_v59 = vrot.slane %v1521_v58, 1  ;;  %v1578_v61 = vadd.f32 %v1577_v42, %v1576_v57 }
 0x294   : > { %v1523_v32 = vadd.f32 %v1522_v59, %v1521_v58  ;;  %v1579_v37 = vrot.slane %v1578_v61, 1 }
 0x296   : > { %v1524_v0 = vadd.f32 %v1523_v32, %v1486_v46  ;;  %v1580_v15 = vadd.f32 %v1579_v37, %v1578_v61 }
 0x298   : > { %1526 = vst.msk [vmem:[%s2006_s18] sm:$0x1] %vm1525_vm15, %v1524_v0  ;;  %v1581_v29 = vadd.f32 %v1580_v15, %v1527_v53 }
 0x29a   : > { %1582 = vst.msk [vmem:[%s2011_s22] sm:$0x1] %vm1525_vm15, %v1581_v29 }
 0x29b PF: > { %s18_s28 = sadd.s32 1, %s1914_s28   ;;  %s2888_s29 = sld [smem:[#allocation3_spill]] }
 0x29c   : > { %p15_p8 = scmp.ge.s32.totalorder %s18_s28, 6   ;;  %s2889_s12 = sld [smem:[#allocation4_spill]] }
 0x29d   : > { %s2890_s24 = smov %s1906_s26  ;;  %s2891_s25 = smov %s1910_s27 }
 0x29e   :  { %17 = sbr.rel (!%p15_p8) target bundleno = 3 (0x3), region = 100 }
 0x2a1   : > { %s2892_s26 = smov %s2888_s29 }
 0x2a2   : > { %s2893_s27 = smov %s2889_s12 }

// kernel: up_forward.5
= control target key start
LH: loop header
LB: loop body
LE: loop exit
PB: predicated region body
PF: predicated region fallthrough
CT: control target
= control target key end

     0   :  { %s2978_s24 = smov 0   ;;  %s2980_s25 = smov 0   ;;  %s5148_s0 = inlined_call_operand.vmem [shape: f32[2,16,16,4], index: 0, kind: input, shape index: {}]   ;;  %s5149_s1 = inlined_call_operand.vmem [shape: f32[2,16,16,4], index: 1, kind: input, shape index: {}]   ;;  %s5150_s2 = inlined_call_operand.vmem [shape: f32[36,4], index: 2, kind: input, shape index: {}]   ;;  %s5151_s3 = inlined_call_operand.vmem [shape: f32[36,4], index: 3, kind: input, shape index: {}]   ;;  %s5152_s4 = inlined_call_operand.vmem [shape: f32[1,4], index: 4, kind: input, shape index: {}]   ;;  %s5153_s5 = inlined_call_operand.vmem [shape: f32[2,16,16,4], index: 5, kind: output, shape index: {0}]   ;;  %s5154_s6 = inlined_call_operand.vmem [shape: f32[2,1,4], index: 6, kind: output, shape index: {1}]   ;;  %s5155_s7 = inlined_call_operand.vmem [shape: f32[2,1,4], index: 7, kind: output, shape index: {2}]  }
   0x1   :  { %5169 = sst [smem:[#allocation86_spill]] %s5148_s0  ;;  %s2982_s26 = smov 0  }
   0x2   :  { %s2984_s27 = smov 0   ;;  %s2986_s28 = smov 0  }
   0x3 LB: > { %s27_s29 = sadd.s32 1, %s2919_s26  ;;  %s30_s30 = sadd.s32 1, %s2923_s27  ;;  %s2927_s28 = sphi %s2986_s28, %s18_s28   ;;  %s2923_s27 = sphi %s2984_s27, %s5338_s27   ;;  %s2919_s26 = sphi %s2982_s26, %s5337_s26   ;;  %s2915_s25 = sphi %s2980_s25, %s5336_s25   ;;  %s2911_s24 = sphi %s2978_s24, %s5335_s24  }
   0x4   : > { %p28_p0 = scmp.ge.s32.totalorder %s27_s29, 2  ;;  %p2662_p1 = scmp.ge.s32.totalorder %s2927_s28, 1 }
   0x5   : > { %p266_p2 = scmp.lt.s32.totalorder %s2927_s28, 5 }
   0x6   : > { %s5340_s29 = smov (%p28_p0, %s27_s29), 0  ;;  %s5342_s30 = smov (!%p28_p0, %s30_s30), %s2923_s27 }
   0x7   : > { %5170 = sst [smem:[#allocation4_spill]] %s5340_s29  ;;  %p267_p3 = pnand %p2662_p1, %p266_p2 }
   0x8   : > { %p32_p4 = scmp.ge.s32.totalorder %s5342_s30, 2 }
   0x9   : > { %270 = sbr.rel (%p267_p3) target bundleno = 967 (0x3c7), region = 40 }
   0xa   : > { %s5344_s30 = smov (%p32_p4, %s5342_s30), 0 }
   0xb   : > { %5171 = sst [smem:[#allocation5_spill]] %s5344_s30 }
   0xe   : > { %p314_p5 = scmp.lt.s32.totalorder %s2915_s25, 1  ;;  %s2667_s8 = sshll.u32 %s2911_s24, 3 }
   0xf   : > { %p327_p6 = scmp.lt.s32.totalorder %s2667_s8, 15  ;;  %s5172_s0 = sld [smem:[#allocation86_spill]] }
  0x10   : > { %s5346_s25 = smov (!%p314_p5, %s2915_s25), 1  ;;  %p2671_p7 = scmp.ne.s32.totalorder %s2911_s24, 0 }
  0x11   : > { %s5348_s8 = smov (!%p327_p6, %s2667_s8), 15  ;;  %s2711_s9 = sshll.u32 %s5346_s25, 8 }
  0x12   : > { %s2669_s10 = sshll.u32 %s5346_s25, 5  ;;  %s3019_s16 = scalar_lea.vmem %s5149_s1, %s2711_s9 }
  0x13   : > { %s2668_s17 = sshll.u32 %s5348_s8, 1  ;;  %s3024_s20 = scalar_lea.vmem %s5154_s6, %s5346_s25 }
  0x14   : > { %s331_s21 = sadd.s32 %s2669_s10, %s2668_s17  ;;  %s3029_s30 = scalar_lea.vmem %s5155_s7, %s5346_s25 }
  0x15   : > { %s3014_s13 = scalar_lea.vmem %s5172_s0, %s2711_s9  ;;  %s2670_s11 = sshll.u32 %s331_s21, 3 }
  0x16   : > { %s3034_s29 = scalar_lea.vmem %s5153_s5, %s2670_s11  ;;  %344 = sbr.rel (%p2671_p7) target bundleno = 115 (0x73), region = 44 }
  0x1b   : > { %vm380_vm0 = vcmask 31744   ;;  %vm383_vm1 = vcmask 25600   ;;  %vm345_vm2 = vcmask 24576   ;;  %v3038_v0 = vld [vmem:[%s3014_s13] sm:$0xff]  ;;  %v3041_v1 = vld [vmem:[%s3014_s13 + $0x8] sm:$0xff]  ;;  %v2929_v2 = vmov 0.0  }
  0x1c   : > { %385 = vst.msk [vmem:[#allocation2 + $0x18] sm:$0xff] %vm380_vm0, %v2929_v2  ;;  %381 = vst.msk [vmem:[#allocation2] sm:$0xff] %vm380_vm0, %v2929_v2  ;;  %v350_v3 = vld [vmem:[%s3014_s13 + $0x10] sm:$0xff]  ;;  %v351_v4 = vld [vmem:[%s3014_s13 + $0x18] sm:$0xff] }
  0x1d   : > { %382 = vst.msk [vmem:[#allocation2 + $0x8] sm:$0xff] %vm380_vm0, %v2929_v2  ;;  %386 = vst.msk [vmem:[#allocation2 + $0x20] sm:$0xff] %vm380_vm0, %v2929_v2  ;;  %v352_v5 = vld [vmem:[%s3014_s13 + $0x20] sm:$0xff]  ;;  %v353_v6 = vld [vmem:[%s3014_s13 + $0x28] sm:$0xff] }
  0x1e   : > { %388 = vst.msk [vmem:[#allocation2 + $0x30] sm:$0xff] %vm380_vm0, %v2929_v2  ;;  %389 = vst.msk [vmem:[#allocation2 + $0x38] sm:$0xff] %vm380_vm0, %v2929_v2  ;;  %v354_v7 = vld [vmem:[%s3014_s13 + $0x30] sm:$0xff]  ;;  %v355_v8 = vld [vmem:[%s3014_s13 + $0x38] sm:$0xff] }
  0x1f   : > { %391 = vst.msk [vmem:[#allocation2 + $0x48] sm:$0xff] %vm380_vm0, %v2929_v2  ;;  %392 = vst.msk [vmem:[#allocation2 + $0x50] sm:$0xff] %vm380_vm0, %v2929_v2  ;;  %v356_v9 = vld [vmem:[%s3014_s13 + $0x40] sm:$0xff]  ;;  %v357_v10 = vld [vmem:[%s3014_s13 + $0x48] sm:$0xff] }
  0x20   : > { %394 = vst.msk [vmem:[#allocation2 + $0x60] sm:$0xff] %vm380_vm0, %v2929_v2  ;;  %395 = vst.msk [vmem:[#allocation2 + $0x68] sm:$0xff] %vm380_vm0, %v2929_v2  ;;  %v358_v11 = vld [vmem:[%s3014_s13 + $0x50] sm:$0xff]  ;;  %v359_v12 = vld [vmem:[%s3014_s13 + $0x58] sm:$0xff] }
  0x21   : > { %397 = vst.msk [vmem:[#allocation2 + $0x78] sm:$0xff] %vm380_vm0, %v2929_v2  ;;  %398 = vst.msk [vmem:[#allocation2 + $0x80] sm:$0xff] %vm380_vm0, %v2929_v2  ;;  %v360_v13 = vld [vmem:[%s3014_s13 + $0x60] sm:$0xff]  ;;  %v361_v14 = vld [vmem:[%s3014_s13 + $0x68] sm:$0xff] }
  0x22   : > { %400 = vst.msk [vmem:[#allocation2 + $0x90] sm:$0xff] %vm380_vm0, %v2929_v2  ;;  %401 = vst.msk [vmem:[#allocation2 + $0x98] sm:$0xff] %vm380_vm0, %v2929_v2  ;;  %v362_v15 = vld [vmem:[%s3014_s13 + $0x70] sm:$0xff]  ;;  %v363_v16 = vld [vmem:[%s3014_s13 + $0x78] sm:$0xff] }
  0x23   : > { %403 = vst.msk [vmem:[#allocation2 + $0xa8] sm:$0xff] %vm380_vm0, %v2929_v2  ;;  %404 = vst.msk [vmem:[#allocation2 + $0xb0] sm:$0xff] %vm380_vm0, %v2929_v2  ;;  %v364_v17 = vld [vmem:[%s3014_s13 + $0x80] sm:$0xff]  ;;  %v365_v18 = vld [vmem:[%s3014_s13 + $0x88] sm:$0xff] }
  0x24   : > { %406 = vst.msk [vmem:[#allocation2 + $0xc0] sm:$0xff] %vm380_vm0, %v2929_v2  ;;  %407 = vst.msk [vmem:[#allocation2 + $0xc8] sm:$0xff] %vm380_vm0, %v2929_v2  ;;  %v366_v19 = vld [vmem:[%s3014_s13 + $0x90] sm:$0xff]  ;;  %v367_v20 = vld [vmem:[%s3014_s13 + $0x98] sm:$0xff] }
  0x25   : > { %409 = vst.msk [vmem:[#allocation2 + $0xd8] sm:$0xff] %vm380_vm0, %v2929_v2  ;;  %410 = vst.msk [vmem:[#allocation2 + $0xe0] sm:$0xff] %vm380_vm0, %v2929_v2  ;;  %v368_v21 = vld [vmem:[%s3014_s13 + $0xa0] sm:$0xff]  ;;  %v369_v22 = vld [vmem:[%s3014_s13 + $0xa8] sm:$0xff] }
  0x26   : > { %412 = vst.msk [vmem:[#allocation2 + $0xf0] sm:$0xff] %vm380_vm0, %v2929_v2  ;;  %413 = vst.msk [vmem:[#allocation2 + $0xf8] sm:$0xff] %vm380_vm0, %v2929_v2  ;;  %v370_v23 = vld [vmem:[%s3014_s13 + $0xb0] sm:$0xff]  ;;  %v371_v24 = vld [vmem:[%s3014_s13 + $0xb8] sm:$0xff] }
  0x27   : > { %415 = vst.msk [vmem:[#allocation2 + $0x108] sm:$0xff] %vm380_vm0, %v2929_v2  ;;  %416 = vst.msk [vmem:[#allocation2 + $0x110] sm:$0xff] %vm380_vm0, %v2929_v2  ;;  %v372_v25 = vld [vmem:[%s3014_s13 + $0xc0] sm:$0xff]  ;;  %v373_v26 = vld [vmem:[%s3014_s13 + $0xc8] sm:$0xff] }
  0x28   : > { %418 = vst.msk [vmem:[#allocation2 + $0x120] sm:$0xff] %vm380_vm0, %v2929_v2  ;;  %419 = vst.msk [vmem:[#allocation2 + $0x128] sm:$0xff] %vm380_vm0, %v2929_v2  ;;  %v374_v27 = vld [vmem:[%s3014_s13 + $0xd0] sm:$0xff]  ;;  %v375_v28 = vld [vmem:[%s3014_s13 + $0xd8] sm:$0xff] }
  0x29   : > { %421 = vst.msk [vmem:[#allocation2 + $0x138] sm:$0xff] %vm380_vm0, %v2929_v2  ;;  %422 = vst.msk [vmem:[#allocation2 + $0x140] sm:$0xff] %vm380_vm0, %v2929_v2  ;;  %v376_v29 = vld [vmem:[%s3014_s13 + $0xe0] sm:$0xff]  ;;  %v377_v30 = vld [vmem:[%s3014_s13 + $0xe8] sm:$0xff] }
  0x2a   : > { %424 = vst.msk [vmem:[#allocation2 + $0x150] sm:$0xff] %vm380_vm0, %v2929_v2  ;;  %425 = vst.msk [vmem:[#allocation2 + $0x158] sm:$0xff] %vm380_vm0, %v2929_v2  ;;  %v378_v31 = vld [vmem:[%s3014_s13 + $0xf0] sm:$0xff]  ;;  %v379_v32 = vld [vmem:[%s3014_s13 + $0xf8] sm:$0xff] }
  0x2b   : > { %427 = vst.msk [vmem:[#allocation2 + $0x168] sm:$0xff] %vm380_vm0, %v2929_v2  ;;  %428 = vst.msk [vmem:[#allocation2 + $0x170] sm:$0xff] %vm380_vm0, %v2929_v2  ;;  %v469_v33 = vld [vmem:[%s3019_s16] sm:$0xff]  ;;  %v470_v34 = vld [vmem:[%s3019_s16 + $0x8] sm:$0xff] }
  0x2c   : > { %430 = vst.msk [vmem:[#allocation2 + $0x180] sm:$0xff] %vm380_vm0, %v2929_v2  ;;  %431 = vst.msk [vmem:[#allocation2 + $0x188] sm:$0xff] %vm380_vm0, %v2929_v2  ;;  %v471_v35 = vld [vmem:[%s3019_s16 + $0x10] sm:$0xff]  ;;  %v472_v36 = vld [vmem:[%s3019_s16 + $0x18] sm:$0xff] }
  0x2d   : > { %433 = vst.msk [vmem:[#allocation2 + $0x198] sm:$0xff] %vm380_vm0, %v2929_v2  ;;  %434 = vst.msk [vmem:[#allocation2 + $0x1a0] sm:$0xff] %vm380_vm0, %v2929_v2  ;;  %v473_v37 = vld [vmem:[%s3019_s16 + $0x20] sm:$0xff]  ;;  %v474_v38 = vld [vmem:[%s3019_s16 + $0x28] sm:$0xff] }
  0x2e   : > { %501 = vst.msk [vmem:[#allocation3] sm:$0xff] %vm380_vm0, %v2929_v2  ;;  %502 = vst.msk [vmem:[#allocation3 + $0x8] sm:$0xff] %vm380_vm0, %v2929_v2  ;;  %v475_v39 = vld [vmem:[%s3019_s16 + $0x30] sm:$0xff]  ;;  %v476_v40 = vld [vmem:[%s3019_s16 + $0x38] sm:$0xff] }
  0x2f   : > { %504 = vst.msk [vmem:[#allocation3 + $0x18] sm:$0xff] %vm380_vm0, %v2929_v2  ;;  %505 = vst.msk [vmem:[#allocation3 + $0x20] sm:$0xff] %vm380_vm0, %v2929_v2  ;;  %v477_v41 = vld [vmem:[%s3019_s16 + $0x40] sm:$0xff]  ;;  %v478_v42 = vld [vmem:[%s3019_s16 + $0x48] sm:$0xff] }
  0x30   : > { %507 = vst.msk [vmem:[#allocation3 + $0x30] sm:$0xff] %vm380_vm0, %v2929_v2  ;;  %508 = vst.msk [vmem:[#allocation3 + $0x38] sm:$0xff] %vm380_vm0, %v2929_v2  ;;  %v479_v43 = vld [vmem:[%s3019_s16 + $0x50] sm:$0xff]  ;;  %v480_v44 = vld [vmem:[%s3019_s16 + $0x58] sm:$0xff] }
  0x31   : > { %510 = vst.msk [vmem:[#allocation3 + $0x48] sm:$0xff] %vm380_vm0, %v2929_v2  ;;  %511 = vst.msk [vmem:[#allocation3 + $0x50] sm:$0xff] %vm380_vm0, %v2929_v2  ;;  %v481_v45 = vld [vmem:[%s3019_s16 + $0x60] sm:$0xff]  ;;  %v482_v46 = vld [vmem:[%s3019_s16 + $0x68] sm:$0xff] }
  0x32   : > { %513 = vst.msk [vmem:[#allocation3 + $0x60] sm:$0xff] %vm380_vm0, %v2929_v2  ;;  %514 = vst.msk [vmem:[#allocation3 + $0x68] sm:$0xff] %vm380_vm0, %v2929_v2  ;;  %v483_v47 = vld [vmem:[%s3019_s16 + $0x70] sm:$0xff]  ;;  %v484_v48 = vld [vmem:[%s3019_s16 + $0x78] sm:$0xff] }
  0x33   : > { %516 = vst.msk [vmem:[#allocation3 + $0x78] sm:$0xff] %vm380_vm0, %v2929_v2  ;;  %517 = vst.msk [vmem:[#allocation3 + $0x80] sm:$0xff] %vm380_vm0, %v2929_v2  ;;  %v485_v49 = vld [vmem:[%s3019_s16 + $0x80] sm:$0xff]  ;;  %v486_v50 = vld [vmem:[%s3019_s16 + $0x88] sm:$0xff] }
  0x34   : > { %519 = vst.msk [vmem:[#allocation3 + $0x90] sm:$0xff] %vm380_vm0, %v2929_v2  ;;  %520 = vst.msk [vmem:[#allocation3 + $0x98] sm:$0xff] %vm380_vm0, %v2929_v2  ;;  %v487_v51 = vld [vmem:[%s3019_s16 + $0x90] sm:$0xff]  ;;  %v488_v52 = vld [vmem:[%s3019_s16 + $0x98] sm:$0xff] }
  0x35   : > { %522 = vst.msk [vmem:[#allocation3 + $0xa8] sm:$0xff] %vm380_vm0, %v2929_v2  ;;  %523 = vst.msk [vmem:[#allocation3 + $0xb0] sm:$0xff] %vm380_vm0, %v2929_v2  ;;  %v489_v53 = vld [vmem:[%s3019_s16 + $0xa0] sm:$0xff]  ;;  %v490_v54 = vld [vmem:[%s3019_s16 + $0xa8] sm:$0xff] }
  0x36   : > { %525 = vst.msk [vmem:[#allocation3 + $0xc0] sm:$0xff] %vm380_vm0, %v2929_v2  ;;  %526 = vst.msk [vmem:[#allocation3 + $0xc8] sm:$0xff] %vm380_vm0, %v2929_v2  ;;  %v491_v55 = vld [vmem:[%s3019_s16 + $0xb0] sm:$0xff]  ;;  %v492_v56 = vld [vmem:[%s3019_s16 + $0xb8] sm:$0xff] }
  0x37   : > { %528 = vst.msk [vmem:[#allocation3 + $0xd8] sm:$0xff] %vm380_vm0, %v2929_v2  ;;  %529 = vst.msk [vmem:[#allocation3 + $0xe0] sm:$0xff] %vm380_vm0, %v2929_v2  ;;  %v493_v57 = vld [vmem:[%s3019_s16 + $0xc0] sm:$0xff]  ;;  %v494_v58 = vld [vmem:[%s3019_s16 + $0xc8] sm:$0xff] }
  0x38   : > { %531 = vst.msk [vmem:[#allocation3 + $0xf0] sm:$0xff] %vm380_vm0, %v2929_v2  ;;  %532 = vst.msk [vmem:[#allocation3 + $0xf8] sm:$0xff] %vm380_vm0, %v2929_v2  ;;  %v495_v59 = vld [vmem:[%s3019_s16 + $0xd0] sm:$0xff]  ;;  %v496_v60 = vld [vmem:[%s3019_s16 + $0xd8] sm:$0xff] }
  0x39   : > { %534 = vst.msk [vmem:[#allocation3 + $0x108] sm:$0xff] %vm380_vm0, %v2929_v2  ;;  %535 = vst.msk [vmem:[#allocation3 + $0x110] sm:$0xff] %vm380_vm0, %v2929_v2  ;;  %v497_v61 = vld [vmem:[%s3019_s16 + $0xe0] sm:$0xff]  ;;  %v498_v62 = vld [vmem:[%s3019_s16 + $0xe8] sm:$0xff] }
  0x3a   : > { %537 = vst.msk [vmem:[#allocation3 + $0x120] sm:$0xff] %vm380_vm0, %v2929_v2  ;;  %538 = vst.msk [vmem:[#allocation3 + $0x128] sm:$0xff] %vm380_vm0, %v2929_v2  ;;  %v499_v63 = vld [vmem:[%s3019_s16 + $0xf0] sm:$0xff] }
  0x3b   : > { %540 = vst.msk [vmem:[#allocation3 + $0x138] sm:$0xff] %vm380_vm0, %v2929_v2  ;;  %541 = vst.msk [vmem:[#allocation3 + $0x140] sm:$0xff] %vm380_vm0, %v2929_v2 }
  0x3c   : > { %543 = vst.msk [vmem:[#allocation3 + $0x150] sm:$0xff] %vm380_vm0, %v2929_v2  ;;  %544 = vst.msk [vmem:[#allocation3 + $0x158] sm:$0xff] %vm380_vm0, %v2929_v2 }
  0x3d   : > { %546 = vst.msk [vmem:[#allocation3 + $0x168] sm:$0xff] %vm380_vm0, %v2929_v2  ;;  %547 = vst.msk [vmem:[#allocation3 + $0x170] sm:$0xff] %vm380_vm0, %v2929_v2 }
  0x3e   : > { %549 = vst.msk [vmem:[#allocation3 + $0x180] sm:$0xff] %vm380_vm0, %v2929_v2  ;;  %550 = vst.msk [vmem:[#allocation3 + $0x188] sm:$0xff] %vm380_vm0, %v2929_v2 }
  0x3f   : > { %552 = vst.msk [vmem:[#allocation3 + $0x198] sm:$0xff] %vm380_vm0, %v2929_v2  ;;  %553 = vst.msk [vmem:[#allocation3 + $0x1a0] sm:$0xff] %vm380_vm0, %v2929_v2 }
  0x40   : > { %387 = vst.msk [vmem:[#allocation2 + $0x28] sm:$0x3] %vm383_vm1, %v2929_v2  ;;  %384 = vst.msk [vmem:[#allocation2 + $0x10] sm:$0x3] %vm383_vm1, %v2929_v2 }
  0x41   : > { %390 = vst.msk [vmem:[#allocation2 + $0x40] sm:$0x3] %vm383_vm1, %v2929_v2  ;;  %393 = vst.msk [vmem:[#allocation2 + $0x58] sm:$0x3] %vm383_vm1, %v2929_v2 }
  0x42   : > { %396 = vst.msk [vmem:[#allocation2 + $0x70] sm:$0x3] %vm383_vm1, %v2929_v2  ;;  %399 = vst.msk [vmem:[#allocation2 + $0x88] sm:$0x3] %vm383_vm1, %v2929_v2 }
  0x43   : > { %402 = vst.msk [vmem:[#allocation2 + $0xa0] sm:$0x3] %vm383_vm1, %v2929_v2  ;;  %405 = vst.msk [vmem:[#allocation2 + $0xb8] sm:$0x3] %vm383_vm1, %v2929_v2 }
  0x44   : > { %408 = vst.msk [vmem:[#allocation2 + $0xd0] sm:$0x3] %vm383_vm1, %v2929_v2  ;;  %411 = vst.msk [vmem:[#allocation2 + $0xe8] sm:$0x3] %vm383_vm1, %v2929_v2 }
  0x45   : > { %414 = vst.msk [vmem:[#allocation2 + $0x100] sm:$0x3] %vm383_vm1, %v2929_v2  ;;  %417 = vst.msk [vmem:[#allocation2 + $0x118] sm:$0x3] %vm383_vm1, %v2929_v2 }
  0x46   : > { %420 = vst.msk [vmem:[#allocation2 + $0x130] sm:$0x3] %vm383_vm1, %v2929_v2  ;;  %423 = vst.msk [vmem:[#allocation2 + $0x148] sm:$0x3] %vm383_vm1, %v2929_v2 }
  0x47   : > { %426 = vst.msk [vmem:[#allocation2 + $0x160] sm:$0x3] %vm383_vm1, %v2929_v2  ;;  %429 = vst.msk [vmem:[#allocation2 + $0x178] sm:$0x3] %vm383_vm1, %v2929_v2 }
  0x48   : > { %432 = vst.msk [vmem:[#allocation2 + $0x190] sm:$0x3] %vm383_vm1, %v2929_v2  ;;  %435 = vst.msk [vmem:[#allocation2 + $0x1a8] sm:$0x3] %vm383_vm1, %v2929_v2 }
  0x49   : > { %503 = vst.msk [vmem:[#allocation3 + $0x10] sm:$0x3] %vm383_vm1, %v2929_v2  ;;  %506 = vst.msk [vmem:[#allocation3 + $0x28] sm:$0x3] %vm383_vm1, %v2929_v2 }
  0x4a   : > { %509 = vst.msk [vmem:[#allocation3 + $0x40] sm:$0x3] %vm383_vm1, %v2929_v2  ;;  %512 = vst.msk [vmem:[#allocation3 + $0x58] sm:$0x3] %vm383_vm1, %v2929_v2 }
  0x4b   : > { %515 = vst.msk [vmem:[#allocation3 + $0x70] sm:$0x3] %vm383_vm1, %v2929_v2  ;;  %518 = vst.msk [vmem:[#allocation3 + $0x88] sm:$0x3] %vm383_vm1, %v2929_v2 }
  0x4c   : > { %521 = vst.msk [vmem:[#allocation3 + $0xa0] sm:$0x3] %vm383_vm1, %v2929_v2  ;;  %524 = vst.msk [vmem:[#allocation3 + $0xb8] sm:$0x3] %vm383_vm1, %v2929_v2 }
  0x4d   : > { %527 = vst.msk [vmem:[#allocation3 + $0xd0] sm:$0x3] %vm383_vm1, %v2929_v2  ;;  %530 = vst.msk [vmem:[#allocation3 + $0xe8] sm:$0x3] %vm383_vm1, %v2929_v2 }
  0x4e   : > { %533 = vst.msk [vmem:[#allocation3 + $0x100] sm:$0x3] %vm383_vm1, %v2929_v2  ;;  %536 = vst.msk [vmem:[#allocation3 + $0x118] sm:$0x3] %vm383_vm1, %v2929_v2 }
  0x4f   : > { %539 = vst.msk [vmem:[#allocation3 + $0x130] sm:$0x3] %vm383_vm1, %v2929_v2  ;;  %542 = vst.msk [vmem:[#allocation3 + $0x148] sm:$0x3] %vm383_vm1, %v2929_v2 }
  0x50   : > { %545 = vst.msk [vmem:[#allocation3 + $0x160] sm:$0x3] %vm383_vm1, %v2929_v2  ;;  %548 = vst.msk [vmem:[#allocation3 + $0x178] sm:$0x3] %vm383_vm1, %v2929_v2 }
  0x51   : > { %551 = vst.msk [vmem:[#allocation3 + $0x190] sm:$0x3] %vm383_vm1, %v2929_v2  ;;  %554 = vst.msk [vmem:[#allocation3 + $0x1a8] sm:$0x3] %vm383_vm1, %v2929_v2 }
  0x52   : > { %346 = vst.msk [vmem:[%s3024_s20] sm:$0x1] %vm345_vm2, %v2929_v2  ;;  %347 = vst.msk [vmem:[%s3029_s30] sm:$0x1] %vm345_vm2, %v2929_v2 }
  0x53   : > { %437 = vst.msk [vmem:[#allocation2 + $0x19] sm:$0xff] %vm380_vm0, %v3038_v0  ;;  %438 = vst.msk [vmem:[#allocation2 + $0x21] sm:$0xff] %vm380_vm0, %v3041_v1  ;;  %v500_v0 = vld [vmem:[%s3019_s16 + $0xf8] sm:$0xff] }
  0x54   : > { %439 = vst.msk [vmem:[#allocation2 + $0x31] sm:$0xff] %vm380_vm0, %v350_v3  ;;  %440 = vst.msk [vmem:[#allocation2 + $0x39] sm:$0xff] %vm380_vm0, %v351_v4 }
  0x55   : > { %441 = vst.msk [vmem:[#allocation2 + $0x49] sm:$0xff] %vm380_vm0, %v352_v5  ;;  %442 = vst.msk [vmem:[#allocation2 + $0x51] sm:$0xff] %vm380_vm0, %v353_v6 }
  0x56   : > { %443 = vst.msk [vmem:[#allocation2 + $0x61] sm:$0xff] %vm380_vm0, %v354_v7  ;;  %444 = vst.msk [vmem:[#allocation2 + $0x69] sm:$0xff] %vm380_vm0, %v355_v8 }
  0x57   : > { %445 = vst.msk [vmem:[#allocation2 + $0x79] sm:$0xff] %vm380_vm0, %v356_v9  ;;  %446 = vst.msk [vmem:[#allocation2 + $0x81] sm:$0xff] %vm380_vm0, %v357_v10 }
  0x58   : > { %447 = vst.msk [vmem:[#allocation2 + $0x91] sm:$0xff] %vm380_vm0, %v358_v11  ;;  %448 = vst.msk [vmem:[#allocation2 + $0x99] sm:$0xff] %vm380_vm0, %v359_v12 }
  0x59   : > { %449 = vst.msk [vmem:[#allocation2 + $0xa9] sm:$0xff] %vm380_vm0, %v360_v13  ;;  %450 = vst.msk [vmem:[#allocation2 + $0xb1] sm:$0xff] %vm380_vm0, %v361_v14 }
  0x5a   : > { %451 = vst.msk [vmem:[#allocation2 + $0xc1] sm:$0xff] %vm380_vm0, %v362_v15  ;;  %452 = vst.msk [vmem:[#allocation2 + $0xc9] sm:$0xff] %vm380_vm0, %v363_v16 }
  0x5b   : > { %453 = vst.msk [vmem:[#allocation2 + $0xd9] sm:$0xff] %vm380_vm0, %v364_v17  ;;  %454 = vst.msk [vmem:[#allocation2 + $0xe1] sm:$0xff] %vm380_vm0, %v365_v18 }
  0x5c   : > { %455 = vst.msk [vmem:[#allocation2 + $0xf1] sm:$0xff] %vm380_vm0, %v366_v19  ;;  %456 = vst.msk [vmem:[#allocation2 + $0xf9] sm:$0xff] %vm380_vm0, %v367_v20 }
  0x5d   : > { %457 = vst.msk [vmem:[#allocation2 + $0x109] sm:$0xff] %vm380_vm0, %v368_v21  ;;  %458 = vst.msk [vmem:[#allocation2 + $0x111] sm:$0xff] %vm380_vm0, %v369_v22 }
  0x5e   : > { %459 = vst.msk [vmem:[#allocation2 + $0x121] sm:$0xff] %vm380_vm0, %v370_v23  ;;  %460 = vst.msk [vmem:[#allocation2 + $0x129] sm:$0xff] %vm380_vm0, %v371_v24 }
  0x5f   : > { %461 = vst.msk [vmem:[#allocation2 + $0x139] sm:$0xff] %vm380_vm0, %v372_v25  ;;  %462 = vst.msk [vmem:[#allocation2 + $0x141] sm:$0xff] %vm380_vm0, %v373_v26 }
  0x60   : > { %463 = vst.msk [vmem:[#allocation2 + $0x151] sm:$0xff] %vm380_vm0, %v374_v27  ;;  %464 = vst.msk [vmem:[#allocation2 + $0x159] sm:$0xff] %vm380_vm0, %v375_v28 }
  0x61   : > { %465 = vst.msk [vmem:[#allocation2 + $0x169] sm:$0xff] %vm380_vm0, %v376_v29  ;;  %466 = vst.msk [vmem:[#allocation2 + $0x171] sm:$0xff] %vm380_vm0, %v377_v30 }
  0x62   : > { %467 = vst.msk [vmem:[#allocation2 + $0x181] sm:$0xff] %vm380_vm0, %v378_v31  ;;  %468 = vst.msk [vmem:[#allocation2 + $0x189] sm:$0xff] %vm380_vm0, %v379_v32 }
  0x63   : > { %556 = vst.msk [vmem:[#allocation3 + $0x19] sm:$0xff] %vm380_vm0, %v469_v33  ;;  %557 = vst.msk [vmem:[#allocation3 + $0x21] sm:$0xff] %vm380_vm0, %v470_v34 }
  0x64   : > { %558 = vst.msk [vmem:[#allocation3 + $0x31] sm:$0xff] %vm380_vm0, %v471_v35  ;;  %559 = vst.msk [vmem:[#allocation3 + $0x39] sm:$0xff] %vm380_vm0, %v472_v36 }
  0x65   : > { %560 = vst.msk [vmem:[#allocation3 + $0x49] sm:$0xff] %vm380_vm0, %v473_v37  ;;  %561 = vst.msk [vmem:[#allocation3 + $0x51] sm:$0xff] %vm380_vm0, %v474_v38 }
  0x66   : > { %562 = vst.msk [vmem:[#allocation3 + $0x61] sm:$0xff] %vm380_vm0, %v475_v39  ;;  %563 = vst.msk [vmem:[#allocation3 + $0x69] sm:$0xff] %vm380_vm0, %v476_v40 }
  0x67   : > { %564 = vst.msk [vmem:[#allocation3 + $0x79] sm:$0xff] %vm380_vm0, %v477_v41  ;;  %565 = vst.msk [vmem:[#allocation3 + $0x81] sm:$0xff] %vm380_vm0, %v478_v42 }
  0x68   : > { %566 = vst.msk [vmem:[#allocation3 + $0x91] sm:$0xff] %vm380_vm0, %v479_v43  ;;  %567 = vst.msk [vmem:[#allocation3 + $0x99] sm:$0xff] %vm380_vm0, %v480_v44 }
  0x69   : > { %568 = vst.msk [vmem:[#allocation3 + $0xa9] sm:$0xff] %vm380_vm0, %v481_v45  ;;  %569 = vst.msk [vmem:[#allocation3 + $0xb1] sm:$0xff] %vm380_vm0, %v482_v46 }
  0x6a   : > { %570 = vst.msk [vmem:[#allocation3 + $0xc1] sm:$0xff] %vm380_vm0, %v483_v47  ;;  %571 = vst.msk [vmem:[#allocation3 + $0xc9] sm:$0xff] %vm380_vm0, %v484_v48 }
  0x6b   : > { %572 = vst.msk [vmem:[#allocation3 + $0xd9] sm:$0xff] %vm380_vm0, %v485_v49  ;;  %573 = vst.msk [vmem:[#allocation3 + $0xe1] sm:$0xff] %vm380_vm0, %v486_v50 }
  0x6c   : > { %574 = vst.msk [vmem:[#allocation3 + $0xf1] sm:$0xff] %vm380_vm0, %v487_v51  ;;  %575 = vst.msk [vmem:[#allocation3 + $0xf9] sm:$0xff] %vm380_vm0, %v488_v52 }
  0x6d   : > { %576 = vst.msk [vmem:[#allocation3 + $0x109] sm:$0xff] %vm380_vm0, %v489_v53  ;;  %577 = vst.msk [vmem:[#allocation3 + $0x111] sm:$0xff] %vm380_vm0, %v490_v54 }
  0x6e   : > { %578 = vst.msk [vmem:[#allocation3 + $0x121] sm:$0xff] %vm380_vm0, %v491_v55  ;;  %579 = vst.msk [vmem:[#allocation3 + $0x129] sm:$0xff] %vm380_vm0, %v492_v56 }
  0x6f   : > { %580 = vst.msk [vmem:[#allocation3 + $0x139] sm:$0xff] %vm380_vm0, %v493_v57  ;;  %581 = vst.msk [vmem:[#allocation3 + $0x141] sm:$0xff] %vm380_vm0, %v494_v58 }
  0x70   : > { %582 = vst.msk [vmem:[#allocation3 + $0x151] sm:$0xff] %vm380_vm0, %v495_v59  ;;  %583 = vst.msk [vmem:[#allocation3 + $0x159] sm:$0xff] %vm380_vm0, %v496_v60 }
  0x71   : > { %584 = vst.msk [vmem:[#allocation3 + $0x169] sm:$0xff] %vm380_vm0, %v497_v61  ;;  %585 = vst.msk [vmem:[#allocation3 + $0x171] sm:$0xff] %vm380_vm0, %v498_v62 }
  0x72   : > { %586 = vst.msk [vmem:[#allocation3 + $0x181] sm:$0xff] %vm380_vm0, %v499_v63  ;;  %587 = vst.msk [vmem:[#allocation3 + $0x189] sm:$0xff] %vm380_vm0, %v500_v0 }
  0x73 PF: > { %s2674_s0 = smul.u32 192, %s2911_s24  ;;  %vm652_vm3 = vcmask 1046528   ;;  %s2930_s8 = smov 4   ;;  %vm741_vm4 = vcmask 1045504   ;;  %vm1334_vm5 = vcmask 1043456   ;;  %vm1144_vm6 = vcmask 31744  }
  0x74   : > { %s2931_s9 = smov 8   ;;  %s2932_s10 = smov 12   ;;  %vm1161_vm7 = vcmask 64512   ;;  %vm1178_vm8 = vcmask 97280   ;;  %vm1195_vm9 = vcmask 130048   ;;  %vm1212_vm10 = vcmask 162816  }
  0x75   : > { %s3396_s25 = scalar_lea.vmem [#allocation2], %s2674_s0  ;;  %s2933_s13 = smov 16   ;;  %vm1229_vm11 = vcmask 195584   ;;  %vm1246_vm12 = vcmask 228352   ;;  %vm1263_vm13 = vcmask 261120   ;;  %vm1285_vm14 = vcmask 293888  }
  0x76   : > { %v3399_v1 = vld [vmem:[%s3396_s25 + $0x18] sm:$0xff]  ;;  %v3402_v2 = vld [vmem:[%s3396_s25 + $0x20] sm:$0xff]  ;;  %v3410_v6 = vld [vmem:[%s3396_s25 + $0x8] sm:$0xff]  ;;  %s2934_s14 = smov 20   ;;  %s2935_s15 = smov 24   ;;  %vm2444_vm15 = vcmask 24576  }
  0x77   : > { %v3405_v3 = vld [vmem:[%s3396_s25] sm:$0xff]  ;;  %v658_v4 = vrot.slane %v3399_v1, 1  ;;  %v659_v5 = vrot.slane %v3402_v2, 1  ;;  %v3414_v8 = vld [vmem:[%s3396_s25 + $0x28] sm:$0x3]  ;;  %v654_v9 = vrot.slane %v3410_v6, 1 }
  0x78   : > { %v653_v7 = vrot.slane %v3405_v3, 1  ;;  %v661_v10 = vrot.slane %v3414_v8, 1  ;;  %v3419_v11 = vld [vmem:[%s3396_s25 + $0x10] sm:$0x3]  ;;  %v3422_v12 = vld [vmem:[%s3396_s25 + $0x38] sm:$0xff]  ;;  %v3452_v25 = vld [vmem:[%s3396_s25 + $0x48] sm:$0xff] }
  0x79   : > { %v3425_v13 = vsel %vm652_vm3, %v658_v4, %v659_v5  ;;  %v656_v14 = vrot.slane %v3419_v11, 1  ;;  %v3429_v15 = vld [vmem:[%s3396_s25 + $0x40] sm:$0x3]  ;;  %v3432_v16 = vld [vmem:[%s3396_s25 + $0x30] sm:$0xff]  ;;  %v664_v19 = vrot.slane %v3422_v12, 1  ;;  %v668_v30 = vrot.slane %v3452_v25, 1 }
  0x7a   : > { %697 = vrot.lane.b32.xlu1 %v3425_v13, %s2930_s8  ;;  %v655_v17 = vsel %vm652_vm3, %v653_v7, %v654_v9  ;;  %v3439_v18 = vsel %vm652_vm3, %v659_v5, %v661_v10  ;;  %v666_v20 = vrot.slane %v3429_v15, 1  ;;  %v663_v22 = vrot.slane %v3432_v16, 1  ;;  %v3446_v23 = vld [vmem:[%s3396_s25 + $0x50] sm:$0xff]  ;;  %v3449_v24 = vld [vmem:[%s3396_s25 + $0x58] sm:$0x3]  ;;  %v3467_v31 = vld [vmem:[%s3396_s25 + $0x68] sm:$0xff] }
  0x7b   : > { %693 = vrot.lane.b32.xlu0 %v655_v17, %s2930_s8  ;;  %v657_v21 = vsel %vm652_vm3, %v654_v9, %v656_v14  ;;  %v669_v27 = vrot.slane %v3446_v23, 1  ;;  %v671_v28 = vrot.slane %v3449_v24, 1  ;;  %v3470_v32 = vld [vmem:[%s3396_s25 + $0x70] sm:$0x3]  ;;  %v3473_v33 = vld [vmem:[%s3396_s25 + $0x60] sm:$0xff]  ;;  %v674_v35 = vrot.slane %v3467_v31, 1 }
  0x7c   : > { %v3458_v26 = vsel %vm652_vm3, %v664_v19, %v666_v20  ;;  %v3463_v29 = vsel %vm652_vm3, %v663_v22, %v664_v19  ;;  %v676_v36 = vrot.slane %v3470_v32, 1  ;;  %v673_v38 = vrot.slane %v3473_v33, 1  ;;  %v3489_v39 = vld [vmem:[%s3396_s25 + $0x80] sm:$0xff]  ;;  %v3492_v40 = vld [vmem:[%s3396_s25 + $0x88] sm:$0x3]  ;;  %v3495_v41 = vld [vmem:[%s3396_s25 + $0x78] sm:$0xff] }
  0x7d   : > { %v3480_v34 = vsel %vm652_vm3, %v669_v27, %v671_v28  ;;  %v3485_v37 = vsel %vm652_vm3, %v668_v30, %v669_v27  ;;  %v679_v43 = vrot.slane %v3489_v39, 1  ;;  %v681_v44 = vrot.slane %v3492_v40, 1  ;;  %v3511_v47 = vld [vmem:[%s3396_s25 + $0x98] sm:$0xff]  ;;  %v3514_v48 = vld [vmem:[%s3396_s25 + $0xa0] sm:$0x3]  ;;  %v3517_v49 = vld [vmem:[%s3396_s25 + $0x90] sm:$0xff] }
  0x7e   : > { %699 = vrot.lane.b32.xlu1 %v3439_v18, %s2930_s8  ;;  %v3502_v42 = vsel %vm652_vm3, %v674_v35, %v676_v36  ;;  %v3507_v45 = vsel %vm652_vm3, %v673_v38, %v674_v35  ;;  %v678_v46 = vrot.slane %v3495_v41, 1  ;;  %v684_v51 = vrot.slane %v3511_v47, 1  ;;  %v3533_v55 = vld [vmem:[%s3396_s25 + $0xb0] sm:$0xff]  ;;  %v3536_v56 = vld [vmem:[%s3396_s25 + $0xb8] sm:$0x3]  ;;  %v3539_v57 = vld [vmem:[%s3396_s25 + $0xa8] sm:$0xff] }
  0x7f   : > { %695 = vrot.lane.b32.xlu0 %v657_v21, %s2930_s8  ;;  %v3524_v50 = vsel %vm652_vm3, %v679_v43, %v681_v44  ;;  %v686_v52 = vrot.slane %v3514_v48, 1  ;;  %v683_v54 = vrot.slane %v3517_v49, 1  ;;  %v689_v59 = vrot.slane %v3533_v55, 1  ;;  %s3897_s16 = scalar_lea.vmem [#allocation3], %s2674_s0  ;;  %s2936_s17 = smov 28  }
  0x80   : > { %v3529_v53 = vsel %vm652_vm3, %v678_v46, %v679_v43  ;;  %v691_v60 = vrot.slane %v3536_v56, 1  ;;  %v688_v62 = vrot.slane %v3539_v57, 1  ;;  %v743_v0 = vrot.slane %v3410_v6, 2  ;;  %s2937_s18 = smov 32  }
  0x81   : > { %v3546_v58 = vsel %vm652_vm3, %v684_v51, %v686_v52  ;;  %v3551_v61 = vsel %vm652_vm3, %v683_v54, %v684_v51  ;;  %v745_v4 = vrot.slane %v3419_v11, 2  ;;  %v742_v7 = vrot.slane %v3405_v3, 2 }
  0x82   : > { %703 = vrot.lane.b32.xlu1 %v3458_v26, %s2930_s8  ;;  %v3559_v63 = vsel %vm652_vm3, %v689_v59, %v691_v60  ;;  %v3564_v5 = vsel %vm652_vm3, %v688_v62, %v689_v59  ;;  %v748_v10 = vrot.slane %v3402_v2, 2  ;;  %v750_v6 = vrot.slane %v3414_v8, 2 }
  0x83   : > { %701 = vrot.lane.b32.xlu0 %v3463_v29, %s2930_s8  ;;  %5173 = vst [vmem:[#allocation6_spill] sm:$0xff] %v3559_v63  ;;  %v746_v9 = vsel %vm741_vm4, %v743_v0, %v745_v4  ;;  %v744_v11 = vsel %vm741_vm4, %v742_v7, %v743_v0  ;;  %v747_v14 = vrot.slane %v3399_v1, 2  ;;  %v753_v19 = vrot.slane %v3422_v12, 2 }
  0x84   : > { %v3579_v17 = vsel %vm741_vm4, %v748_v10, %v750_v6  ;;  %v755_v20 = vrot.slane %v3429_v15, 2  ;;  %v752_v8 = vrot.slane %v3432_v16, 2  ;;  %v758_v27 = vrot.slane %v3446_v23, 2 }
  0x85   : > { %v3584_v21 = vsel %vm741_vm4, %v747_v14, %v748_v10  ;;  %v760_v28 = vrot.slane %v3449_v24, 2  ;;  %v757_v30 = vrot.slane %v3452_v25, 2  ;;  %v763_v36 = vrot.slane %v3467_v31, 2 }
  0x86   : > { %707 = vrot.lane.b32.xlu1 %v3480_v34, %s2930_s8  ;;  %v3592_v22 = vsel %vm741_vm4, %v753_v19, %v755_v20  ;;  %v3597_v15 = vsel %vm741_vm4, %v752_v8, %v753_v19  ;;  %v765_v38 = vrot.slane %v3470_v32, 2  ;;  %v762_v43 = vrot.slane %v3473_v33, 2 }
  0x87   : > { %705 = vrot.lane.b32.xlu0 %v3485_v37, %s2930_s8  ;;  %v3605_v35 = vsel %vm741_vm4, %v758_v27, %v760_v28  ;;  %v3610_v24 = vsel %vm741_vm4, %v757_v30, %v758_v27  ;;  %v768_v46 = vrot.slane %v3489_v39, 2  ;;  %v770_v51 = vrot.slane %v3492_v40, 2 }
  0x88   : > { %v3618_v44 = vsel %vm741_vm4, %v763_v36, %v765_v38  ;;  %v3623_v32 = vsel %vm741_vm4, %v762_v43, %v763_v36  ;;  %v767_v52 = vrot.slane %v3495_v41, 2  ;;  %v773_v59 = vrot.slane %v3511_v47, 2 }
  0x89   : > { %v3631_v54 = vsel %vm741_vm4, %v768_v46, %v770_v51  ;;  %v775_v60 = vrot.slane %v3514_v48, 2  ;;  %v772_v62 = vrot.slane %v3517_v49, 2  ;;  %v778_v4 = vrot.slane %v3533_v55, 2 }
  0x8a   : > { %711 = vrot.lane.b32.xlu1 %v3502_v42, %s2930_s8  ;;  %v3636_v40 = vsel %vm741_vm4, %v767_v52, %v768_v46  ;;  %v780_v7 = vrot.slane %v3536_v56, 2 }
  0x8b   : > { %709 = vrot.lane.b32.xlu0 %v3507_v45, %s2930_s8  ;;  %v3644_v0 = vsel %vm741_vm4, %v773_v59, %v775_v60  ;;  %v3649_v48 = vsel %vm741_vm4, %v772_v62, %v773_v59 }
  0x8c   : > { %v3657_v10 = vsel %vm741_vm4, %v778_v4, %v780_v7 }
  0x8d   : > { %5174 = vst [vmem:[#allocation7_spill] sm:$0xff] %v3657_v10 }
  0x8e   : > { %715 = vrot.lane.b32.xlu1 %v3524_v50, %s2930_s8 }
  0x8f   : > { %713 = vrot.lane.b32.xlu0 %v3529_v53, %s2930_s8 }
  0x92   : > { %719 = vrot.lane.b32.xlu1 %v3546_v58, %s2930_s8 }
  0x93   : > { %717 = vrot.lane.b32.xlu0 %v3551_v61, %s2930_s8 }
  0x96   : > { %723 = vrot.lane.b32.xlu1 %v3559_v63, %s2930_s8 }
  0x97   : > { %721 = vrot.lane.b32.xlu0 %v3564_v5, %s2930_s8 }
  0x9a   : > { %784 = vrot.lane.b32.xlu1 %v746_v9, %s2931_s9  ;;  %v777_v9 = vrot.slane %v3539_v57, 2 }
  0x9b   : > { %782 = vrot.lane.b32.xlu0 %v744_v11, %s2931_s9 }
  0x9c   : > { %v3660_v6 = vsel %vm741_vm4, %v777_v9, %v778_v4 }
  0x9d   : > { %5175 = vst [vmem:[#allocation8_spill] sm:$0xff] %v3660_v6 }
  0x9e   : > { %788 = vrot.lane.b32.xlu1 %v3579_v17, %s2931_s9 }
  0x9f   : > { %786 = vrot.lane.b32.xlu0 %v3584_v21, %s2931_s9 }
  0xa2   : > { %792 = vrot.lane.b32.xlu1 %v3592_v22, %s2931_s9 }
  0xa3   : > { %790 = vrot.lane.b32.xlu0 %v3597_v15, %s2931_s9 }
  0xa6   : > { %796 = vrot.lane.b32.xlu1 %v3605_v35, %s2931_s9 }
  0xa7   : > { %794 = vrot.lane.b32.xlu0 %v3610_v24, %s2931_s9 }
  0xaa   : > { %800 = vrot.lane.b32.xlu1 %v3618_v44, %s2931_s9 }
  0xab   : > { %798 = vrot.lane.b32.xlu0 %v3623_v32, %s2931_s9 }
  0xae   : > { %804 = vrot.lane.b32.xlu1 %v3631_v54, %s2931_s9 }
  0xaf   : > { %802 = vrot.lane.b32.xlu0 %v3636_v40, %s2931_s9 }
  0xb2   : > { %808 = vrot.lane.b32.xlu1 %v3644_v0, %s2931_s9 }
  0xb3   : > { %806 = vrot.lane.b32.xlu0 %v3649_v48, %s2931_s9 }
  0xb6   : > { %812 = vrot.lane.b32.xlu1 %v3657_v10, %s2931_s9 }
  0xb7   : > { %810 = vrot.lane.b32.xlu0 %v3660_v6, %s2931_s9 }
  0xba   : > { %834 = vrot.lane.b32.xlu1 %v3402_v2, %s2932_s10  ;;  %v3698_v2 = vld [vmem:[%s3396_s25 + $0xc0] sm:$0xff] }
  0xbb   : > { %832 = vrot.lane.b32.xlu0 %v3399_v1, %s2932_s10  ;;  %v3695_v1 = vld [vmem:[%s3396_s25 + $0xc8] sm:$0xff]  ;;  %v881_v20 = vrot.slane %v3698_v2, 1 }
  0xbc   : > { %v882_v11 = vrot.slane %v3695_v1, 1  ;;  %v935_v9 = vrot.slane %v3695_v1, 2 }
  0xbe   : > { %838 = vrot.lane.b32.xlu1 %v3422_v12, %s2932_s10  ;;  %v3749_v30 = vsel %vm652_vm3, %v881_v20, %v882_v11  ;;  %v934_v20 = vrot.slane %v3698_v2, 2 }
  0xbf   : > { %836 = vrot.lane.b32.xlu0 %v3432_v16, %s2932_s10  ;;  %5178 = vst [vmem:[#allocation11_spill] sm:$0xff] %v3749_v30 }
  0xc2   : > { %842 = vrot.lane.b32.xlu1 %v3446_v23, %s2932_s10 }
  0xc3   : > { %840 = vrot.lane.b32.xlu0 %v3452_v25, %s2932_s10 }
  0xc6   : > { %846 = vrot.lane.b32.xlu1 %v3467_v31, %s2932_s10 }
  0xc7   : > { %844 = vrot.lane.b32.xlu0 %v3473_v33, %s2932_s10 }
  0xca   : > { %850 = vrot.lane.b32.xlu1 %v3489_v39, %s2932_s10 }
  0xcb   : > { %848 = vrot.lane.b32.xlu0 %v3495_v41, %s2932_s10 }
  0xce   : > { %854 = vrot.lane.b32.xlu1 %v3511_v47, %s2932_s10 }
  0xcf   : > { %852 = vrot.lane.b32.xlu0 %v3517_v49, %s2932_s10 }
  0xd2   : > { %858 = vrot.lane.b32.xlu1 %v3533_v55, %s2932_s10 }
  0xd3   : > { %856 = vrot.lane.b32.xlu0 %v3539_v57, %s2932_s10 }
  0xd6   : > { %862 = vrot.lane.b32.xlu1 %v3695_v1, %s2932_s10 }
  0xd7   : > { %860 = vrot.lane.b32.xlu0 %v3698_v2, %s2932_s10 }
  0xda   : > { %888 = vrot.lane.b32.xlu1 %v3439_v18, %s2933_s13  ;;  %v624_v18 = vld [vmem:[%s3396_s25 + $0xd0] sm:$0x3] }
  0xdb   : > { %886 = vrot.lane.b32.xlu0 %v3425_v13, %s2933_s13  ;;  %v884_v14 = vrot.slane %v624_v18, 1 }
  0xdd   : > { %v3744_v27 = vsel %vm652_vm3, %v882_v11, %v884_v14  ;;  %v937_v11 = vrot.slane %v624_v18, 2 }
  0xde   : > { %892 = vrot.lane.b32.xlu1 %v3458_v26, %s2933_s13  ;;  %5176 = vst [vmem:[#allocation9_spill] sm:$0xff] %v3744_v27 }
  0xdf   : > { %890 = vrot.lane.b32.xlu0 %v3463_v29, %s2933_s13 }
  0xe2   : > { %896 = vrot.lane.b32.xlu1 %v3480_v34, %s2933_s13 }
  0xe3   : > { %894 = vrot.lane.b32.xlu0 %v3485_v37, %s2933_s13 }
  0xe6   : > { %900 = vrot.lane.b32.xlu1 %v3502_v42, %s2933_s13 }
  0xe7   : > { %898 = vrot.lane.b32.xlu0 %v3507_v45, %s2933_s13 }
  0xea   : > { %904 = vrot.lane.b32.xlu1 %v3524_v50, %s2933_s13 }
  0xeb   : > { %902 = vrot.lane.b32.xlu0 %v3529_v53, %s2933_s13 }
  0xec   : > { %v3724_v13 = vpop.permute.xlu1 %697 }
  0xed   : > { %v3727_v56 = vpop.permute.xlu0 %693 }
  0xee   : > { %908 = vrot.lane.b32.xlu1 %v3546_v58, %s2933_s13 }
  0xef   : > { %906 = vrot.lane.b32.xlu0 %v3551_v61, %s2933_s13 }
  0xf0   : > { %v3734_v19 = vpop.permute.xlu1 %699 }
  0xf1   : > { %v3737_v8 = vpop.permute.xlu0 %695 }
  0xf2   : > { %912 = vrot.lane.b32.xlu1 %v3559_v63, %s2933_s13 }
  0xf3   : > { %910 = vrot.lane.b32.xlu0 %v3564_v5, %s2933_s13 }
  0xf4   : > { %v3746_v28 = vpop.permute.xlu1 %703 }
  0xf5   : > { %5177 = vst [vmem:[#allocation10_spill] sm:$0xff] %v3746_v28  ;;  %v3751_v36 = vpop.permute.xlu0 %701 }
  0xf6   : > { %916 = vrot.lane.b32.xlu1 %v3744_v27, %s2933_s13  ;;  %v4011_v27 = vld [vmem:[%s3897_s16 + $0x38] sm:$0xff] }
  0xf7   : > { %914 = vrot.lane.b32.xlu0 %v3749_v30, %s2933_s13  ;;  %5218 = vst [vmem:[#allocation51_spill] sm:$0xff] %v4011_v27 }
  0xf8   : > { %v3757_v38 = vpop.permute.xlu1 %707 }
  0xf9   : > { %5179 = vst [vmem:[#allocation12_spill] sm:$0xff] %v3757_v38  ;;  %v3759_v43 = vpop.permute.xlu0 %705  ;;  %v1653_v38 = vrot.slane %v4011_v27, 2 }
  0xfa   : > { %5180 = vst [vmem:[#allocation13_spill] sm:$0xff] %v3759_v43  ;;  %941 = vrot.lane.b32.xlu1 %v3579_v17, %s2934_s14  ;;  %v4100_v43 = vld [vmem:[%s3897_s16 + $0x48] sm:$0xff] }
  0xfb   : > { %939 = vrot.lane.b32.xlu0 %v3584_v21, %s2934_s14  ;;  %5232 = vst [vmem:[#allocation65_spill] sm:$0xff] %v4100_v43 }
  0xfc   : > { %v3765_v46 = vpop.permute.xlu1 %711 }
  0xfd   : > { %5181 = vst [vmem:[#allocation14_spill] sm:$0xff] %v3765_v46  ;;  %v3767_v51 = vpop.permute.xlu0 %709 }
  0xfe   : > { %5182 = vst [vmem:[#allocation15_spill] sm:$0xff] %v3767_v51  ;;  %945 = vrot.lane.b32.xlu1 %v3592_v22, %s2934_s14 }
  0xff   : > { %943 = vrot.lane.b32.xlu0 %v3597_v15, %s2934_s14 }
 0x100   : > { %v3773_v52 = vpop.permute.xlu1 %715 }
 0x101   : > { %5183 = vst [vmem:[#allocation16_spill] sm:$0xff] %v3773_v52  ;;  %v3775_v59 = vpop.permute.xlu0 %713 }
 0x102   : > { %5184 = vst [vmem:[#allocation17_spill] sm:$0xff] %v3775_v59  ;;  %949 = vrot.lane.b32.xlu1 %v3605_v35, %s2934_s14 }
 0x103   : > { %947 = vrot.lane.b32.xlu0 %v3610_v24, %s2934_s14 }
 0x104   : > { %v3781_v17 = vpop.permute.xlu1 %719 }
 0x105   : > { %5185 = vst [vmem:[#allocation18_spill] sm:$0xff] %v3781_v17  ;;  %v3783_v21 = vpop.permute.xlu0 %717 }
 0x106   : > { %5186 = vst [vmem:[#allocation19_spill] sm:$0xff] %v3783_v21  ;;  %953 = vrot.lane.b32.xlu1 %v3618_v44, %s2934_s14  ;;  %v3821_v21 = vsel %vm741_vm4, %v934_v20, %v935_v9 }
 0x107   : > { %951 = vrot.lane.b32.xlu0 %v3623_v32, %s2934_s14  ;;  %5191 = vst [vmem:[#allocation24_spill] sm:$0xff] %v3821_v21 }
 0x108   : > { %v3789_v60 = vpop.permute.xlu1 %723 }
 0x109   : > { %5187 = vst [vmem:[#allocation20_spill] sm:$0xff] %v3789_v60  ;;  %v3791_v62 = vpop.permute.xlu0 %721 }
 0x10a   : > { %5188 = vst [vmem:[#allocation21_spill] sm:$0xff] %v3791_v62  ;;  %957 = vrot.lane.b32.xlu1 %v3631_v54, %s2934_s14  ;;  %v3816_v62 = vsel %vm741_vm4, %v935_v9, %v937_v11 }
 0x10b   : > { %955 = vrot.lane.b32.xlu0 %v3636_v40, %s2934_s14  ;;  %5189 = vst [vmem:[#allocation22_spill] sm:$0xff] %v3816_v62 }
 0x10c   : > { %v3797_v4 = vpop.permute.xlu1 %784 }
 0x10d   : > { %v3799_v7 = vpop.permute.xlu0 %782 }
 0x10e   : > { %961 = vrot.lane.b32.xlu1 %v3644_v0, %s2934_s14 }
 0x10f   : > { %959 = vrot.lane.b32.xlu0 %v3649_v48, %s2934_s14 }
 0x110   : > { %v3806_v14 = vpop.permute.xlu1 %788 }
 0x111   : > { %v3809_v60 = vpop.permute.xlu0 %786 }
 0x112   : > { %965 = vrot.lane.b32.xlu1 %v3657_v10, %s2934_s14 }
 0x113   : > { %963 = vrot.lane.b32.xlu0 %v3660_v6, %s2934_s14 }
 0x114   : > { %v3818_v17 = vpop.permute.xlu1 %792 }
 0x115   : > { %5190 = vst [vmem:[#allocation23_spill] sm:$0xff] %v3818_v17  ;;  %v3823_v18 = vpop.permute.xlu0 %790 }
 0x116   : > { %969 = vrot.lane.b32.xlu1 %v3816_v62, %s2934_s14 }
 0x117   : > { %967 = vrot.lane.b32.xlu0 %v3821_v21, %s2934_s14 }
 0x118   : > { %v3829_v52 = vpop.permute.xlu1 %796 }
 0x119   : > { %5192 = vst [vmem:[#allocation25_spill] sm:$0xff] %v3829_v52  ;;  %v3831_v59 = vpop.permute.xlu0 %794 }
 0x11a   : > { %5193 = vst [vmem:[#allocation26_spill] sm:$0xff] %v3831_v59  ;;  %991 = vrot.lane.b32.xlu1 %v3422_v12, %s2935_s15 }
 0x11b   : > { %989 = vrot.lane.b32.xlu0 %v3432_v16, %s2935_s15 }
 0x11c   : > { %v3837_v9 = vpop.permute.xlu1 %800 }
 0x11d   : > { %5194 = vst [vmem:[#allocation27_spill] sm:$0xff] %v3837_v9  ;;  %v3839_v11 = vpop.permute.xlu0 %798 }
 0x11e   : > { %5195 = vst [vmem:[#allocation28_spill] sm:$0xff] %v3839_v11  ;;  %995 = vrot.lane.b32.xlu1 %v3446_v23, %s2935_s15 }
 0x11f   : > { %993 = vrot.lane.b32.xlu0 %v3452_v25, %s2935_s15 }
 0x120   : > { %v3845_v20 = vpop.permute.xlu1 %804 }
 0x121   : > { %5196 = vst [vmem:[#allocation29_spill] sm:$0xff] %v3845_v20  ;;  %v3847_v46 = vpop.permute.xlu0 %802 }
 0x122   : > { %5197 = vst [vmem:[#allocation30_spill] sm:$0xff] %v3847_v46  ;;  %999 = vrot.lane.b32.xlu1 %v3467_v31, %s2935_s15 }
 0x123   : > { %997 = vrot.lane.b32.xlu0 %v3473_v33, %s2935_s15 }
 0x124   : > { %v3853_v12 = vpop.permute.xlu1 %808 }
 0x125   : > { %5198 = vst [vmem:[#allocation31_spill] sm:$0xff] %v3853_v12  ;;  %v3855_v16 = vpop.permute.xlu0 %806  ;;  %v3906_v12 = vld [vmem:[%s3897_s16] sm:$0xff] }
 0x126   : > { %5199 = vst [vmem:[#allocation32_spill] sm:$0xff] %v3855_v16  ;;  %1003 = vrot.lane.b32.xlu1 %v3489_v39, %s2935_s15  ;;  %v1554_v20 = vrot.slane %v3906_v12, 1  ;;  %v1642_v51 = vrot.slane %v3906_v12, 2 }
 0x127   : > { %1001 = vrot.lane.b32.xlu0 %v3495_v41, %s2935_s15 }
 0x128   : > { %v3861_v23 = vpop.permute.xlu1 %812 }
 0x129   : > { %5200 = vst [vmem:[#allocation33_spill] sm:$0xff] %v3861_v23  ;;  %v3863_v25 = vpop.permute.xlu0 %810  ;;  %v625_v23 = vld [vmem:[%s3396_s25 + $0xd8] sm:$0xff] }
 0x12a   : > { %5201 = vst [vmem:[#allocation34_spill] sm:$0xff] %v3863_v25  ;;  %1007 = vrot.lane.b32.xlu1 %v3511_v47, %s2935_s15  ;;  %v626_v47 = vld [vmem:[%s3396_s25 + $0xe0] sm:$0xff] }
 0x12b   : > { %1005 = vrot.lane.b32.xlu0 %v3517_v49, %s2935_s15 }
 0x12c   : > { %v3869_v31 = vpop.permute.xlu1 %834 }
 0x12d   : > { %v3871_v33 = vpop.permute.xlu0 %832 }
 0x12e   : > { %1011 = vrot.lane.b32.xlu1 %v3533_v55, %s2935_s15 }
 0x12f   : > { %1009 = vrot.lane.b32.xlu0 %v3539_v57, %s2935_s15  ;;  %v3900_v57 = vld [vmem:[%s3897_s16 + $0x8] sm:$0xff] }
 0x130   : > { %v3877_v39 = vpop.permute.xlu1 %838 }
 0x131   : > { %v3879_v41 = vpop.permute.xlu0 %836 }
 0x132   : > { %1015 = vrot.lane.b32.xlu1 %v3695_v1, %s2935_s15  ;;  %v1502_v1 = vld [vmem:[%s3897_s16 + $0x10] sm:$0x3] }
 0x133   : > { %1013 = vrot.lane.b32.xlu0 %v3698_v2, %s2935_s15  ;;  %v1645_v9 = vrot.slane %v1502_v1, 2 }
 0x134   : > { %v3886_v49 = vpop.permute.xlu1 %842 }
 0x135   : > { %5202 = vst [vmem:[#allocation35_spill] sm:$0xff] %v3886_v49  ;;  %v3889_v25 = vpop.permute.xlu0 %840 }
 0x136   : > { %1019 = vrot.lane.b32.xlu1 %v626_v47, %s2935_s15  ;;  %v1557_v47 = vrot.slane %v1502_v1, 1  ;;  %v3937_v1 = vld [vmem:[%s3897_s16 + $0x20] sm:$0xff] }
 0x137   : > { %1017 = vrot.lane.b32.xlu0 %v625_v23, %s2935_s15  ;;  %v1555_v23 = vrot.slane %v3900_v57, 1 }
 0x138   : > { %v3893_v55 = vpop.permute.xlu1 %846 }
 0x139   : > { %5203 = vst [vmem:[#allocation36_spill] sm:$0xff] %v3893_v55  ;;  %v3903_v2 = vpop.permute.xlu0 %844 }
 0x13a   : > { %5204 = vst [vmem:[#allocation37_spill] sm:$0xff] %v3903_v2  ;;  %1045 = vrot.lane.b32.xlu1 %v3458_v26, %s2936_s17  ;;  %v1558_v26 = vsel %vm652_vm3, %v1555_v23, %v1557_v47 }
 0x13b   : > { %1043 = vrot.lane.b32.xlu0 %v3463_v29, %s2936_s17  ;;  %v1643_v29 = vrot.slane %v3900_v57, 2 }
 0x13c   : > { %v3913_v16 = vpop.permute.xlu1 %850 }
 0x13d   : > { %5205 = vst [vmem:[#allocation38_spill] sm:$0xff] %v3913_v16  ;;  %v3916_v46 = vpop.permute.xlu0 %848  ;;  %v1556_v16 = vsel %vm652_vm3, %v1554_v20, %v1555_v23  ;;  %v1644_v47 = vsel %vm741_vm4, %v1642_v51, %v1643_v29  ;;  %v1560_v23 = vrot.slane %v3937_v1, 1 }
 0x13e   : > { %5206 = vst [vmem:[#allocation39_spill] sm:$0xff] %v3916_v46  ;;  %1049 = vrot.lane.b32.xlu1 %v3480_v34, %s2936_s17  ;;  %v1646_v34 = vsel %vm741_vm4, %v1643_v29, %v1645_v9  ;;  %v1284_v9 = vld [vmem:[%s5150_s2 + $0x20] sm:$0xf]  ;;  %v1505_v29 = vld [vmem:[%s3897_s16 + $0x28] sm:$0x3] }
 0x13f   : > { %1047 = vrot.lane.b32.xlu0 %v3485_v37, %s2936_s17  ;;  %2755 = vmatprep.subr.msk.mxu0 %vm1334_vm5, %v1284_v9  ;;  %v1281_v46 = vld [vmem:[%s5150_s2 + $0x8] sm:$0xff] }
 0x140   : > { %v3924_v11 = vpop.permute.xlu1 %854  ;;  %2756 = vmatpush3.msk.msra.mxu0 %vm1334_vm5, %v1284_v9  ;;  %v1282_v9 = vld [vmem:[%s5150_s2 + $0x10] sm:$0xff] }
 0x141   : > { %5207 = vst [vmem:[#allocation40_spill] sm:$0xff] %v3924_v11  ;;  %v3928_v62 = vpop.permute.xlu0 %852  ;;  %v3940_v11 = vld [vmem:[%s3897_s16 + $0x18] sm:$0xff] }
 0x142   : > { %5208 = vst [vmem:[#allocation41_spill] sm:$0xff] %v3928_v62  ;;  %1596 = vrot.lane.b32.xlu1 %v1558_v26, %s2930_s8 }
 0x143   : > { %1594 = vrot.lane.b32.xlu0 %v1556_v16, %s2930_s8  ;;  %v1559_v16 = vrot.slane %v3940_v11, 1 }
 0x144   : > { %v3933_v37 = vpop.permute.xlu1 %858 }
 0x145   : > { %5209 = vst [vmem:[#allocation42_spill] sm:$0xff] %v3933_v37  ;;  %v3942_v20 = vpop.permute.xlu0 %856  ;;  %v1647_v37 = vrot.slane %v3940_v11, 2 }
 0x146   : > { %5210 = vst [vmem:[#allocation43_spill] sm:$0xff] %v3942_v20  ;;  %1684 = vrot.lane.b32.xlu1 %v1646_v34, %s2931_s9  ;;  %v1283_v34 = vld [vmem:[%s5150_s2 + $0x18] sm:$0xff]  ;;  %v1562_v20 = vrot.slane %v1505_v29, 1 }
 0x147   : > { %1682 = vrot.lane.b32.xlu0 %v1644_v47, %s2931_s9  ;;  %2757 = vmatprep.subr.mxu0 %v1283_v34  ;;  %v1648_v47 = vrot.slane %v3937_v1, 2 }
 0x148   : > { %v3951_v51 = vpop.permute.xlu1 %862  ;;  %2758 = vmatpush3.msra.mxu0 %v1283_v34  ;;  %v1280_v34 = vld [vmem:[%s5150_s2] sm:$0xff]  ;;  %v1563_v55 = vsel %vm652_vm3, %v1560_v23, %v1562_v20 }
 0x149   : > { %5211 = vst [vmem:[#allocation44_spill] sm:$0xff] %v3951_v51  ;;  %v3954_v26 = vpop.permute.xlu0 %860  ;;  %v1561_v51 = vsel %vm652_vm3, %v1559_v16, %v1560_v23  ;;  %2759 = vmatprep.subr.mxu0 %v1282_v9  ;;  %v1649_v16 = vsel %vm741_vm4, %v1647_v37, %v1648_v47  ;;  %v1650_v37 = vrot.slane %v1505_v29, 2 }
 0x14a   : > { %5212 = vst [vmem:[#allocation45_spill] sm:$0xff] %v3954_v26  ;;  %1734 = vrot.lane.b32.xlu1 %v3937_v1, %s2932_s10  ;;  %2760 = vmatpush3.msra.mxu0 %v1282_v9 }
 0x14b   : > { %1732 = vrot.lane.b32.xlu0 %v3940_v11, %s2932_s10  ;;  %2761 = vmatprep.subr.mxu0 %v1281_v46 }
 0x14c   : > { %v3971_v26 = vpop.permute.xlu1 %888  ;;  %2762 = vmatpush3.msra.mxu0 %v1281_v46  ;;  %v1651_v46 = vsel %vm741_vm4, %v1648_v47, %v1650_v37  ;;  %v1565_v47 = vrot.slane %v4011_v27, 1 }
 0x14d   : > { %v3973_v62 = vpop.permute.xlu0 %886  ;;  %2763 = vmatprep.subr.mxu0 %v1280_v34 }
 0x14e   : > { %1598 = vrot.lane.b32.xlu1 %v1561_v51, %s2930_s8  ;;  %2764 = vmatpush3.msra.mxu0 %v1280_v34  ;;  %v4008_v34 = vld [vmem:[%s3897_s16 + $0x30] sm:$0xff] }
 0x14f   : > { %1786 = vrot.lane.b32.xlu0 %v1561_v51, %s2933_s13  ;;  %5217 = vst [vmem:[#allocation50_spill] sm:$0xff] %v4008_v34 }
 0x150   : > { %v3984_v21 = vpop.permute.xlu1 %892 }
 0x151   : > { %v3987_v9 = vpop.permute.xlu0 %890 }
 0x152   : > { %1839 = vrot.lane.b32.xlu1 %v1649_v16, %s2934_s14 }
 0x153   : > { %1788 = vrot.lane.b32.xlu0 %v1563_v55, %s2933_s13 }
 0x154   : > { %v3991_v51 = vpop.permute.xlu1 %896 }
 0x155   : > { %5213 = vst [vmem:[#allocation46_spill] sm:$0xff] %v3991_v51  ;;  %v3993_v52 = vpop.permute.xlu0 %894 }
 0x156   : > { %1600 = vrot.lane.b32.xlu1 %v1563_v55, %s2930_s8 }
 0x157   : > { %1096 = vrot.lane.b32.xlu0 %v3597_v15, %s2937_s18  ;;  %v1564_v15 = vrot.slane %v4008_v34, 1 }
 0x158   : > { %v3999_v20 = vpop.permute.xlu1 %900 }
 0x159   : > { %5214 = vst [vmem:[#allocation47_spill] sm:$0xff] %v3999_v20  ;;  %v4001_v23 = vpop.permute.xlu0 %898 }
 0x15a   : > { %5215 = vst [vmem:[#allocation48_spill] sm:$0xff] %v4001_v23  ;;  %1841 = vrot.lane.b32.xlu1 %v1651_v46, %s2934_s14 }
 0x15b   : > { %1686 = vrot.lane.b32.xlu0 %v1649_v16, %s2931_s9  ;;  %v2176_v16 = vld [vmem:[%s5151_s3 + $0x20] sm:$0xf] }
 0x15c   : > { %v4005_v29 = vpop.permute.xlu1 %904  ;;  %2789 = vmatprep.subr.msk.mxu1 %vm1334_vm5, %v2176_v16 }
 0x15d   : > { %5216 = vst [vmem:[#allocation49_spill] sm:$0xff] %v4005_v29  ;;  %v4013_v55 = vpop.permute.xlu0 %902  ;;  %2790 = vmatpush3.msk.msra.mxu1 %vm1334_vm5, %v2176_v16 }
 0x15e   : > { %5219 = vst [vmem:[#allocation52_spill] sm:$0xff] %v4013_v55  ;;  %1098 = vrot.lane.b32.xlu1 %v3592_v22, %s2937_s18  ;;  %v2175_v22 = vld [vmem:[%s5151_s3 + $0x18] sm:$0xff]  ;;  %v1566_v55 = vsel %vm652_vm3, %v1564_v15, %v1565_v47  ;;  %v1652_v15 = vrot.slane %v4008_v34, 2 }
 0x15f   : > { %1889 = vrot.lane.b32.xlu0 %v4008_v34, %s2935_s15  ;;  %2791 = vmatprep.subr.mxu1 %v2175_v22 }
 0x160   : > { %v4024_v37 = vpop.permute.xlu1 %908  ;;  %2792 = vmatpush3.msra.mxu1 %v2175_v22  ;;  %v2172_v22 = vld [vmem:[%s5151_s3] sm:$0xff]  ;;  %v1654_v23 = vsel %vm741_vm4, %v1652_v15, %v1653_v38 }
 0x161   : > { %5220 = vst [vmem:[#allocation53_spill] sm:$0xff] %v4024_v37  ;;  %v4027_v29 = vpop.permute.xlu0 %906  ;;  %v2174_v37 = vld [vmem:[%s5151_s3 + $0x10] sm:$0xff] }
 0x162   : > { %5221 = vst [vmem:[#allocation54_spill] sm:$0xff] %v4027_v29  ;;  %1736 = vrot.lane.b32.xlu1 %v4008_v34, %s2932_s10  ;;  %v1508_v29 = vld [vmem:[%s3897_s16 + $0x40] sm:$0x3]  ;;  %2793 = vmatprep.subr.mxu1 %v2174_v37 }
 0x163   : > { %1688 = vrot.lane.b32.xlu0 %v1651_v46, %s2931_s9  ;;  %2794 = vmatpush3.msra.mxu1 %v2174_v37  ;;  %v2173_v46 = vld [vmem:[%s5151_s3 + $0x8] sm:$0xff] }
 0x164   : > { %v4040_v20 = vpop.permute.xlu1 %912  ;;  %2795 = vmatprep.subr.mxu1 %v2173_v46 }
 0x165   : > { %5222 = vst [vmem:[#allocation55_spill] sm:$0xff] %v4040_v20  ;;  %v4042_v16 = vpop.permute.xlu0 %910  ;;  %2796 = vmatpush3.msra.mxu1 %v2173_v46  ;;  %v1655_v46 = vrot.slane %v1508_v29, 2 }
 0x166   : > { %5223 = vst [vmem:[#allocation56_spill] sm:$0xff] %v4042_v16  ;;  %1943 = vrot.lane.b32.xlu1 %v1566_v55, %s2936_s17  ;;  %v1567_v16 = vrot.slane %v1508_v29, 1  ;;  %2797 = vmatprep.subr.mxu1 %v2172_v22 }
 0x167   : > { %1891 = vrot.lane.b32.xlu0 %v4011_v27, %s2935_s15  ;;  %2798 = vmatpush3.msra.mxu1 %v2172_v22  ;;  %v1656_v15 = vsel %vm741_vm4, %v1653_v38, %v1655_v46 }
 0x168   : > { %v4056_v20 = vpop.permute.xlu1 %916  ;;  %v1568_v59 = vsel %vm652_vm3, %v1565_v47, %v1567_v16 }
 0x169   : > { %5224 = vst [vmem:[#allocation57_spill] sm:$0xff] %v4056_v20  ;;  %v4058_v37 = vpop.permute.xlu0 %914 }
 0x16a   : > { %5225 = vst [vmem:[#allocation58_spill] sm:$0xff] %v4058_v37  ;;  %1790 = vrot.lane.b32.xlu1 %v1566_v55, %s2933_s13 }
 0x16b   : > { %1738 = vrot.lane.b32.xlu0 %v4011_v27, %s2932_s10 }
 0x16c   : > { %v4064_v2 = vpop.permute.xlu1 %941 }
 0x16d   : > { %v4067_v30 = vpop.permute.xlu0 %939 }
 0x16e   : > { %1996 = vrot.lane.b32.xlu1 %v1654_v23, %s2937_s18 }
 0x16f   : > { %1945 = vrot.lane.b32.xlu0 %v1568_v59, %s2936_s17 }
 0x170   : > { %v4071_v20 = vpop.permute.xlu1 %945 }
 0x171   : > { %v4073_v37 = vpop.permute.xlu0 %943 }
 0x172   : > { %1792 = vrot.lane.b32.xlu1 %v1568_v59, %s2933_s13 }
 0x173   : > { %1602 = vrot.lane.b32.xlu0 %v1566_v55, %s2930_s8 }
 0x174   : > { %v4078_v47 = vpop.permute.xlu1 %949 }
 0x175   : > { %5226 = vst [vmem:[#allocation59_spill] sm:$0xff] %v4078_v47  ;;  %v4080_v16 = vpop.permute.xlu0 %947 }
 0x176   : > { %1998 = vrot.lane.b32.xlu1 %v1656_v15, %s2937_s18 }
 0x177   : > { %1843 = vrot.lane.b32.xlu0 %v1654_v23, %s2934_s14 }
 0x178   : > { %v4084_v29 = vpop.permute.xlu1 %953 }
 0x179   : > { %5227 = vst [vmem:[#allocation60_spill] sm:$0xff] %v4084_v29  ;;  %v4086_v22 = vpop.permute.xlu0 %951  ;;  %v4103_v29 = vld [vmem:[%s3897_s16 + $0x50] sm:$0xff] }
 0x17a   : > { %5228 = vst [vmem:[#allocation61_spill] sm:$0xff] %v4086_v22  ;;  %1604 = vrot.lane.b32.xlu1 %v1568_v59, %s2930_s8  ;;  %5233 = vst [vmem:[#allocation66_spill] sm:$0xff] %v4103_v29  ;;  %v1570_v59 = vrot.slane %v4103_v29, 1 }
 0x17b   : > { %1100 = vrot.lane.b32.xlu0 %v3610_v24, %s2937_s18  ;;  %v1569_v24 = vrot.slane %v4100_v43, 1 }
 0x17c   : > { %v4091_v55 = vpop.permute.xlu1 %957 }
 0x17d   : > { %5229 = vst [vmem:[#allocation62_spill] sm:$0xff] %v4091_v55  ;;  %v4093_v38 = vpop.permute.xlu0 %955 }
 0x17e   : > { %5230 = vst [vmem:[#allocation63_spill] sm:$0xff] %v4093_v38  ;;  %1845 = vrot.lane.b32.xlu1 %v1656_v15, %s2934_s14  ;;  %v1511_v38 = vld [vmem:[%s3897_s16 + $0x58] sm:$0x3] }
 0x17f   : > { %1690 = vrot.lane.b32.xlu0 %v1654_v23, %s2931_s9  ;;  %v1572_v34 = vrot.slane %v1511_v38, 1 }
 0x180   : > { %v4097_v46 = vpop.permute.xlu1 %961 }
 0x181   : > { %5231 = vst [vmem:[#allocation64_spill] sm:$0xff] %v4097_v46  ;;  %v4105_v22 = vpop.permute.xlu0 %959  ;;  %v1571_v46 = vsel %vm652_vm3, %v1569_v24, %v1570_v59 }
 0x182   : > { %5234 = vst [vmem:[#allocation67_spill] sm:$0xff] %v4105_v22  ;;  %1102 = vrot.lane.b32.xlu1 %v3605_v35, %s2937_s18 }
 0x183   : > { %1893 = vrot.lane.b32.xlu0 %v4100_v43, %s2935_s15 }
 0x184   : > { %v4113_v23 = vpop.permute.xlu1 %965 }
 0x185   : > { %5235 = vst [vmem:[#allocation68_spill] sm:$0xff] %v4113_v23  ;;  %v4115_v55 = vpop.permute.xlu0 %963  ;;  %v1657_v23 = vrot.slane %v4100_v43, 2 }
 0x186   : > { %5236 = vst [vmem:[#allocation69_spill] sm:$0xff] %v4115_v55  ;;  %1740 = vrot.lane.b32.xlu1 %v4100_v43, %s2932_s10  ;;  %v1658_v55 = vrot.slane %v4103_v29, 2 }
 0x187   : > { %1692 = vrot.lane.b32.xlu0 %v1656_v15, %s2931_s9 }
 0x188   : > { %v4121_v22 = vpop.permute.xlu1 %969  ;;  %v1659_v24 = vsel %vm741_vm4, %v1657_v23, %v1658_v55 }
 0x189   : > { %5237 = vst [vmem:[#allocation70_spill] sm:$0xff] %v4121_v22  ;;  %v4123_v35 = vpop.permute.xlu0 %967 }
 0x18a   : > { %5238 = vst [vmem:[#allocation71_spill] sm:$0xff] %v4123_v35  ;;  %1947 = vrot.lane.b32.xlu1 %v1571_v46, %s2936_s17  ;;  %v1573_v35 = vsel %vm652_vm3, %v1570_v59, %v1572_v34 }
 0x18b   : > { %1895 = vrot.lane.b32.xlu0 %v4103_v29, %s2935_s15 }
 0x18c   : > { %v4131_v27 = vpop.permute.xlu1 %991 }
 0x18d   : > { %v4133_v15 = vpop.permute.xlu0 %989 }
 0x18e   : > { %1794 = vrot.lane.b32.xlu1 %v1571_v46, %s2933_s13 }
 0x18f   : > { %1742 = vrot.lane.b32.xlu0 %v4103_v29, %s2932_s10  ;;  %v1660_v29 = vrot.slane %v1511_v38, 2 }
 0x190   : > { %v4139_v22 = vpop.permute.xlu1 %995 }
 0x191   : > { %v4142_v10 = vpop.permute.xlu0 %993  ;;  %v1661_v59 = vsel %vm741_vm4, %v1658_v55, %v1660_v29  ;;  %v4183_v29 = vld [vmem:[%s3897_s16 + $0x60] sm:$0xff]  ;;  %v4186_v55 = vld [vmem:[%s3897_s16 + $0x68] sm:$0xff] }
 0x192   : > { %2000 = vrot.lane.b32.xlu1 %v1659_v24, %s2937_s18  ;;  %5250 = vst [vmem:[#allocation83_spill] sm:$0xff] %v4183_v29  ;;  %5251 = vst [vmem:[#allocation84_spill] sm:$0xff] %v4186_v55 }
 0x193   : > { %1949 = vrot.lane.b32.xlu0 %v1573_v35, %s2936_s17 }
 0x194   : > { %v4146_v43 = vpop.permute.xlu1 %999 }
 0x195   : > { %5239 = vst [vmem:[#allocation72_spill] sm:$0xff] %v4146_v43  ;;  %v4148_v6 = vpop.permute.xlu0 %997 }
 0x196   : > { %5240 = vst [vmem:[#allocation73_spill] sm:$0xff] %v4148_v6  ;;  %1606 = vrot.lane.b32.xlu1 %v1571_v46, %s2930_s8 }
 0x197   : > { %1051 = vrot.lane.b32.xlu0 %v3507_v45, %s2936_s17 }
 0x198   : > { %v4153_v23 = vpop.permute.xlu1 %1003 }
 0x199   : > { %5241 = vst [vmem:[#allocation74_spill] sm:$0xff] %v4153_v23  ;;  %v4155_v47 = vpop.permute.xlu0 %1001 }
 0x19a   : > { %5242 = vst [vmem:[#allocation75_spill] sm:$0xff] %v4155_v47  ;;  %1847 = vrot.lane.b32.xlu1 %v1659_v24, %s2934_s14 }
 0x19b   : > { %1796 = vrot.lane.b32.xlu0 %v1573_v35, %s2933_s13 }
 0x19c   : > { %v4159_v34 = vpop.permute.xlu1 %1007 }
 0x19d   : > { %5243 = vst [vmem:[#allocation76_spill] sm:$0xff] %v4159_v34  ;;  %v4162_v43 = vpop.permute.xlu0 %1005 }
 0x19e   : > { %5244 = vst [vmem:[#allocation77_spill] sm:$0xff] %v4162_v43  ;;  %1053 = vrot.lane.b32.xlu1 %v3502_v42, %s2936_s17  ;;  %v1663_v43 = vrot.slane %v4186_v55, 2 }
 0x19f   : > { %2002 = vrot.lane.b32.xlu0 %v1661_v59, %s2937_s18 }
 0x1a0   : > { %v4167_v45 = vpop.permute.xlu1 %1011 }
 0x1a1   : > { %5245 = vst [vmem:[#allocation78_spill] sm:$0xff] %v4167_v45  ;;  %v4169_v38 = vpop.permute.xlu0 %1009 }
 0x1a2   : > { %5246 = vst [vmem:[#allocation79_spill] sm:$0xff] %v4169_v38  ;;  %1608 = vrot.lane.b32.xlu1 %v1573_v35, %s2930_s8  ;;  %v1575_v35 = vrot.slane %v4186_v55, 1  ;;  %v1662_v38 = vrot.slane %v4183_v29, 2 }
 0x1a3   : > { %1104 = vrot.lane.b32.xlu0 %v3623_v32, %s2937_s18  ;;  %v1574_v32 = vrot.slane %v4183_v29, 1 }
 0x1a4   : > { %v4174_v46 = vpop.permute.xlu1 %1015 }
 0x1a5   : > { %5247 = vst [vmem:[#allocation80_spill] sm:$0xff] %v4174_v46  ;;  %v4176_v34 = vpop.permute.xlu0 %1013 }
 0x1a6   : > { %5248 = vst [vmem:[#allocation81_spill] sm:$0xff] %v4176_v34  ;;  %1849 = vrot.lane.b32.xlu1 %v1661_v59, %s2934_s14  ;;  %v1514_v34 = vld [vmem:[%s3897_s16 + $0x70] sm:$0x3] }
 0x1a7   : > { %1694 = vrot.lane.b32.xlu0 %v1659_v24, %s2931_s9  ;;  %v1577_v47 = vrot.slane %v1514_v34, 1 }
 0x1a8   : > { %v4180_v42 = vpop.permute.xlu1 %1019 }
 0x1a9   : > { %5249 = vst [vmem:[#allocation82_spill] sm:$0xff] %v4180_v42  ;;  %v4188_v45 = vpop.permute.xlu0 %1017  ;;  %v1576_v42 = vsel %vm652_vm3, %v1574_v32, %v1575_v35  ;;  %v1664_v32 = vsel %vm741_vm4, %v1662_v38, %v1663_v43  ;;  %v1578_v49 = vsel %vm652_vm3, %v1575_v35, %v1577_v47  ;;  %v1145_v35 = vsel %vm1144_vm6, %v3405_v3, %v3727_v56 }
 0x1aa   : > { %5252 = vst [vmem:[#allocation85_spill] sm:$0xff] %v4188_v45  ;;  %1106 = vrot.lane.b32.xlu1 %v3618_v44, %s2937_s18 }
 0x1ab   : > { %1897 = vrot.lane.b32.xlu0 %v4183_v29, %s2935_s15 }
 0x1ac   : > { %v4196_v24 = vpop.permute.xlu1 %1045 }
 0x1ad   : > { %v1044_v46 = vpop.permute.xlu0 %1043 }
 0x1ae   : > { %1744 = vrot.lane.b32.xlu1 %v4183_v29, %s2932_s10 }
 0x1af   : > { %1696 = vrot.lane.b32.xlu0 %v1661_v59, %s2931_s9 }
 0x1b0   : > { %v4202_v45 = vpop.permute.xlu1 %1049 }
 0x1b1   : > { %v4204_v44 = vpop.permute.xlu0 %1047 }
 0x1b2   : > { %1951 = vrot.lane.b32.xlu1 %v1576_v42, %s2936_s17 }
 0x1b3   : > { %1899 = vrot.lane.b32.xlu0 %v4186_v55, %s2935_s15 }
 0x1b4   : > { %v4212_v23 = vpop.permute.xlu1 %1596 }
 0x1b5   : > { %v4214_v59 = vpop.permute.xlu0 %1594 }
 0x1b6   : > { %1798 = vrot.lane.b32.xlu1 %v1576_v42, %s2933_s13 }
 0x1b7   : > { %1746 = vrot.lane.b32.xlu0 %v4186_v55, %s2932_s10  ;;  %v1665_v55 = vrot.slane %v1514_v34, 2 }
 0x1b8   : > { %v4220_v51 = vpop.permute.xlu1 %1684 }
 0x1b9   : > { %v4223_v17 = vpop.permute.xlu0 %1682  ;;  %v1666_v34 = vsel %vm741_vm4, %v1663_v43, %v1665_v55 }
 0x1ba   : > { %2004 = vrot.lane.b32.xlu1 %v1664_v32, %s2937_s18 }
 0x1bb   : > { %1953 = vrot.lane.b32.xlu0 %v1578_v49, %s2936_s17 }
 0x1bc   : > { %v4227_v29 = vpop.permute.xlu1 %1734 }
 0x1bd   : > { %v4229_v63 = vpop.permute.xlu0 %1732 }
 0x1be   : > { %1610 = vrot.lane.b32.xlu1 %v1576_v42, %s2930_s8 }
 0x1bf   : > { %1055 = vrot.lane.b32.xlu0 %v3529_v53, %s2936_s17  ;;  %v1162_v53 = vsel %vm1161_vm7, %v1145_v35, %v3799_v7 }
 0x1c0   : > { %v4234_v38 = vpop.permute.xlu1 %1598  ;;  %v1179_v28 = vsel %vm1178_vm8, %v1162_v53, %v3871_v33  ;;  %v4287_v53 = vld [vmem:[%s3897_s16 + $0x78] sm:$0xff] }
 0x1c1   : > { %v4236_v47 = vpop.permute.xlu0 %1786  ;;  %v1196_v3 = vsel %vm1195_vm9, %v1179_v28, %v3973_v62  ;;  %v2872_v28 = vld [vmem:[%s3396_s25 + $0x8] sm:$0xff] }
 0x1c2   : > { %1851 = vrot.lane.b32.xlu1 %v1664_v32, %s2934_s14  ;;  %v1213_v56 = vsel %vm1212_vm10, %v1196_v3, %v4067_v30  ;;  %v1146_v62 = vsel %vm1144_vm6, %v2872_v28, %v3737_v8  ;;  %v2044_v28 = vsel %vm1144_vm6, %v3906_v12, %v4214_v59 }
 0x1c3   : > { %1800 = vrot.lane.b32.xlu0 %v1578_v49, %s2933_s13  ;;  %v1230_v43 = vsel %vm1229_vm11, %v1213_v56, %v4133_v15  ;;  %v1163_v30 = vsel %vm1161_vm7, %v1146_v62, %v3797_v4  ;;  %v2060_v62 = vsel %vm1161_vm7, %v2044_v28, %v4223_v17 }
 0x1c4   : > { %v1840_v42 = vpop.permute.xlu1 %1839  ;;  %v1247_v33 = vsel %vm1246_vm12, %v1230_v43, %v1044_v46  ;;  %v1180_v15 = vsel %vm1178_vm8, %v1163_v30, %v3869_v31  ;;  %v2076_v30 = vsel %vm1178_vm8, %v2060_v62, %v4229_v63 }
 0x1c5   : > { %v4248_v6 = vpop.permute.xlu0 %1788  ;;  %v1197_v8 = vsel %vm1195_vm9, %v1180_v15, %v3971_v26  ;;  %v4290_v26 = vld [vmem:[%s3897_s16 + $0x80] sm:$0xff]  ;;  %v2092_v12 = vsel %vm1195_vm9, %v2076_v30, %v4236_v47 }
 0x1c6   : > { %1057 = vrot.lane.b32.xlu1 %v3524_v50, %s2936_s17  ;;  %v2108_v17 = vsel %vm1212_vm10, %v2092_v12, %v1840_v42  ;;  %v2045_v42 = vsel %vm1144_vm6, %v3900_v57, %v4212_v23  ;;  %v2873_v23 = vld [vmem:[%s3396_s25 + $0x18] sm:$0xff]  ;;  %v2874_v12 = vld [vmem:[%s3396_s25 + $0x20] sm:$0xff] }
 0x1c7   : > { %2006 = vrot.lane.b32.xlu0 %v1666_v34, %s2937_s18 }
 0x1c8   : > { %v4259_v7 = vpop.permute.xlu1 %1600 }
 0x1c9   : > { %v1097_v55 = vpop.permute.xlu0 %1096 }
 0x1ca   : > { %1612 = vrot.lane.b32.xlu1 %v1578_v49, %s2930_s8  ;;  %v1264_v50 = vsel %vm1263_vm13, %v1247_v33, %v1097_v55  ;;  %v1214_v49 = vsel %vm1212_vm10, %v1197_v8, %v4064_v2  ;;  %v1580_v2 = vrot.slane %v4290_v26, 1  ;;  %v1517_v55 = vld [vmem:[%s3897_s16 + $0x88] sm:$0x3] }
 0x1cb   : > { %1108 = vrot.lane.b32.xlu0 %v3636_v40, %s2937_s18  ;;  %2765 = vmatprep.mubr.msk.f32.mxu0 %vm1285_vm14, %v1264_v50  ;;  %v1231_v4 = vsel %vm1229_vm11, %v1214_v49, %v4131_v27  ;;  %v1579_v27 = vrot.slane %v4287_v53, 1  ;;  %v1667_v50 = vrot.slane %v4287_v53, 2  ;;  %v1582_v8 = vrot.slane %v1517_v55, 1 }
 0x1cc   : > { %v1842_v46 = vpop.permute.xlu1 %1841  ;;  %v1248_v40 = vsel %vm1246_vm12, %v1231_v4, %v4196_v24  ;;  %v1670_v30 = vrot.slane %v1517_v55, 2 }
 0x1cd   : > { %v4276_v35 = vpop.permute.xlu0 %1686 }
 0x1ce   : > { %1853 = vrot.lane.b32.xlu1 %v1666_v34, %s2934_s14 }
 0x1cf   : > { %1698 = vrot.lane.b32.xlu0 %v1664_v32, %s2931_s9 }
 0x1d0   : > { %v1099_v31 = vpop.permute.xlu1 %1098 }
 0x1d1   : > { %v1265_v3 = vsel %vm1263_vm13, %v1248_v40, %v1099_v31  ;;  %v1890_v56 = vpop.permute.xlu0 %1889  ;;  %v1583_v31 = vsel %vm652_vm3, %v1580_v2, %v1582_v8 }
 0x1d2   : > { %1110 = vrot.lane.b32.xlu1 %v3631_v54, %s2937_s18  ;;  %2766 = vmatmul.mubr.msk.f32.vlgmr.msra.gmra.mxu0 %vm1285_vm14, %v1265_v3  ;;  %v1581_v54 = vsel %vm652_vm3, %v1579_v27, %v1580_v2  ;;  %v2124_v49 = vsel %vm1229_vm11, %v2108_v17, %v1890_v56  ;;  %v2061_v56 = vsel %vm1161_vm7, %v2045_v42, %v4220_v51 }
 0x1d3   : > { %1901 = vrot.lane.b32.xlu0 %v4287_v53, %s2935_s15  ;;  %v2077_v27 = vsel %vm1178_vm8, %v2061_v56, %v4227_v29  ;;  %v1147_v51 = vsel %vm1144_vm6, %v2873_v23, %v3724_v13  ;;  %v1148_v17 = vsel %vm1144_vm6, %v2874_v12, %v3734_v19  ;;  %v2046_v42 = vsel %vm1144_vm6, %v3940_v11, %v4234_v38  ;;  %v1520_v11 = vld [vmem:[%s3897_s16 + $0xa0] sm:$0x3]  ;;  %v2875_v12 = vld [vmem:[%s3396_s25 + $0x30] sm:$0xff] }
 0x1d4   : > { %v4300_v24 = vpop.permute.xlu1 %1736  ;;  %v1164_v29 = vsel %vm1161_vm7, %v1147_v51, %v3809_v60  ;;  %v2062_v56 = vsel %vm1161_vm7, %v2046_v42, %v4276_v35 }
 0x1d5   : > { %v4302_v32 = vpop.permute.xlu0 %1688 }
 0x1d6   : > { %1748 = vrot.lane.b32.xlu1 %v4287_v53, %s2932_s10 }
 0x1d7   : > { %1700 = vrot.lane.b32.xlu0 %v1666_v34, %s2931_s9  ;;  %v1668_v34 = vrot.slane %v4290_v26, 2 }
 0x1d8   : > { %v1944_v43 = vpop.permute.xlu1 %1943 }
 0x1d9   : > { %v1892_v33 = vpop.permute.xlu0 %1891  ;;  %v1669_v4 = vsel %vm741_vm4, %v1667_v50, %v1668_v34  ;;  %v2140_v63 = vsel %vm1246_vm12, %v2124_v49, %v1944_v43  ;;  %v2093_v43 = vsel %vm1195_vm9, %v2077_v27, %v4248_v6  ;;  %v2078_v27 = vsel %vm1178_vm8, %v2062_v56, %v4300_v24  ;;  %v5258_v56 = vld [vmem:[#allocation46_spill] sm:$0xff] }
 0x1da   : > { %1955 = vrot.lane.b32.xlu1 %v1581_v54, %s2936_s17  ;;  %v2109_v57 = vsel %vm1212_vm10, %v2093_v43, %v1842_v46  ;;  %v1181_v46 = vsel %vm1178_vm8, %v1164_v29, %v3879_v41  ;;  %v1671_v41 = vsel %vm741_vm4, %v1668_v34, %v1670_v30 }
 0x1db   : > { %1903 = vrot.lane.b32.xlu0 %v4290_v26, %s2935_s15  ;;  %v2125_v62 = vsel %vm1229_vm11, %v2109_v57, %v1892_v33  ;;  %v1198_v13 = vsel %vm1195_vm9, %v1181_v46, %v3987_v9 }
 0x1dc   : > { %v4321_v15 = vpop.permute.xlu1 %1790 }
 0x1dd   : > { %v4325_v59 = vpop.permute.xlu0 %1738  ;;  %v2094_v57 = vsel %vm1195_vm9, %v2078_v27, %v4321_v15  ;;  %v1587_v15 = vrot.slane %v1520_v11, 1 }
 0x1de   : > { %1802 = vrot.lane.b32.xlu1 %v1581_v54, %s2933_s13 }
 0x1df   : > { %1750 = vrot.lane.b32.xlu0 %v4290_v26, %s2932_s10 }
 0x1e0   : > { %v1997_v40 = vpop.permute.xlu1 %1996 }
 0x1e1   : > { %v1946_v47 = vpop.permute.xlu0 %1945  ;;  %v2156_v3 = vsel %vm1263_vm13, %v2140_v63, %v1997_v40 }
 0x1e2   : > { %2008 = vrot.lane.b32.xlu1 %v1669_v4, %s2937_s18  ;;  %2799 = vmatprep.mubr.msk.f32.mxu1 %vm1285_vm14, %v2156_v3  ;;  %v2141_v6 = vsel %vm1246_vm12, %v2125_v62, %v1946_v47 }
 0x1e3   : > { %1957 = vrot.lane.b32.xlu0 %v1583_v31, %s2936_s17 }
 0x1e4   : > { %v4346_v2 = vpop.permute.xlu1 %1792 }
 0x1e5   : > { %v4350_v28 = vpop.permute.xlu0 %1602 }
 0x1e6   : > { %1614 = vrot.lane.b32.xlu1 %v1581_v54, %s2930_s8 }
 0x1e7   : > { %1059 = vrot.lane.b32.xlu0 %v3551_v61, %s2936_s17  ;;  %v1215_v61 = vsel %vm1212_vm10, %v1198_v13, %v4073_v37  ;;  %v2047_v13 = vsel %vm1144_vm6, %v3937_v1, %v4259_v7  ;;  %v1149_v1 = vsel %vm1144_vm6, %v2875_v12, %v3751_v36  ;;  %v5263_v12 = vld [vmem:[#allocation50_spill] sm:$0xff] }
 0x1e8   : > { %v1999_v50 = vpop.permute.xlu1 %1998  ;;  %v1232_v60 = vsel %vm1229_vm11, %v1215_v61, %v4142_v10  ;;  %v1165_v10 = vsel %vm1161_vm7, %v1148_v17, %v3806_v14  ;;  %v2063_v61 = vsel %vm1161_vm7, %v2047_v13, %v4302_v32  ;;  %v1166_v32 = vsel %vm1161_vm7, %v1149_v1, %v3823_v18  ;;  %v5253_v18 = vld [vmem:[#allocation73_spill] sm:$0xff]  ;;  %v5262_v13 = vld [vmem:[#allocation7_spill] sm:$0xff] }
 0x1e9   : > { %v2157_v54 = vsel %vm1263_vm13, %v2141_v6, %v1999_v50  ;;  %v1844_v8 = vpop.permute.xlu0 %1843  ;;  %v1249_v55 = vsel %vm1246_vm12, %v1232_v60, %v4204_v44  ;;  %v1182_v37 = vsel %vm1178_vm8, %v1165_v10, %v3877_v39  ;;  %v2048_v1 = vsel %vm1144_vm6, %v5263_v12, %v4350_v28  ;;  %v1523_v28 = vld [vmem:[%s3897_s16 + $0xb8] sm:$0x3] }
 0x1ea   : > { %1855 = vrot.lane.b32.xlu1 %v1669_v4, %s2934_s14  ;;  %2800 = vmatmul.mubr.msk.f32.vlgmr.msra.gmra.mxu1 %vm1285_vm14, %v2157_v54  ;;  %v1199_v19 = vsel %vm1195_vm9, %v1182_v37, %v3984_v21  ;;  %v2110_v38 = vsel %vm1212_vm10, %v2094_v57, %v1844_v8  ;;  %v5259_v57 = vld [vmem:[#allocation59_spill] sm:$0xff] }
 0x1eb   : > { %1804 = vrot.lane.b32.xlu0 %v1583_v31, %s2933_s13 }
 0x1ec   : > { %v4375_v33 = vpop.permute.xlu1 %1604 }
 0x1ed   : > { %v1101_v9 = vpop.permute.xlu0 %1100 }
 0x1ee   : > { %v1266_v49 = vsel %vm1263_vm13, %v1249_v55, %v1101_v9  ;;  %1061 = vrot.lane.b32.xlu1 %v3546_v58, %s2936_s17  ;;  %v1216_v58 = vsel %vm1212_vm10, %v1199_v19, %v4071_v20 }
 0x1ef   : > { %2010 = vrot.lane.b32.xlu0 %v1671_v41, %s2937_s18  ;;  %2768 = vmatprep.mubr.msk.f32.mxu0 %vm1285_vm14, %v1266_v49  ;;  %v1233_v14 = vsel %vm1229_vm11, %v1216_v58, %v4139_v22  ;;  %v4417_v22 = vld [vmem:[%s3897_s16 + $0x98] sm:$0xff]  ;;  %v1183_v49 = vsel %vm1178_vm8, %v1166_v32, %v3889_v25 }
 0x1f0   : > { %v4392_v44 = vpop.permute.xlu1 %1845  ;;  %v1250_v39 = vsel %vm1246_vm12, %v1233_v14, %v4202_v45  ;;  %v1585_v47 = vrot.slane %v4417_v22, 1  ;;  %v1673_v24 = vrot.slane %v4417_v22, 2  ;;  %v1200_v37 = vsel %vm1195_vm9, %v1183_v49, %v3993_v52 }
 0x1f1   : > { %v4396_v34 = vpop.permute.xlu0 %1690 }
 0x1f2   : > { %1616 = vrot.lane.b32.xlu1 %v1583_v31, %s2930_s8  ;;  %v4414_v31 = vld [vmem:[%s3897_s16 + $0x90] sm:$0xff]  ;;  %v1588_v54 = vsel %vm652_vm3, %v1585_v47, %v1587_v15 }
 0x1f3   : > { %1112 = vrot.lane.b32.xlu0 %v3649_v48, %s2937_s18  ;;  %v1584_v45 = vrot.slane %v4414_v31, 1  ;;  %v1672_v51 = vrot.slane %v4414_v31, 2 }
 0x1f4   : > { %v1103_v63 = vpop.permute.xlu1 %1102 }
 0x1f5   : > { %v1267_v40 = vsel %vm1263_vm13, %v1250_v39, %v1103_v63  ;;  %v1894_v21 = vpop.permute.xlu0 %1893  ;;  %v1674_v30 = vsel %vm741_vm4, %v1672_v51, %v1673_v24  ;;  %v2876_v39 = vld [vmem:[%s3396_s25 + $0x38] sm:$0xff]  ;;  %v5254_v63 = vld [vmem:[#allocation10_spill] sm:$0xff]  ;;  %v5261_v51 = vld [vmem:[#allocation8_spill] sm:$0xff] }
 0x1f6   : > { %1857 = vrot.lane.b32.xlu1 %v1671_v41, %s2934_s14  ;;  %2769 = vmatmul.mubr.msk.f32.gmra.mxu0 %vm1285_vm14, %v1267_v40  ;;  %v2126_v35 = vsel %vm1229_vm11, %v2110_v38, %v1894_v21  ;;  %v1150_v40 = vsel %vm1144_vm6, %v2876_v39, %v5254_v63  ;;  %v5255_v21 = vld [vmem:[#allocation6_spill] sm:$0xff]  ;;  %v5260_v38 = vld [vmem:[#allocation72_spill] sm:$0xff] }
 0x1f7   : > { %1702 = vrot.lane.b32.xlu0 %v1669_v4, %s2931_s9 }
 0x1f8   : > { %v4411_v20 = vpop.permute.xlu1 %1740 }
 0x1f9   : > { %v4419_v48 = vpop.permute.xlu0 %1692 }
 0x1fa   : > { %1114 = vrot.lane.b32.xlu1 %v3644_v0, %s2937_s18  ;;  %v1586_v0 = vsel %vm652_vm3, %v1584_v45, %v1585_v47  ;;  %v5256_v45 = vld [vmem:[#allocation23_spill] sm:$0xff] }
 0x1fb   : > { %1905 = vrot.lane.b32.xlu0 %v4414_v31, %s2935_s15  ;;  %v1167_v47 = vsel %vm1161_vm7, %v1150_v40, %v5256_v45 }
 0x1fc   : > { %v1948_v4 = vpop.permute.xlu1 %1947 }
 0x1fd   : > { %v1896_v3 = vpop.permute.xlu0 %1895  ;;  %v2142_v62 = vsel %vm1246_vm12, %v2126_v35, %v1948_v4  ;;  %v5257_v4 = vld [vmem:[#allocation35_spill] sm:$0xff] }
 0x1fe   : > { %1752 = vrot.lane.b32.xlu1 %v4414_v31, %s2932_s10 }
 0x1ff   : > { %1704 = vrot.lane.b32.xlu0 %v1671_v41, %s2931_s9  ;;  %v2079_v41 = vsel %vm1178_vm8, %v2063_v61, %v4325_v59 }
 0x200   : > { %v4438_v43 = vpop.permute.xlu1 %1794  ;;  %v2095_v9 = vsel %vm1195_vm9, %v2079_v41, %v4346_v2  ;;  %v1675_v2 = vrot.slane %v1520_v11, 2 }
 0x201   : > { %v4442_v23 = vpop.permute.xlu0 %1742  ;;  %v2111_v7 = vsel %vm1212_vm10, %v2095_v9, %v4392_v44 }
 0x202   : > { %1959 = vrot.lane.b32.xlu1 %v1586_v0, %s2936_s17  ;;  %v2127_v59 = vsel %vm1229_vm11, %v2111_v7, %v1896_v3  ;;  %v1676_v58 = vsel %vm741_vm4, %v1673_v24, %v1675_v2  ;;  %v1184_v3 = vsel %vm1178_vm8, %v1167_v47, %v5257_v4  ;;  %v2064_v7 = vsel %vm1161_vm7, %v2048_v1, %v4396_v34  ;;  %v2877_v47 = vld [vmem:[%s3396_s25 + $0x48] sm:$0xff]  ;;  %v5265_v4 = vld [vmem:[#allocation13_spill] sm:$0xff]  ;;  %v2878_v1 = vld [vmem:[%s3396_s25 + $0x50] sm:$0xff] }
 0x203   : > { %1907 = vrot.lane.b32.xlu0 %v4417_v22, %s2935_s15 }
 0x204   : > { %v2001_v29 = vpop.permute.xlu1 %2000 }
 0x205   : > { %v2158_v6 = vsel %vm1263_vm13, %v2142_v62, %v2001_v29  ;;  %v1950_v50 = vpop.permute.xlu0 %1949 }
 0x206   : > { %1806 = vrot.lane.b32.xlu1 %v1586_v0, %s2933_s13  ;;  %2802 = vmatprep.mubr.msk.f32.mxu1 %vm1285_vm14, %v2158_v6  ;;  %v2143_v10 = vsel %vm1246_vm12, %v2127_v59, %v1950_v50  ;;  %v4538_v50 = vld [vmem:[%s3897_s16 + $0xa8] sm:$0xff]  ;;  %v2080_v59 = vsel %vm1178_vm8, %v2064_v7, %v4411_v20  ;;  %v5272_v7 = vld [vmem:[#allocation12_spill] sm:$0xff] }
 0x207   : > { %1754 = vrot.lane.b32.xlu0 %v4417_v22, %s2932_s10  ;;  %v1589_v61 = vrot.slane %v4538_v50, 1  ;;  %v2096_v2 = vsel %vm1195_vm9, %v2080_v59, %v4438_v43  ;;  %v1677_v20 = vrot.slane %v4538_v50, 2 }
 0x208   : > { %v4459_v46 = vpop.permute.xlu1 %1606 }
 0x209   : > { %v1052_v8 = vpop.permute.xlu0 %1051 }
 0x20a   : > { %2012 = vrot.lane.b32.xlu1 %v1674_v30, %s2937_s18 }
 0x20b   : > { %1961 = vrot.lane.b32.xlu0 %v1588_v54, %s2936_s17 }
 0x20c   : > { %v4469_v60 = vpop.permute.xlu1 %1847 }
 0x20d   : > { %v4473_v55 = vpop.permute.xlu0 %1796 }
 0x20e   : > { %1618 = vrot.lane.b32.xlu1 %v1586_v0, %s2930_s8  ;;  %v1201_v0 = vsel %vm1195_vm9, %v1184_v3, %v5258_v56  ;;  %v5267_v56 = vld [vmem:[#allocation26_spill] sm:$0xff] }
 0x20f   : > { %1063 = vrot.lane.b32.xlu0 %v3564_v5, %s2936_s17  ;;  %v1217_v5 = vsel %vm1212_vm10, %v1200_v37, %v4080_v16  ;;  %v1218_v11 = vsel %vm1212_vm10, %v1201_v0, %v5259_v57 }
 0x210   : > { %v1054_v17 = vpop.permute.xlu1 %1053  ;;  %v1234_v25 = vsel %vm1229_vm11, %v1217_v5, %v5253_v18  ;;  %v1235_v35 = vsel %vm1229_vm11, %v1218_v11, %v5260_v38  ;;  %v5268_v11 = vld [vmem:[#allocation37_spill] sm:$0xff] }
 0x211   : > { %v2003_v36 = vpop.permute.xlu0 %2002  ;;  %v1251_v52 = vsel %vm1246_vm12, %v1234_v25, %v1052_v8  ;;  %v1252_v24 = vsel %vm1246_vm12, %v1235_v35, %v1054_v17 }
 0x212   : > { %v2159_v44 = vsel %vm1263_vm13, %v2143_v10, %v2003_v36  ;;  %1859 = vrot.lane.b32.xlu1 %v1674_v30, %s2934_s14  ;;  %v2112_v10 = vsel %vm1212_vm10, %v2096_v2, %v4469_v60  ;;  %v5273_v2 = vld [vmem:[#allocation9_spill] sm:$0xff] }
 0x213   : > { %1808 = vrot.lane.b32.xlu0 %v1588_v54, %s2933_s13  ;;  %2803 = vmatmul.mubr.msk.f32.gmra.mxu1 %vm1285_vm14, %v2159_v44  ;;  %v1592_v44 = vrot.slane %v1523_v28, 1 }
 0x214   : > { %v4501_v19 = vpop.permute.xlu1 %1608 }
 0x215   : > { %v1105_v14 = vpop.permute.xlu0 %1104 }
 0x216   : > { %v1268_v16 = vsel %vm1263_vm13, %v1251_v52, %v1105_v14  ;;  %1065 = vrot.lane.b32.xlu1 %v5255_v21, %s2936_s17  ;;  %v5264_v14 = vld [vmem:[#allocation51_spill] sm:$0xff] }
 0x217   : > { %2014 = vrot.lane.b32.xlu0 %v1676_v58, %s2937_s18  ;;  %2771 = vmatprep.mubr.msk.f32.mxu0 %vm1285_vm14, %v1268_v16  ;;  %v2049_v39 = vsel %vm1144_vm6, %v5264_v14, %v4375_v33  ;;  %v1151_v33 = vsel %vm1144_vm6, %v2877_v47, %v5265_v4 }
 0x218   : > { %v4517_v42 = vpop.permute.xlu1 %1849  ;;  %v2065_v63 = vsel %vm1161_vm7, %v2049_v39, %v4419_v48  ;;  %v5266_v48 = vld [vmem:[#allocation11_spill] sm:$0xff]  ;;  %v5279_v39 = vld [vmem:[#allocation24_spill] sm:$0xff] }
 0x219   : > { %v4521_v27 = vpop.permute.xlu0 %1694  ;;  %v2081_v16 = vsel %vm1178_vm8, %v2065_v63, %v4442_v23  ;;  %v1168_v23 = vsel %vm1161_vm7, %v1151_v33, %v5267_v56  ;;  %v1525_v33 = vld [vmem:[%s3897_s16 + $0xc8] sm:$0xff] }
 0x21a   : > { %1620 = vrot.lane.b32.xlu1 %v1588_v54, %s2930_s8  ;;  %v4541_v54 = vld [vmem:[%s3897_s16 + $0xb0] sm:$0xff]  ;;  %v2097_v45 = vsel %vm1195_vm9, %v2081_v16, %v4473_v55  ;;  %v1680_v55 = vrot.slane %v1523_v28, 2  ;;  %v1185_v38 = vsel %vm1178_vm8, %v1168_v23, %v5268_v11  ;;  %v5274_v28 = vld [vmem:[#allocation25_spill] sm:$0xff]  ;;  %v1782_v23 = vrot.slane %v1525_v33, 1 }
 0x21b   : > { %1116 = vrot.lane.b32.xlu0 %v5261_v51, %s2937_s18  ;;  %v1590_v41 = vrot.slane %v4541_v54, 1  ;;  %v1678_v36 = vrot.slane %v4541_v54, 2  ;;  %v2113_v3 = vsel %vm1212_vm10, %v2097_v45, %v4517_v42 }
 0x21c   : > { %v1107_v62 = vpop.permute.xlu1 %1106 }
 0x21d   : > { %v1269_v29 = vsel %vm1263_vm13, %v1252_v24, %v1107_v62  ;;  %v1898_v15 = vpop.permute.xlu0 %1897  ;;  %v1591_v32 = vsel %vm652_vm3, %v1589_v61, %v1590_v41  ;;  %v1679_v60 = vsel %vm741_vm4, %v1677_v20, %v1678_v36  ;;  %v5269_v24 = vld [vmem:[#allocation48_spill] sm:$0xff] }
 0x21e   : > { %1861 = vrot.lane.b32.xlu1 %v1676_v58, %s2934_s14  ;;  %2772 = vmatmul.mubr.msk.f32.gmra.mxu0 %vm1285_vm14, %v1269_v29  ;;  %v2128_v34 = vsel %vm1229_vm11, %v2112_v10, %v1898_v15  ;;  %v1202_v42 = vsel %vm1195_vm9, %v1185_v38, %v5269_v24  ;;  %v5270_v29 = vld [vmem:[#allocation61_spill] sm:$0xff] }
 0x21f   : > { %1706 = vrot.lane.b32.xlu0 %v1674_v30, %s2931_s9  ;;  %v1219_v15 = vsel %vm1212_vm10, %v1202_v42, %v5270_v29 }
 0x220   : > { %v4535_v6 = vpop.permute.xlu1 %1744 }
 0x221   : > { %v4543_v8 = vpop.permute.xlu0 %1696 }
 0x222   : > { %1118 = vrot.lane.b32.xlu1 %v5262_v13, %s2937_s18  ;;  %v5271_v13 = vld [vmem:[#allocation75_spill] sm:$0xff] }
 0x223   : > { %1909 = vrot.lane.b32.xlu0 %v4538_v50, %s2935_s15  ;;  %v1236_v61 = vsel %vm1229_vm11, %v1219_v15, %v5271_v13 }
 0x224   : > { %v1952_v30 = vpop.permute.xlu1 %1951 }
 0x225   : > { %v1900_v9 = vpop.permute.xlu0 %1899  ;;  %v2144_v37 = vsel %vm1246_vm12, %v2128_v34, %v1952_v30  ;;  %v1681_v30 = vsel %vm741_vm4, %v1678_v36, %v1680_v55  ;;  %v5275_v34 = vld [vmem:[#allocation36_spill] sm:$0xff]  ;;  %v5281_v55 = vld [vmem:[#allocation65_spill] sm:$0xff] }
 0x226   : > { %1756 = vrot.lane.b32.xlu1 %v4538_v50, %s2932_s10  ;;  %v2129_v0 = vsel %vm1229_vm11, %v2113_v3, %v1900_v9 }
 0x227   : > { %1708 = vrot.lane.b32.xlu0 %v1676_v58, %s2931_s9  ;;  %v1593_v58 = vsel %vm652_vm3, %v1590_v41, %v1592_v44 }
 0x228   : > { %v4562_v17 = vpop.permute.xlu1 %1798 }
 0x229   : > { %v4566_v49 = vpop.permute.xlu0 %1746 }
 0x22a   : > { %1963 = vrot.lane.b32.xlu1 %v1591_v32, %s2936_s17 }
 0x22b   : > { %1911 = vrot.lane.b32.xlu0 %v4541_v54, %s2935_s15 }
 0x22c   : > { %v2005_v43 = vpop.permute.xlu1 %2004 }
 0x22d   : > { %v2160_v5 = vsel %vm1263_vm13, %v2144_v37, %v2005_v43  ;;  %v1954_v18 = vpop.permute.xlu0 %1953  ;;  %v5276_v37 = vld [vmem:[#allocation47_spill] sm:$0xff] }
 0x22e   : > { %1810 = vrot.lane.b32.xlu1 %v1591_v32, %s2933_s13  ;;  %2805 = vmatprep.mubr.msk.f32.mxu1 %vm1285_vm14, %v2160_v5  ;;  %v2145_v35 = vsel %vm1246_vm12, %v2129_v0, %v1954_v18  ;;  %v5277_v5 = vld [vmem:[#allocation60_spill] sm:$0xff] }
 0x22f   : > { %1758 = vrot.lane.b32.xlu0 %v4541_v54, %s2932_s10 }
 0x230   : > { %v4584_v25 = vpop.permute.xlu1 %1610 }
 0x231   : > { %v1056_v52 = vpop.permute.xlu0 %1055 }
 0x232   : > { %2016 = vrot.lane.b32.xlu1 %v1679_v60, %s2937_s18  ;;  %v1253_v9 = vsel %vm1246_vm12, %v1236_v61, %v1056_v52  ;;  %v5278_v52 = vld [vmem:[#allocation74_spill] sm:$0xff] }
 0x233   : > { %1965 = vrot.lane.b32.xlu0 %v1593_v58, %s2936_s17 }
 0x234   : > { %v4594_v40 = vpop.permute.xlu1 %1851 }
 0x235   : > { %v4598_v21 = vpop.permute.xlu0 %1800 }
 0x236   : > { %1622 = vrot.lane.b32.xlu1 %v1591_v32, %s2930_s8  ;;  %v1152_v32 = vsel %vm1144_vm6, %v2878_v1, %v5272_v7  ;;  %v2880_v1 = vld [vmem:[%s3396_s25 + $0xd8] sm:$0xff] }
 0x237   : > { %1067 = vrot.lane.b32.xlu0 %v5266_v48, %s2936_s17  ;;  %v1169_v10 = vsel %vm1161_vm7, %v1152_v32, %v5274_v28  ;;  %v5280_v48 = vld [vmem:[#allocation22_spill] sm:$0xff]  ;;  %v1038_v7 = vrot.slane %v2880_v1, 1 }
 0x238   : > { %v1058_v57 = vpop.permute.xlu1 %1057  ;;  %v1186_v20 = vsel %vm1178_vm8, %v1169_v10, %v5275_v34  ;;  %v5282_v28 = vld [vmem:[#allocation66_spill] sm:$0xff] }
 0x239   : > { %v2007_v51 = vpop.permute.xlu0 %2006  ;;  %v1203_v43 = vsel %vm1195_vm9, %v1186_v20, %v5276_v37  ;;  %v2051_v10 = vsel %vm1144_vm6, %v5282_v28, %v4501_v19  ;;  %v1529_v28 = vld [vmem:[%s3897_s16 + $0xe8] sm:$0x3] }
 0x23a   : > { %v2161_v62 = vsel %vm1263_vm13, %v2145_v35, %v2007_v51  ;;  %1863 = vrot.lane.b32.xlu1 %v1679_v60, %s2934_s14  ;;  %v1220_v18 = vsel %vm1212_vm10, %v1203_v43, %v5277_v5  ;;  %v2067_v20 = vsel %vm1161_vm7, %v2051_v10, %v4543_v8  ;;  %v5292_v10 = vld [vmem:[#allocation49_spill] sm:$0xff] }
 0x23b   : > { %1812 = vrot.lane.b32.xlu0 %v1593_v58, %s2933_s13  ;;  %2806 = vmatmul.mubr.msk.f32.gmra.mxu1 %vm1285_vm14, %v2161_v62  ;;  %v1237_v14 = vsel %vm1229_vm11, %v1220_v18, %v5278_v52  ;;  %v2083_v5 = vsel %vm1178_vm8, %v2067_v20, %v4566_v49  ;;  %v627_v52 = vld [vmem:[%s3396_s25 + $0xe8] sm:$0x3] }
 0x23c   : > { %v4626_v41 = vpop.permute.xlu1 %1612  ;;  %v1254_v63 = vsel %vm1246_vm12, %v1237_v14, %v1058_v57  ;;  %v2099_v19 = vsel %vm1195_vm9, %v2083_v5, %v4598_v21 }
 0x23d   : > { %v1109_v12 = vpop.permute.xlu0 %1108 }
 0x23e   : > { %v1270_v59 = vsel %vm1263_vm13, %v1253_v9, %v1109_v12  ;;  %1069 = vrot.lane.b32.xlu1 %v5273_v2, %s2936_s17  ;;  %v4698_v9 = vld [vmem:[%s3396_s25 + $0xe0] sm:$0xff] }
 0x23f   : > { %2018 = vrot.lane.b32.xlu0 %v1681_v30, %s2937_s18  ;;  %2774 = vmatprep.mubr.msk.f32.mxu0 %vm1285_vm14, %v1270_v59  ;;  %v1039_v12 = vrot.slane %v4698_v9, 1  ;;  %v1092_v14 = vrot.slane %v4698_v9, 2  ;;  %v1527_v9 = vld [vmem:[%s3897_s16 + $0xd8] sm:$0xff] }
 0x240   : > { %v4642_v36 = vpop.permute.xlu1 %1853 }
 0x241   : > { %v4646_v44 = vpop.permute.xlu0 %1698  ;;  %v1040_v43 = vsel %vm652_vm3, %v1038_v7, %v1039_v12 }
 0x242   : > { %1624 = vrot.lane.b32.xlu1 %v1593_v58, %s2930_s8  ;;  %v1524_v58 = vld [vmem:[%s3897_s16 + $0xc0] sm:$0xff] }
 0x243   : > { %1120 = vrot.lane.b32.xlu0 %v5279_v39, %s2937_s18  ;;  %v1781_v56 = vrot.slane %v1524_v58, 1  ;;  %v1834_v29 = vrot.slane %v1524_v58, 2  ;;  %v2881_v39 = vld [vmem:[%s3396_s25 + $0x60] sm:$0xff] }
 0x244   : > { %v1111_v16 = vpop.permute.xlu1 %1110 }
 0x245   : > { %v1271_v45 = vsel %vm1263_vm13, %v1254_v63, %v1111_v16  ;;  %v1902_v47 = vpop.permute.xlu0 %1901  ;;  %v1783_v38 = vsel %vm652_vm3, %v1781_v56, %v1782_v23  ;;  %v5283_v63 = vld [vmem:[#allocation15_spill] sm:$0xff]  ;;  %v1091_v16 = vrot.slane %v2880_v1, 2 }
 0x246   : > { %1865 = vrot.lane.b32.xlu1 %v1681_v30, %s2934_s14  ;;  %2775 = vmatmul.mubr.msk.f32.gmra.mxu0 %vm1285_vm14, %v1271_v45  ;;  %v1153_v8 = vsel %vm1144_vm6, %v2881_v39, %v5283_v63  ;;  %v2115_v45 = vsel %vm1212_vm10, %v2099_v19, %v4642_v36  ;;  %v5285_v56 = vld [vmem:[#allocation39_spill] sm:$0xff]  ;;  %v5294_v19 = vld [vmem:[#allocation76_spill] sm:$0xff] }
 0x247   : > { %1710 = vrot.lane.b32.xlu0 %v1679_v60, %s2931_s9  ;;  %v2050_v60 = vsel %vm1144_vm6, %v5281_v55, %v4459_v46  ;;  %v1526_v46 = vld [vmem:[%s3897_s16 + $0xd0] sm:$0x3] }
 0x248   : > { %v4660_v4 = vpop.permute.xlu1 %1748  ;;  %v2066_v11 = vsel %vm1161_vm7, %v2050_v60, %v4521_v27  ;;  %v1837_v34 = vrot.slane %v1526_v46, 2  ;;  %v5286_v60 = vld [vmem:[#allocation52_spill] sm:$0xff] }
 0x249   : > { %v4664_v3 = vpop.permute.xlu0 %1700  ;;  %v2082_v35 = vsel %vm1178_vm8, %v2066_v11, %v4535_v6  ;;  %v1835_v6 = vrot.slane %v1525_v33, 2 }
 0x24a   : > { %1122 = vrot.lane.b32.xlu1 %v5280_v48, %s2937_s18  ;;  %v2098_v24 = vsel %vm1195_vm9, %v2082_v35, %v4562_v17  ;;  %v1784_v17 = vrot.slane %v1526_v46, 1  ;;  %v1041_v48 = vrot.slane %v627_v52, 1 }
 0x24b   : > { %1913 = vrot.lane.b32.xlu0 %v1524_v58, %s2935_s15  ;;  %v2114_v62 = vsel %vm1212_vm10, %v2098_v24, %v4594_v40  ;;  %v1836_v40 = vsel %vm741_vm4, %v1834_v29, %v1835_v6  ;;  %v1838_v49 = vsel %vm741_vm4, %v1835_v6, %v1837_v34  ;;  %v5288_v24 = vld [vmem:[#allocation77_spill] sm:$0xff] }
 0x24c   : > { %v1956_v0 = vpop.permute.xlu1 %1955  ;;  %v2130_v27 = vsel %vm1229_vm11, %v2114_v62, %v1902_v47  ;;  %v1785_v59 = vsel %vm652_vm3, %v1782_v23, %v1784_v17  ;;  %v5284_v47 = vld [vmem:[#allocation28_spill] sm:$0xff] }
 0x24d   : > { %v1904_v57 = vpop.permute.xlu0 %1903  ;;  %v2146_v15 = vsel %vm1246_vm12, %v2130_v27, %v1956_v0  ;;  %v1042_v27 = vsel %vm652_vm3, %v1039_v12, %v1041_v48  ;;  %v5291_v12 = vld [vmem:[#allocation38_spill] sm:$0xff] }
 0x24e   : > { %1760 = vrot.lane.b32.xlu1 %v1524_v58, %s2932_s10  ;;  %v1170_v58 = vsel %vm1161_vm7, %v1153_v8, %v5284_v47  ;;  %v1941_v8 = vrot.slane %v1529_v28, 1 }
 0x24f   : > { %1712 = vrot.lane.b32.xlu0 %v1681_v30, %s2931_s9  ;;  %v1187_v23 = vsel %vm1178_vm8, %v1170_v58, %v5285_v56  ;;  %v1994_v56 = vrot.slane %v1529_v28, 2 }
 0x250   : > { %v4679_v51 = vpop.permute.xlu1 %1802  ;;  %v1204_v36 = vsel %vm1195_vm9, %v1187_v23, %v5286_v60  ;;  %v1991_v23 = vrot.slane %v1527_v9, 2 }
 0x251   : > { %v4683_v42 = vpop.permute.xlu0 %1750 }
 0x252   : > { %1967 = vrot.lane.b32.xlu1 %v1783_v38, %s2936_s17 }
 0x253   : > { %1915 = vrot.lane.b32.xlu0 %v1525_v33, %s2935_s15 }
 0x254   : > { %v2009_v13 = vpop.permute.xlu1 %2008 }
 0x255   : > { %v2162_v61 = vsel %vm1263_vm13, %v2146_v15, %v2009_v13  ;;  %v1958_v30 = vpop.permute.xlu0 %1957  ;;  %v2882_v15 = vld [vmem:[%s3396_s25 + $0x68] sm:$0xff]  ;;  %v5289_v13 = vld [vmem:[#allocation14_spill] sm:$0xff] }
 0x256   : > { %1814 = vrot.lane.b32.xlu1 %v1783_v38, %s2933_s13  ;;  %2808 = vmatprep.mubr.msk.f32.mxu1 %vm1285_vm14, %v2162_v61  ;;  %v5287_v38 = vld [vmem:[#allocation63_spill] sm:$0xff]  ;;  %v1154_v17 = vsel %vm1144_vm6, %v2882_v15, %v5289_v13 }
 0x257   : > { %1762 = vrot.lane.b32.xlu0 %v1525_v33, %s2932_s10  ;;  %v2131_v33 = vsel %vm1229_vm11, %v2115_v45, %v1904_v57  ;;  %v1221_v35 = vsel %vm1212_vm10, %v1204_v36, %v5287_v38  ;;  %v1093_v57 = vsel %vm741_vm4, %v1091_v16, %v1092_v14  ;;  %v1938_v16 = vrot.slane %v1527_v9, 1  ;;  %v5295_v38 = vld [vmem:[#allocation83_spill] sm:$0xff] }
 0x258   : > { %v4702_v32 = vpop.permute.xlu1 %1614  ;;  %v2147_v0 = vsel %vm1246_vm12, %v2131_v33, %v1958_v30  ;;  %v1238_v46 = vsel %vm1229_vm11, %v1221_v35, %v5288_v24  ;;  %v5290_v30 = vld [vmem:[#allocation27_spill] sm:$0xff]  ;;  %v2052_v35 = vsel %vm1144_vm6, %v5295_v38, %v4584_v25  ;;  %v5306_v38 = vld [vmem:[#allocation53_spill] sm:$0xff] }
 0x259   : > { %v1060_v2 = vpop.permute.xlu0 %1059 }
 0x25a   : > { %2020 = vrot.lane.b32.xlu1 %v1836_v40, %s2937_s18  ;;  %v1255_v29 = vsel %vm1246_vm12, %v1238_v46, %v1060_v2  ;;  %v1094_v2 = vrot.slane %v627_v52, 2 }
 0x25b   : > { %1969 = vrot.lane.b32.xlu0 %v1785_v59, %s2936_s17 }
 0x25c   : > { %v4712_v37 = vpop.permute.xlu1 %1855  ;;  %v1095_v47 = vsel %vm741_vm4, %v1092_v14, %v1094_v2  ;;  %v5297_v2 = vld [vmem:[#allocation17_spill] sm:$0xff] }
 0x25d   : > { %v4717_v18 = vpop.permute.xlu0 %1804 }
 0x25e   : > { %1816 = vrot.lane.b32.xlu1 %v1785_v59, %s2933_s13  ;;  %v1528_v59 = vld [vmem:[%s3897_s16 + $0xe0] sm:$0xff] }
 0x25f   : > { %1071 = vrot.lane.b32.xlu0 %v1040_v43, %s2936_s17  ;;  %v5293_v43 = vld [vmem:[#allocation62_spill] sm:$0xff]  ;;  %v1939_v63 = vrot.slane %v1528_v59, 1  ;;  %v1992_v48 = vrot.slane %v1528_v59, 2 }
 0x260   : > { %v1062_v21 = vpop.permute.xlu1 %1061 }
 0x261   : > { %v2011_v55 = vpop.permute.xlu0 %2010  ;;  %v1995_v14 = vsel %vm741_vm4, %v1992_v48, %v1994_v56  ;;  %v1993_v36 = vsel %vm741_vm4, %v1991_v23, %v1992_v48  ;;  %v2884_v48 = vld [vmem:[%s3396_s25 + $0x80] sm:$0xff] }
 0x262   : > { %v2163_v11 = vsel %vm1263_vm13, %v2147_v0, %v2011_v55  ;;  %2022 = vrot.lane.b32.xlu1 %v1838_v49, %s2937_s18 }
 0x263   : > { %1867 = vrot.lane.b32.xlu0 %v1836_v40, %s2934_s14  ;;  %2809 = vmatmul.mubr.msk.f32.gmra.mxu1 %vm1285_vm14, %v2163_v11  ;;  %v1171_v40 = vsel %vm1161_vm7, %v1154_v17, %v5290_v30 }
 0x264   : > { %v4748_v62 = vpop.permute.xlu1 %1616  ;;  %v1188_v1 = vsel %vm1178_vm8, %v1171_v40, %v5291_v12 }
 0x265   : > { %v1113_v6 = vpop.permute.xlu0 %1112  ;;  %v1205_v34 = vsel %vm1195_vm9, %v1188_v1, %v5292_v10 }
 0x266   : > { %v1272_v61 = vsel %vm1263_vm13, %v1255_v29, %v1113_v6  ;;  %1124 = vrot.lane.b32.xlu1 %v1093_v57, %s2937_s18  ;;  %v1222_v5 = vsel %vm1212_vm10, %v1205_v34, %v5293_v43  ;;  %v2068_v57 = vsel %vm1161_vm7, %v2052_v35, %v4646_v44 }
 0x267   : > { %1073 = vrot.lane.b32.xlu0 %v1042_v27, %s2936_s17  ;;  %2777 = vmatprep.mubr.msk.f32.mxu0 %vm1285_vm14, %v1272_v61  ;;  %v1239_v39 = vsel %vm1229_vm11, %v1222_v5, %v5294_v19  ;;  %v2084_v24 = vsel %vm1178_vm8, %v2068_v57, %v4660_v4  ;;  %v5299_v5 = vld [vmem:[#allocation41_spill] sm:$0xff] }
 0x268   : > { %v1858_v7 = vpop.permute.xlu1 %1857  ;;  %v1256_v52 = vsel %vm1246_vm12, %v1239_v39, %v1062_v21  ;;  %v1940_v21 = vsel %vm652_vm3, %v1938_v16, %v1939_v63  ;;  %v2100_v27 = vsel %vm1195_vm9, %v2084_v24, %v4679_v51  ;;  %v5296_v51 = vld [vmem:[#allocation84_spill] sm:$0xff]  ;;  %v5302_v16 = vld [vmem:[#allocation79_spill] sm:$0xff] }
 0x269   : > { %v4768_v20 = vpop.permute.xlu0 %1702  ;;  %v2116_v25 = vsel %vm1212_vm10, %v2100_v27, %v4712_v37  ;;  %v2053_v30 = vsel %vm1144_vm6, %v5296_v51, %v4626_v41  ;;  %v5298_v41 = vld [vmem:[#allocation30_spill] sm:$0xff]  ;;  %v5307_v24 = vld [vmem:[#allocation64_spill] sm:$0xff] }
 0x26a   : > { %1917 = vrot.lane.b32.xlu1 %v1527_v9, %s2935_s15  ;;  %v2069_v37 = vsel %vm1161_vm7, %v2053_v30, %v4664_v3 }
 0x26b   : > { %1869 = vrot.lane.b32.xlu0 %v1838_v49, %s2934_s14  ;;  %v1942_v49 = vsel %vm652_vm3, %v1939_v63, %v1941_v8  ;;  %v2085_v9 = vsel %vm1178_vm8, %v2069_v37, %v4683_v42 }
 0x26c   : > { %v1115_v45 = vpop.permute.xlu1 %1114  ;;  %v2101_v1 = vsel %vm1195_vm9, %v2085_v9, %v4717_v18  ;;  %v5300_v18 = vld [vmem:[#allocation54_spill] sm:$0xff]  ;;  %v2054_v9 = vsel %vm1144_vm6, %v4287_v53, %v4702_v32 }
 0x26d   : > { %v1273_v58 = vsel %vm1263_vm13, %v1256_v52, %v1115_v45  ;;  %v1906_v33 = vpop.permute.xlu0 %1905  ;;  %v2117_v10 = vsel %vm1212_vm10, %v2101_v1, %v1858_v7  ;;  %v5301_v52 = vld [vmem:[#allocation67_spill] sm:$0xff]  ;;  %v2070_v1 = vsel %vm1161_vm7, %v2054_v9, %v4768_v20 }
 0x26e   : > { %1919 = vrot.lane.b32.xlu1 %v1528_v59, %s2935_s15  ;;  %2778 = vmatmul.mubr.msk.f32.gmra.mxu0 %vm1285_vm14, %v1273_v58  ;;  %v2132_v6 = vsel %vm1229_vm11, %v2116_v25, %v1906_v33  ;;  %v2883_v59 = vld [vmem:[%s3396_s25 + $0x78] sm:$0xff]  ;;  %v5308_v25 = vld [vmem:[#allocation78_spill] sm:$0xff] }
 0x26f   : > { %1126 = vrot.lane.b32.xlu0 %v1095_v47, %s2937_s18  ;;  %v1155_v28 = vsel %vm1144_vm6, %v2883_v59, %v5297_v2 }
 0x270   : > { %v4783_v0 = vpop.permute.xlu1 %1752  ;;  %v1172_v34 = vsel %vm1161_vm7, %v1155_v28, %v5298_v41 }
 0x271   : > { %v4786_v55 = vpop.permute.xlu0 %1704  ;;  %v1189_v42 = vsel %vm1178_vm8, %v1172_v34, %v5299_v5  ;;  %v2086_v59 = vsel %vm1178_vm8, %v2070_v1, %v4783_v0  ;;  %v4888_v0 = vld [vmem:[%s5152_s4] ss:$0 sm:$0xff] }
 0x272   : > { %1973 = vrot.lane.b32.xlu1 %v1942_v49, %s2936_s17  ;;  %v1206_v63 = vsel %vm1195_vm9, %v1189_v42, %v5300_v18  ;;  %v5303_v49 = vld [vmem:[#allocation16_spill] sm:$0xff] }
 0x273   : > { %1971 = vrot.lane.b32.xlu0 %v1940_v21, %s2936_s17  ;;  %v1223_v7 = vsel %vm1212_vm10, %v1206_v63, %v5301_v52  ;;  %v1156_v56 = vsel %vm1144_vm6, %v2884_v48, %v5303_v49  ;;  %v5304_v21 = vld [vmem:[#allocation29_spill] sm:$0xff]  ;;  %v2885_v48 = vld [vmem:[%s3396_s25 + $0x90] sm:$0xff] }
 0x274   : > { %v1960_v60 = vpop.permute.xlu1 %1959  ;;  %v1240_v45 = vsel %vm1229_vm11, %v1223_v7, %v5302_v16 }
 0x275   : > { %v1908_v11 = vpop.permute.xlu0 %1907  ;;  %v2148_v15 = vsel %vm1246_vm12, %v2132_v6, %v1960_v60  ;;  %v5305_v60 = vld [vmem:[#allocation40_spill] sm:$0xff] }
 0x276   : > { %2026 = vrot.lane.b32.xlu1 %v1995_v14, %s2937_s18  ;;  %v2133_v3 = vsel %vm1229_vm11, %v2117_v10, %v1908_v11  ;;  %v1173_v14 = vsel %vm1161_vm7, %v1156_v56, %v5304_v21  ;;  %v5310_v21 = vld [vmem:[#allocation32_spill] sm:$0xff] }
 0x277   : > { %2024 = vrot.lane.b32.xlu0 %v1993_v36, %s2937_s18  ;;  %v1190_v36 = vsel %vm1178_vm8, %v1173_v14, %v5305_v60 }
 0x278   : > { %v1807_v46 = vpop.permute.xlu1 %1806  ;;  %v1207_v35 = vsel %vm1195_vm9, %v1190_v36, %v5306_v38 }
 0x279   : > { %v4803_v29 = vpop.permute.xlu0 %1754  ;;  %v1224_v27 = vsel %vm1212_vm10, %v1207_v35, %v5307_v24  ;;  %v2102_v28 = vsel %vm1195_vm9, %v2086_v59, %v1807_v46  ;;  %v5311_v35 = vld [vmem:[#allocation43_spill] sm:$0xff] }
 0x27a   : > { %v1241_v6 = vsel %vm1229_vm11, %v1224_v27, %v5308_v25 }
 0x27c   : > { %v2013_v44 = vpop.permute.xlu1 %2012 }
 0x27d   : > { %v2164_v13 = vsel %vm1263_vm13, %v2148_v15, %v2013_v44  ;;  %v1962_v17 = vpop.permute.xlu0 %1961 }
 0x27e   : > { %2811 = vmatprep.mubr.msk.f32.mxu1 %vm1285_vm14, %v2164_v13  ;;  %v2149_v19 = vsel %vm1246_vm12, %v2133_v3, %v1962_v17 }
 0x280   : > { %v4811_v4 = vpop.permute.xlu1 %1618 }
 0x281   : > { %v1064_v61 = vpop.permute.xlu0 %1063 }
 0x282   : > { %v1257_v58 = vsel %vm1246_vm12, %v1240_v45, %v1064_v61 }
 0x284   : > { %v1860_v40 = vpop.permute.xlu1 %1859 }
 0x285   : > { %v4820_v12 = vpop.permute.xlu0 %1808  ;;  %v2118_v41 = vsel %vm1212_vm10, %v2102_v28, %v1860_v40 }
 0x288   : > { %v1066_v43 = vpop.permute.xlu1 %1065 }
 0x289   : > { %v2015_v39 = vpop.permute.xlu0 %2014  ;;  %v1258_v15 = vsel %vm1246_vm12, %v1241_v6, %v1066_v43  ;;  %v5312_v6 = vld [vmem:[#allocation56_spill] sm:$0xff] }
 0x28a   : > { %v2165_v8 = vsel %vm1263_vm13, %v2149_v19, %v2015_v39  ;;  %v2055_v39 = vsel %vm1144_vm6, %v4290_v26, %v4748_v62  ;;  %v5309_v26 = vld [vmem:[#allocation19_spill] sm:$0xff] }
 0x28b   : > { %2812 = vmatmul.mubr.msk.f32.gmra.mxu1 %vm1285_vm14, %v2165_v8  ;;  %v2071_v8 = vsel %vm1161_vm7, %v2055_v39, %v4786_v55  ;;  %v1157_v62 = vsel %vm1144_vm6, %v2885_v48, %v5309_v26 }
 0x28c   : > { %v4842_v47 = vpop.permute.xlu1 %1620  ;;  %v2087_v16 = vsel %vm1178_vm8, %v2071_v8, %v4803_v29  ;;  %v1174_v14 = vsel %vm1161_vm7, %v1157_v62, %v5310_v21  ;;  %v5320_v8 = vld [vmem:[#allocation80_spill] sm:$0xff] }
 0x28d   : > { %v1117_v33 = vpop.permute.xlu0 %1116  ;;  %v2103_v49 = vsel %vm1195_vm9, %v2087_v16, %v4820_v12  ;;  %v1191_v12 = vsel %vm1178_vm8, %v1174_v14, %v5311_v35 }
 0x28e   : > { %v1274_v23 = vsel %vm1263_vm13, %v1257_v58, %v1117_v33 }
 0x28f   : > { %2780 = vmatprep.mubr.msk.f32.mxu0 %vm1285_vm14, %v1274_v23 }
 0x290   : > { %v1862_v11 = vpop.permute.xlu1 %1861 }
 0x291   : > { %v4856_v57 = vpop.permute.xlu0 %1706  ;;  %v2119_v55 = vsel %vm1212_vm10, %v2103_v49, %v1862_v11 }
 0x292   : > { %v2767_v3 = vpop.f32.mrf.mxu0 }
 0x293   : > { %v1484_v5 = vadd.f32 %v2767_v3, %v4888_v0 }
 0x294   : > { %v1119_v44 = vpop.permute.xlu1 %1118  ;;  %v1404_v46 = vpop.f32.mrf.mxu0 }
 0x295   : > { %v1275_v13 = vsel %vm1263_vm13, %v1258_v15, %v1119_v44  ;;  %v1910_v17 = vpop.permute.xlu0 %1909  ;;  %v1483_v18 = vadd.f32 %v4888_v0, %v1404_v46  ;;  %v1208_v15 = vsel %vm1195_vm9, %v1191_v12, %v5312_v6 }
 0x296   : > { %2781 = vmatmul.mubr.msk.f32.gmra.mxu0 %vm1285_vm14, %v1275_v13  ;;  %v2134_v34 = vsel %vm1229_vm11, %v2118_v41, %v1910_v17  ;;  %v5313_v17 = vld [vmem:[#allocation69_spill] sm:$0xff] }
 0x297   : > { %v2886_v41 = vld [vmem:[%s3396_s25 + $0x98] sm:$0xff] }
 0x298   : > { %v4865_v61 = vpop.permute.xlu1 %1756 }
 0x299   : > { %v4867_v51 = vpop.permute.xlu0 %1708 }
 0x29c   : > { %v1964_v30 = vpop.permute.xlu1 %1963 }
 0x29d   : > { %v1912_v37 = vpop.permute.xlu0 %1911  ;;  %v2150_v43 = vsel %vm1246_vm12, %v2134_v34, %v1964_v30  ;;  %v1225_v30 = vsel %vm1212_vm10, %v1208_v15, %v5313_v17  ;;  %v5315_v34 = vld [vmem:[#allocation18_spill] sm:$0xff]  ;;  %v2887_v15 = vld [vmem:[%s3396_s25 + $0xa8] sm:$0xff] }
 0x29e   : > { %v2135_v60 = vsel %vm1229_vm11, %v2119_v55, %v1912_v37  ;;  %v5314_v37 = vld [vmem:[#allocation81_spill] sm:$0xff]  ;;  %v1158_v3 = vsel %vm1144_vm6, %v2886_v41, %v5315_v34 }
 0x29f   : > { %v1242_v9 = vsel %vm1229_vm11, %v1225_v30, %v5314_v37 }
 0x2a0   : > { %v4876_v2 = vpop.permute.xlu1 %1810 }
 0x2a1   : > { %v4879_v10 = vpop.permute.xlu0 %1758 }
 0x2a4   : > { %v2017_v53 = vpop.permute.xlu1 %2016 }
 0x2a5   : > { %v2166_v32 = vsel %vm1263_vm13, %v2150_v43, %v2017_v53  ;;  %v1966_v20 = vpop.permute.xlu0 %1965  ;;  %v5316_v53 = vld [vmem:[#allocation31_spill] sm:$0xff] }
 0x2a6   : > { %2814 = vmatprep.mubr.msk.f32.mxu1 %vm1285_vm14, %v2166_v32  ;;  %v2151_v11 = vsel %vm1246_vm12, %v2135_v60, %v1966_v20  ;;  %v1175_v32 = vsel %vm1161_vm7, %v1158_v3, %v5316_v53  ;;  %v5317_v20 = vld [vmem:[#allocation42_spill] sm:$0xff] }
 0x2a7   : > { %v1192_v46 = vsel %vm1178_vm8, %v1175_v32, %v5317_v20  ;;  %v5324_v3 = vld [vmem:[#allocation58_spill] sm:$0xff] }
 0x2a8   : > { %v4891_v40 = vpop.permute.xlu1 %1622 }
 0x2a9   : > { %v1068_v42 = vpop.permute.xlu0 %1067 }
 0x2aa   : > { %v2801_v19 = vpop.f32.mrf.mxu1  ;;  %v1259_v59 = vsel %vm1246_vm12, %v1242_v9, %v1068_v42  ;;  %v5323_v9 = vld [vmem:[#allocation45_spill] sm:$0xff] }
 0x2ab   : > { %v2374_v63 = vadd.f32 %v2801_v19, %v1484_v5  ;;  %v5318_v19 = vld [vmem:[#allocation55_spill] sm:$0xff] }
 0x2ac   : > { %v1864_v52 = vpop.permute.xlu1 %1863  ;;  %v2294_v7 = vpop.f32.mrf.mxu1  ;;  %v1209_v39 = vsel %vm1195_vm9, %v1192_v46, %v5318_v19  ;;  %v5325_v46 = vld [vmem:[#allocation71_spill] sm:$0xff] }
 0x2ad   : > { %2390 = vst.msk [vmem:[%s3034_s29 + $0x8] sm:$0xff] %vm1144_vm6, %v2374_v63  ;;  %v2448_v45 = vmul.f32 %v2374_v63, %v2374_v63  ;;  %v2373_v58 = vadd.f32 %v2294_v7, %v1483_v18  ;;  %v4904_v33 = vpop.permute.xlu0 %1812  ;;  %v2407_v56 = vsel %vm1144_vm6, %v2374_v63, 0.0  ;;  %v5319_v18 = vld [vmem:[#allocation68_spill] sm:$0xff] }
 0x2ae   : > { %v1226_v63 = vsel %vm1212_vm10, %v1209_v39, %v5319_v18  ;;  %v5326_v39 = vld [vmem:[#allocation85_spill] sm:$0xff] }
 0x2af   : > { %2389 = vst.msk [vmem:[%s3034_s29] sm:$0xff] %vm1144_vm6, %v2373_v58  ;;  %v2406_v29 = vsel %vm1144_vm6, %v2373_v58, 0.0  ;;  %v2447_v23 = vmul.f32 %v2373_v58, %v2373_v58  ;;  %v2464_v24 = vsel %vm1144_vm6, %v2448_v45, 0.0  ;;  %v1243_v7 = vsel %vm1229_vm11, %v1226_v63, %v5320_v8 }
 0x2b0   : > { %v4919_v36 = vadd.f32 %v2407_v56, %v2406_v29  ;;  %v1070_v38 = vpop.permute.xlu1 %1069  ;;  %v2056_v56 = vsel %vm1144_vm6, %v4414_v31, %v4811_v4 }
 0x2b1   : > { %v2463_v27 = vsel %vm1144_vm6, %v2447_v23, 0.0  ;;  %v2019_v25 = vpop.permute.xlu0 %2018  ;;  %v1260_v16 = vsel %vm1246_vm12, %v1243_v7, %v1070_v38  ;;  %v2072_v29 = vsel %vm1161_vm7, %v2056_v56, %v4856_v57 }
 0x2b2   : > { %v4928_v44 = vadd.f32 %v2464_v24, %v2463_v27  ;;  %v2167_v13 = vsel %vm1263_vm13, %v2151_v11, %v2019_v25  ;;  %v2088_v23 = vsel %vm1178_vm8, %v2072_v29, %v4865_v61  ;;  %v2057_v61 = vsel %vm1144_vm6, %v4417_v22, %v4842_v47  ;;  %v2888_v29 = vld [vmem:[%s3396_s25 + $0xb0] sm:$0xff] }
 0x2b3   : > { %2815 = vmatmul.mubr.msk.f32.gmra.mxu1 %vm1285_vm14, %v2167_v13  ;;  %v2104_v14 = vsel %vm1195_vm9, %v2088_v23, %v4876_v2  ;;  %v2073_v2 = vsel %vm1161_vm7, %v2057_v61, %v4867_v51  ;;  %v5321_v13 = vld [vmem:[#allocation21_spill] sm:$0xff]  ;;  %v5322_v51 = vld [vmem:[#allocation34_spill] sm:$0xff]  ;;  %v5327_v23 = vld [vmem:[#allocation20_spill] sm:$0xff] }
 0x2b4   : > { %v4936_v1 = vpop.permute.xlu1 %1624  ;;  %v2120_v38 = vsel %vm1212_vm10, %v2104_v14, %v1864_v52  ;;  %v2089_v52 = vsel %vm1178_vm8, %v2073_v2, %v4879_v10  ;;  %v1159_v17 = vsel %vm1144_vm6, %v2887_v15, %v5321_v13  ;;  %v1160_v14 = vsel %vm1144_vm6, %v2888_v29, %v5327_v23  ;;  %v5332_v15 = vld [vmem:[#allocation82_spill] sm:$0xff] }
 0x2b5   : > { %v1121_v28 = vpop.permute.xlu0 %1120  ;;  %v2105_v27 = vsel %vm1195_vm9, %v2089_v52, %v4904_v33  ;;  %v1176_v30 = vsel %vm1161_vm7, %v1159_v17, %v5322_v51  ;;  %v5330_v52 = vld [vmem:[#allocation57_spill] sm:$0xff] }
 0x2b6   : > { %v1276_v43 = vsel %vm1263_vm13, %v1259_v59, %v1121_v28  ;;  %v2770_v12 = vpop.f32.mrf.mxu0  ;;  %v1193_v33 = vsel %vm1178_vm8, %v1176_v30, %v5323_v9  ;;  %v2058_v30 = vsel %vm1144_vm6, %v4538_v50, %v4891_v40 }
 0x2b7   : > { %2783 = vmatprep.mubr.msk.f32.mxu0 %vm1285_vm14, %v1276_v43  ;;  %v1486_v22 = vadd.f32 %v2770_v12, %v4888_v0  ;;  %v1210_v43 = vsel %vm1195_vm9, %v1193_v33, %v5324_v3 }
 0x2b8   : > { %v1866_v5 = vpop.permute.xlu1 %1865  ;;  %v1414_v25 = vpop.f32.mrf.mxu0 }
 0x2b9   : > { %v4950_v42 = vpop.permute.xlu0 %1710  ;;  %v2121_v47 = vsel %vm1212_vm10, %v2105_v27, %v1866_v5  ;;  %v1485_v59 = vadd.f32 %v4888_v0, %v1414_v25  ;;  %v1227_v5 = vsel %vm1212_vm10, %v1210_v43, %v5325_v46  ;;  %v5331_v25 = vld [vmem:[#allocation70_spill] sm:$0xff] }
 0x2ba   : > { %v1244_v18 = vsel %vm1229_vm11, %v1227_v5, %v5326_v39 }
 0x2bc   : > { %v1123_v45 = vpop.permute.xlu1 %1122 }
 0x2bd   : > { %v1277_v58 = vsel %vm1263_vm13, %v1260_v16, %v1123_v45  ;;  %v1914_v48 = vpop.permute.xlu0 %1913 }
 0x2be   : > { %2784 = vmatmul.mubr.msk.f32.gmra.mxu0 %vm1285_vm14, %v1277_v58  ;;  %v2136_v35 = vsel %vm1229_vm11, %v2120_v38, %v1914_v48 }
 0x2c0   : > { %v4959_v26 = vpop.permute.xlu1 %1760 }
 0x2c1   : > { %v4961_v62 = vpop.permute.xlu0 %1712 }
 0x2c4   : > { %v1968_v49 = vpop.permute.xlu1 %1967 }
 0x2c5   : > { %v1916_v55 = vpop.permute.xlu0 %1915  ;;  %v2152_v31 = vsel %vm1246_vm12, %v2136_v35, %v1968_v49 }
 0x2c6   : > { %v2137_v10 = vsel %vm1229_vm11, %v2121_v47, %v1916_v55  ;;  %v2059_v47 = vsel %vm1144_vm6, %v4541_v54, %v4936_v1 }
 0x2c8   : > { %v4970_v21 = vpop.permute.xlu1 %1814 }
 0x2c9   : > { %v4974_v60 = vpop.permute.xlu0 %1762 }
 0x2cc   : > { %v2021_v4 = vpop.permute.xlu1 %2020 }
 0x2cd   : > { %v2168_v57 = vsel %vm1263_vm13, %v2152_v31, %v2021_v4  ;;  %v1970_v11 = vpop.permute.xlu0 %1969  ;;  %v5328_v31 = vld [vmem:[#allocation33_spill] sm:$0xff] }
 0x2ce   : > { %2817 = vmatprep.mubr.msk.f32.mxu1 %vm1285_vm14, %v2168_v57  ;;  %v2153_v28 = vsel %vm1246_vm12, %v2137_v10, %v1970_v11  ;;  %v1177_v4 = vsel %vm1161_vm7, %v1160_v14, %v5328_v31  ;;  %v5329_v57 = vld [vmem:[#allocation44_spill] sm:$0xff]  ;;  %v2075_v10 = vsel %vm1161_vm7, %v2059_v47, %v4961_v62 }
 0x2cf   : > { %v1194_v11 = vsel %vm1178_vm8, %v1177_v4, %v5329_v57  ;;  %v2091_v9 = vsel %vm1178_vm8, %v2075_v10, %v4974_v60 }
 0x2d0   : > { %v4988_v24 = vpop.permute.xlu1 %1816  ;;  %v1211_v27 = vsel %vm1195_vm9, %v1194_v11, %v5330_v52 }
 0x2d1   : > { %v1072_v6 = vpop.permute.xlu0 %1071  ;;  %v2107_v1 = vsel %vm1195_vm9, %v2091_v9, %v4988_v24 }
 0x2d2   : > { %v1261_v63 = vsel %vm1246_vm12, %v1244_v18, %v1072_v6  ;;  %v1228_v6 = vsel %vm1212_vm10, %v1211_v27, %v5331_v25 }
 0x2d3   : > { %v2804_v37 = vpop.f32.mrf.mxu1 }
 0x2d4   : > { %v2376_v41 = vadd.f32 %v2804_v37, %v1486_v22  ;;  %v2023_v34 = vpop.permute.xlu1 %2022  ;;  %v2074_v37 = vsel %vm1161_vm7, %v2058_v30, %v4950_v42 }
 0x2d5   : > { %v2169_v53 = vsel %vm1263_vm13, %v2153_v28, %v2023_v34  ;;  %v2304_v32 = vpop.f32.mrf.mxu1  ;;  %v1868_v20 = vpop.permute.xlu0 %1867  ;;  %v2090_v54 = vsel %vm1178_vm8, %v2074_v37, %v4959_v26 }
 0x2d6   : > { %2392 = vst.msk [vmem:[%s3034_s29 + $0x18] sm:$0xff] %vm1144_vm6, %v2376_v41  ;;  %v2375_v19 = vadd.f32 %v2304_v32, %v1485_v59  ;;  %2818 = vmatmul.mubr.msk.f32.gmra.mxu1 %vm1285_vm14, %v2169_v53  ;;  %v2450_v8 = vmul.f32 %v2376_v41, %v2376_v41  ;;  %v2411_v55 = vsel %vm1144_vm6, %v2376_v41, 0.0  ;;  %v2106_v50 = vsel %vm1195_vm9, %v2090_v54, %v4970_v21 }
 0x2d7   : > { %v2122_v62 = vsel %vm1212_vm10, %v2106_v50, %v1868_v20 }
 0x2d8   : > { %2391 = vst.msk [vmem:[%s3034_s29 + $0x10] sm:$0xff] %vm1144_vm6, %v2375_v19  ;;  %v2409_v7 = vsel %vm1144_vm6, %v2375_v19, 0.0  ;;  %v2449_v16 = vmul.f32 %v2375_v19, %v2375_v19  ;;  %v1125_v45 = vpop.permute.xlu1 %1124 }
 0x2d9   : > { %v2410_v58 = vadd.f32 %v2409_v7, %v4919_v36  ;;  %v1278_v48 = vsel %vm1263_vm13, %v1261_v63, %v1125_v45  ;;  %v1074_v49 = vpop.permute.xlu0 %1073  ;;  %v2468_v36 = vsel %vm1144_vm6, %v2450_v8, 0.0 }
 0x2da   : > { %v2466_v56 = vsel %vm1144_vm6, %v2449_v16, 0.0  ;;  %2786 = vmatprep.mubr.msk.f32.mxu0 %vm1285_vm14, %v1278_v48 }
 0x2db   : > { %v2467_v38 = vadd.f32 %v2466_v56, %v4928_v44  ;;  %v2412_v35 = vadd.f32 %v2411_v55, %v2410_v58  ;;  %v1245_v44 = vsel %vm1229_vm11, %v1228_v6, %v5332_v15 }
 0x2dc   : > { %v1918_v12 = vpop.permute.xlu1 %1917  ;;  %v1262_v17 = vsel %vm1246_vm12, %v1245_v44, %v1074_v49 }
 0x2dd   : > { %v1870_v61 = vpop.permute.xlu0 %1869  ;;  %v2469_v2 = vadd.f32 %v2468_v36, %v2467_v38  ;;  %v2138_v28 = vsel %vm1229_vm11, %v2122_v62, %v1918_v12 }
 0x2de   : > { %v2123_v40 = vsel %vm1212_vm10, %v2107_v1, %v1870_v61  ;;  %v2773_v3 = vpop.f32.mrf.mxu0 }
 0x2df   : > { %v1488_v53 = vadd.f32 %v2773_v3, %v4888_v0 }
 0x2e0   : > { %v1920_v13 = vpop.permute.xlu1 %1919  ;;  %v1424_v43 = vpop.f32.mrf.mxu0 }
 0x2e1   : > { %v1127_v22 = vpop.permute.xlu0 %1126  ;;  %v2139_v42 = vsel %vm1229_vm11, %v2123_v40, %v1920_v13  ;;  %v1487_v20 = vadd.f32 %v4888_v0, %v1424_v43 }
 0x2e2   : > { %v1279_v51 = vsel %vm1263_vm13, %v1262_v17, %v1127_v22 }
 0x2e3   : > { %2787 = vmatmul.mubr.msk.f32.gmra.mxu0 %vm1285_vm14, %v1279_v51 }
 0x2e4   : > { %v1974_v33 = vpop.permute.xlu1 %1973 }
 0x2e5   : > { %v1972_v59 = vpop.permute.xlu0 %1971  ;;  %v2155_v60 = vsel %vm1246_vm12, %v2139_v42, %v1974_v33 }
 0x2e6   : > { %v2154_v26 = vsel %vm1246_vm12, %v2138_v28, %v1972_v59 }
 0x2e8   : > { %v2027_v41 = vpop.permute.xlu1 %2026 }
 0x2e9   : > { %v2171_v24 = vsel %vm1263_vm13, %v2155_v60, %v2027_v41  ;;  %v2025_v34 = vpop.permute.xlu0 %2024 }
 0x2ea   : > { %v2170_v21 = vsel %vm1263_vm13, %v2154_v26, %v2025_v34 }
 0x2eb   : > { %2820 = vmatprep.mubr.msk.f32.mxu1 %vm1285_vm14, %v2170_v21 }
 0x2ec   : > { %2821 = vmatmul.mubr.msk.f32.gmra.mxu1 %vm1285_vm14, %v2171_v24 }
 0x2fb   : > { %v2807_v32 = vpop.f32.mrf.mxu1 }
 0x2fc   : > { %v2378_v46 = vadd.f32 %v2807_v32, %v1488_v53 }
 0x2fd   : > { %v2314_v5 = vpop.f32.mrf.mxu1 }
 0x2fe   : > { %2394 = vst.msk [vmem:[%s3034_s29 + $0x28] sm:$0xff] %vm1144_vm6, %v2378_v46  ;;  %v2377_v19 = vadd.f32 %v2314_v5, %v1487_v20  ;;  %v2452_v39 = vmul.f32 %v2378_v46, %v2378_v46  ;;  %v2415_v7 = vsel %vm1144_vm6, %v2378_v46, 0.0 }
 0x300   : > { %2393 = vst.msk [vmem:[%s3034_s29 + $0x20] sm:$0xff] %vm1144_vm6, %v2377_v19  ;;  %v2413_v18 = vsel %vm1144_vm6, %v2377_v19, 0.0  ;;  %v2451_v63 = vmul.f32 %v2377_v19, %v2377_v19  ;;  %v2472_v48 = vsel %vm1144_vm6, %v2452_v39, 0.0 }
 0x301   : > { %v2414_v8 = vadd.f32 %v2413_v18, %v2412_v35 }
 0x302   : > { %v2470_v16 = vsel %vm1144_vm6, %v2451_v63, 0.0 }
 0x303   : > { %v2471_v45 = vadd.f32 %v2470_v16, %v2469_v2  ;;  %v2416_v58 = vadd.f32 %v2415_v7, %v2414_v8 }
 0x305   : > { %v2473_v49 = vadd.f32 %v2472_v48, %v2471_v45 }
 0x306   : > { %v2776_v55 = vpop.f32.mrf.mxu0 }
 0x307   : > { %v1490_v29 = vadd.f32 %v2776_v55, %v4888_v0 }
 0x308   : > { %v1434_v56 = vpop.f32.mrf.mxu0 }
 0x309   : > { %v1489_v14 = vadd.f32 %v4888_v0, %v1434_v56 }
 0x323   : > { %v2810_v23 = vpop.f32.mrf.mxu1 }
 0x324   : > { %v2380_v38 = vadd.f32 %v2810_v23, %v1490_v29 }
 0x325   : > { %v2324_v31 = vpop.f32.mrf.mxu1 }
 0x326   : > { %2396 = vst.msk [vmem:[%s3034_s29 + $0x38] sm:$0xff] %vm1144_vm6, %v2380_v38  ;;  %v2379_v35 = vadd.f32 %v2324_v31, %v1489_v14  ;;  %v2454_v4 = vmul.f32 %v2380_v38, %v2380_v38  ;;  %v2419_v11 = vsel %vm1144_vm6, %v2380_v38, 0.0 }
 0x328   : > { %2395 = vst.msk [vmem:[%s3034_s29 + $0x30] sm:$0xff] %vm1144_vm6, %v2379_v35  ;;  %v2417_v36 = vsel %vm1144_vm6, %v2379_v35, 0.0  ;;  %v2453_v12 = vmul.f32 %v2379_v35, %v2379_v35  ;;  %v2476_v27 = vsel %vm1144_vm6, %v2454_v4, 0.0 }
 0x329   : > { %v2418_v57 = vadd.f32 %v2417_v36, %v2416_v58 }
 0x32a   : > { %v2474_v61 = vsel %vm1144_vm6, %v2453_v12, 0.0 }
 0x32b   : > { %v2475_v2 = vadd.f32 %v2474_v61, %v2473_v49  ;;  %v2420_v52 = vadd.f32 %v2419_v11, %v2418_v57 }
 0x32d   : > { %v2477_v25 = vadd.f32 %v2476_v27, %v2475_v2 }
 0x32e   : > { %v2779_v6 = vpop.f32.mrf.mxu0 }
 0x32f   : > { %v1492_v44 = vadd.f32 %v2779_v6, %v4888_v0 }
 0x330   : > { %v1444_v15 = vpop.f32.mrf.mxu0 }
 0x331   : > { %v1491_v17 = vadd.f32 %v4888_v0, %v1444_v15 }
 0x34b   : > { %v2813_v13 = vpop.f32.mrf.mxu1 }
 0x34c   : > { %v2382_v22 = vadd.f32 %v2813_v13, %v1492_v44 }
 0x34d   : > { %v2334_v47 = vpop.f32.mrf.mxu1 }
 0x34e   : > { %2398 = vst.msk [vmem:[%s3034_s29 + $0x48] sm:$0xff] %vm1144_vm6, %v2382_v22  ;;  %v2381_v51 = vadd.f32 %v2334_v47, %v1491_v17  ;;  %v2456_v30 = vmul.f32 %v2382_v22, %v2382_v22  ;;  %v2423_v33 = vsel %vm1144_vm6, %v2382_v22, 0.0 }
 0x350   : > { %2397 = vst.msk [vmem:[%s3034_s29 + $0x40] sm:$0xff] %vm1144_vm6, %v2381_v51  ;;  %v2421_v10 = vsel %vm1144_vm6, %v2381_v51, 0.0  ;;  %v2455_v37 = vmul.f32 %v2381_v51, %v2381_v51  ;;  %v2480_v50 = vsel %vm1144_vm6, %v2456_v30, 0.0 }
 0x351   : > { %v2422_v9 = vadd.f32 %v2421_v10, %v2420_v52 }
 0x352   : > { %v2478_v54 = vsel %vm1144_vm6, %v2455_v37, 0.0 }
 0x353   : > { %v2479_v1 = vadd.f32 %v2478_v54, %v2477_v25  ;;  %v2424_v59 = vadd.f32 %v2423_v33, %v2422_v9 }
 0x355   : > { %v2481_v40 = vadd.f32 %v2480_v50, %v2479_v1 }
 0x356   : > { %v2782_v62 = vpop.f32.mrf.mxu0 }
 0x357   : > { %v1494_v28 = vadd.f32 %v2782_v62, %v4888_v0 }
 0x358   : > { %v1454_v42 = vpop.f32.mrf.mxu0 }
 0x359   : > { %v1493_v41 = vadd.f32 %v4888_v0, %v1454_v42 }
 0x373   : > { %v2816_v60 = vpop.f32.mrf.mxu1 }
 0x374   : > { %v2384_v26 = vadd.f32 %v2816_v60, %v1494_v28  ;;  %v2446_v28 = vld [vmem:[%s3029_s30] sm:$0x1] }
 0x375   : > { %v2344_v24 = vpop.f32.mrf.mxu1 }
 0x376   : > { %2400 = vst.msk [vmem:[%s3034_s29 + $0x58] sm:$0xff] %vm1144_vm6, %v2384_v26  ;;  %v2383_v34 = vadd.f32 %v2344_v24, %v1493_v41  ;;  %v2458_v7 = vmul.f32 %v2384_v26, %v2384_v26  ;;  %v2427_v58 = vsel %vm1144_vm6, %v2384_v26, 0.0 }
 0x378   : > { %2399 = vst.msk [vmem:[%s3034_s29 + $0x50] sm:$0xff] %vm1144_vm6, %v2383_v34  ;;  %v2457_v19 = vmul.f32 %v2383_v34, %v2383_v34  ;;  %v2425_v39 = vsel %vm1144_vm6, %v2383_v34, 0.0  ;;  %v2484_v56 = vsel %vm1144_vm6, %v2458_v7, 0.0 }
 0x379   : > { %v2426_v63 = vadd.f32 %v2425_v39, %v2424_v59 }
 0x37a   : > { %v2482_v18 = vsel %vm1144_vm6, %v2457_v19, 0.0 }
 0x37b   : > { %v2483_v45 = vadd.f32 %v2482_v18, %v2481_v40  ;;  %v2428_v49 = vadd.f32 %v2427_v58, %v2426_v63  ;;  %v2405_v40 = vld [vmem:[%s3024_s20] sm:$0x1] }
 0x37d   : > { %v2485_v38 = vadd.f32 %v2484_v56, %v2483_v45 }
 0x37e   : > { %v2785_v21 = vpop.f32.mrf.mxu0 }
 0x37f   : > { %v1496_v43 = vadd.f32 %v2785_v21, %v4888_v0 }
 0x380   : > { %v1464_v3 = vpop.f32.mrf.mxu0 }
 0x381   : > { %v1495_v32 = vadd.f32 %v4888_v0, %v1464_v3 }
 0x396   : > { %v2819_v53 = vpop.f32.mrf.mxu1 }
 0x397   : > { %v2386_v20 = vadd.f32 %v2819_v53, %v1496_v43 }
 0x398   : > { %v2354_v46 = vpop.f32.mrf.mxu1 }
 0x399   : > { %2402 = vst.msk [vmem:[%s3034_s29 + $0x68] sm:$0xff] %vm1144_vm6, %v2386_v20  ;;  %v2385_v5 = vadd.f32 %v2354_v46, %v1495_v32  ;;  %v2460_v35 = vmul.f32 %v2386_v20, %v2386_v20  ;;  %v2431_v11 = vsel %vm1144_vm6, %v2386_v20, 0.0 }
 0x39b   : > { %2401 = vst.msk [vmem:[%s3034_s29 + $0x60] sm:$0xff] %vm1144_vm6, %v2385_v5  ;;  %v2459_v16 = vmul.f32 %v2385_v5, %v2385_v5  ;;  %v2429_v48 = vsel %vm1144_vm6, %v2385_v5, 0.0  ;;  %v2488_v52 = vsel %vm1144_vm6, %v2460_v35, 0.0 }
 0x39c   : > { %v2430_v14 = vadd.f32 %v2429_v48, %v2428_v49 }
 0x39d   : > { %v2486_v29 = vsel %vm1144_vm6, %v2459_v16, 0.0 }
 0x39e   : > { %v2487_v12 = vadd.f32 %v2486_v29, %v2485_v38  ;;  %v2432_v2 = vadd.f32 %v2431_v11, %v2430_v14 }
 0x3a0   : > { %v2489_v44 = vadd.f32 %v2488_v52, %v2487_v12 }
 0x3a3   : > { %v2788_v8 = vpop.f32.mrf.mxu0 }
 0x3a4   : > { %v1498_v23 = vadd.f32 %v2788_v8, %v4888_v0 }
 0x3a5   : > { %v1474_v55 = vpop.f32.mrf.mxu0 }
 0x3a6   : > { %v1497_v4 = vadd.f32 %v4888_v0, %v1474_v55 }
 0x3ac   : > { %v2822_v31 = vpop.f32.mrf.mxu1 }
 0x3ad   : > { %v2388_v36 = vadd.f32 %v2822_v31, %v1498_v23 }
 0x3ae   : > { %v2364_v57 = vpop.f32.mrf.mxu1 }
 0x3af   : > { %2404 = vst.msk [vmem:[%s3034_s29 + $0x78] sm:$0xff] %vm1144_vm6, %v2388_v36  ;;  %v2387_v61 = vadd.f32 %v2364_v57, %v1497_v4  ;;  %v2462_v27 = vmul.f32 %v2388_v36, %v2388_v36  ;;  %v2435_v0 = vsel %vm1144_vm6, %v2388_v36, 0.0 }
 0x3b1   : > { %2403 = vst.msk [vmem:[%s3034_s29 + $0x70] sm:$0xff] %vm1144_vm6, %v2387_v61  ;;  %v2433_v25 = vsel %vm1144_vm6, %v2387_v61, 0.0  ;;  %v2461_v6 = vmul.f32 %v2387_v61, %v2387_v61  ;;  %v2492_v47 = vsel %vm1144_vm6, %v2462_v27, 0.0 }
 0x3b2   : > { %v2434_v15 = vadd.f32 %v2433_v25, %v2432_v2 }
 0x3b3   : > { %v2490_v13 = vsel %vm1144_vm6, %v2461_v6, 0.0 }
 0x3b4   : > { %v2436_v17 = vadd.f32 %v2435_v0, %v2434_v15  ;;  %v2491_v22 = vadd.f32 %v2490_v13, %v2489_v44 }
 0x3b6   : > { %v2437_v51 = vrot.slane %v2436_v17, 4  ;;  %v2493_v30 = vadd.f32 %v2492_v47, %v2491_v22 }
 0x3b8   : > { %v2438_v10 = vadd.f32 %v2437_v51, %v2436_v17  ;;  %v2494_v37 = vrot.slane %v2493_v30, 4 }
 0x3ba   : > { %v2439_v9 = vrot.slane %v2438_v10, 2  ;;  %v2495_v33 = vadd.f32 %v2494_v37, %v2493_v30 }
 0x3bc   : > { %v2440_v54 = vadd.f32 %v2439_v9, %v2438_v10  ;;  %v2496_v1 = vrot.slane %v2495_v33, 2 }
 0x3be   : > { %v2441_v59 = vrot.slane %v2440_v54, 1  ;;  %v2497_v50 = vadd.f32 %v2496_v1, %v2495_v33 }
 0x3c0   : > { %v2442_v62 = vadd.f32 %v2441_v59, %v2440_v54  ;;  %v2498_v42 = vrot.slane %v2497_v50, 1 }
 0x3c2   : > { %v2443_v60 = vadd.f32 %v2442_v62, %v2405_v40  ;;  %v2499_v41 = vadd.f32 %v2498_v42, %v2497_v50 }
 0x3c4   : > { %2445 = vst.msk [vmem:[%s3024_s20] sm:$0x1] %vm2444_vm15, %v2443_v60  ;;  %v2500_v26 = vadd.f32 %v2499_v41, %v2446_v28 }
 0x3c6   : > { %2501 = vst.msk [vmem:[%s3029_s30] sm:$0x1] %vm2444_vm15, %v2500_v26 }
 0x3c7 PF: > { %s18_s28 = sadd.s32 1, %s2927_s28   ;;  %s5333_s29 = sld [smem:[#allocation4_spill]] }
 0x3c8   : > { %p15_p8 = scmp.ge.s32.totalorder %s18_s28, 6   ;;  %s5334_s10 = sld [smem:[#allocation5_spill]] }
 0x3c9   : > { %s5335_s24 = smov %s2919_s26  ;;  %s5336_s25 = smov %s2923_s27 }
 0x3ca   :  { %17 = sbr.rel (!%p15_p8) target bundleno = 3 (0x3), region = 105 }
 0x3cd   : > { %s5337_s26 = smov %s5333_s29 }
 0x3ce   : > { %s5338_s27 = smov %s5334_s10 }

</bundles_post_ra>
